<compile_context>
chip_gen: v6e
topology: v6e:2x2x1
jax: 0.10.0
libtpu: 0.0.40
codegen_flags: <defaults>
</compile_context>

<pallas_src>
import jax
import jax.numpy as jnp
from jax import lax
from jax.experimental import pallas as pl
from jax.experimental.pallas import tpu as pltpu


# ----------------------------------------------------------------------------
# Fused Pallas kernel: one batch element per grid step.
# ----------------------------------------------------------------------------
def fused_cnn_kernel(p1_ref, w1_ref, b1_ref, w2_ref, b2_ref,
                     wf1_ref, bf1_ref, wf2_ref, bf2_ref, o_ref):
    f32 = jnp.float32

    # ---- conv1: ONE matmul over all 14*14 output positions ----------------
    p1 = p1_ref[0]                                                  # [196, 64]
    y1 = jnp.dot(p1, w1_ref[...], preferred_element_type=f32) + b1_ref[...]
    y1 = jnp.maximum(y1, 0.0).reshape(14, 14, 16)                   # [14,14,16]

    # ---- max_pool2d(2, stride=1): max of 4 shifted in-register views -------
    pool1 = jnp.maximum(
        jnp.maximum(y1[:13, :13, :], y1[:13, 1:, :]),
        jnp.maximum(y1[1:, :13, :], y1[1:, 1:, :]))                 # [13,13,16]

    # ---- conv2, evaluated densely at stride 1 ------------------------------
    # im2col via 16 contiguous shifted windows concatenated along lanes
    # (patch order (kh*4+kw)*16+ci matches the reshaped conv2 weight), then
    # ONE matmul.  The stride-2 subsample is handled later by zero rows of the
    # expanded fc1 weight, so no strided slicing is needed inside the kernel.
    cols = [pool1[kh:kh + 10, kw:kw + 10, :]
            for kh in range(4) for kw in range(4)]
    p2 = jnp.concatenate(cols, axis=-1)                             # [10,10,256]
    p2 = p2.reshape(100, 256)
    y2 = jnp.dot(p2, w2_ref[...], preferred_element_type=f32) + b2_ref[...]
    y2 = jnp.maximum(y2, 0.0).reshape(10, 10, 32)                   # [10,10,32]

    # ---- pool2 on the stride-2 grid == max over {0,2}x{0,2} shifts ----------
    # m[2i,2j,c] equals PyTorch's pool2 output (i,j,c); odd rows/cols of m are
    # multiplied by zero rows of the expanded fc1 weight.
    m = jnp.maximum(
        jnp.maximum(y2[:8, :8, :], y2[:8, 2:, :]),
        jnp.maximum(y2[2:, :8, :], y2[2:, 2:, :]))                  # [8,8,32]

    # ---- lane-dense flatten via 2-level concat: index = v*256 + u*32 + c ----
    rows = jnp.concatenate([m[u] for u in range(8)], axis=-1)       # [8, 256]
    flat = jnp.concatenate([rows[v:v + 1, :] for v in range(8)],
                           axis=-1)                                 # [1, 2048]

    # ---- fc1 + ReLU + fc2 + log_softmax -------------------------------------
    h1 = jnp.dot(flat, wf1_ref[...], preferred_element_type=f32) + bf1_ref[...]
    h1 = jnp.maximum(h1, 0.0)                                       # [1, 32]
    z = jnp.dot(h1, wf2_ref[...], preferred_element_type=f32) + bf2_ref[...]
    zmax = jnp.max(z, axis=-1, keepdims=True)
    lse = jnp.log(jnp.sum(jnp.exp(z - zmax), axis=-1, keepdims=True)) + zmax
    o_ref[0] = z - lse                                              # [1, 10]


# ----------------------------------------------------------------------------
# JAX glue: layout-only prep (im2col for conv1, weight reshapes) + pallas_call
# ----------------------------------------------------------------------------
def im2col(x_nhwc, k, stride, pad=0):
    if pad:
        x_nhwc = jnp.pad(x_nhwc, ((0, 0), (pad, pad), (pad, pad), (0, 0)))
    bsz, hh, ww, c = x_nhwc.shape
    oh = (hh - k) // stride + 1
    ow = (ww - k) // stride + 1
    cols = []
    for a in range(k):
        for b in range(k):
            cols.append(
                x_nhwc[:, a:a + stride * (oh - 1) + 1:stride,
                       b:b + stride * (ow - 1) + 1:stride, :])
    p = jnp.stack(cols, axis=3)                       # [B, oh, ow, k*k, C]
    return p.reshape(bsz, oh, ow, k * k * c), oh, ow


def cnn_mnist_forward(x_nchw, params):
    (w1, b1, w2, b2, wf1, bf1, wf2, bf2) = params
    bsz = x_nchw.shape[0]

    x = jnp.transpose(x_nchw, (0, 2, 3, 1))                       # NCHW -> NHWC
    p1, oh1, ow1 = im2col(x, 8, 2, pad=3)                         # [B,14,14,64]
    p1 = p1.reshape(bsz, oh1 * ow1, 64)                           # [B,196,64]

    # PyTorch conv weight [Cout, Cin, KH, KW] -> matrix [KH*KW*Cin, Cout]
    w1m = jnp.transpose(w1, (2, 3, 1, 0)).reshape(-1, w1.shape[0])  # [64, 16]
    w2m = jnp.transpose(w2, (2, 3, 1, 0)).reshape(-1, w2.shape[0])  # [256, 32]

    # fc1 weight: absorb (a) PyTorch's NCHW flatten order, (b) the kernel's
    # (v,u,c) lane-flatten order, and (c) the stride-2 subsample of the dense
    # conv2 output (zero rows at odd u/v positions).
    wr = wf1.reshape(32, 32, 4, 4).transpose(3, 2, 1, 0)          # [j, i, c, o]
    wexp = jnp.zeros((8, 8, 32, 32), jnp.float32).at[::2, ::2, :, :].set(wr)
    wexp = wexp.reshape(8 * 8 * 32, 32)                           # [2048, 32]

    out = pl.pallas_call(
        fused_cnn_kernel,
        out_shape=jax.ShapeDtypeStruct((bsz, 1, 10), jnp.float32),
        grid=(bsz,),
        in_specs=[
            pl.BlockSpec((1, 196, 64), lambda b: (b, 0, 0)),
            pl.BlockSpec((64, 16), lambda b: (0, 0)),
            pl.BlockSpec((1, 16), lambda b: (0, 0)),
            pl.BlockSpec((256, 32), lambda b: (0, 0)),
            pl.BlockSpec((1, 32), lambda b: (0, 0)),
            pl.BlockSpec((2048, 32), lambda b: (0, 0)),
            pl.BlockSpec((1, 32), lambda b: (0, 0)),
            pl.BlockSpec((32, 10), lambda b: (0, 0)),
            pl.BlockSpec((1, 10), lambda b: (0, 0)),
        ],
        out_specs=pl.BlockSpec((1, 1, 10), lambda b: (b, 0, 0)),
        compiler_params=pltpu.CompilerParams(
            dimension_semantics=("parallel",)),
        cost_estimate=pl.CostEstimate(
            flops=2 * bsz * (196 * 64 * 16 + 100 * 256 * 32
                             + 2048 * 32 + 32 * 10),
            transcendentals=bsz * 11,
            bytes_accessed=4 * (bsz * 196 * 64 + 64 * 16 + 256 * 32
                                + 2048 * 32 + 32 * 10 + bsz * 10)),
    )(p1, w1m, b1.reshape(1, -1), w2m, b2.reshape(1, -1),
      wexp, bf1.reshape(1, -1), wf2.T, bf2.reshape(1, -1))
    return out.reshape(bsz, 10)


# ----------------------------------------------------------------------------
# Deterministic parameter init (shapes from CNNMnist.__init__) + pure-JAX ref
# ----------------------------------------------------------------------------
def init_params(key):
    ks = jax.random.split(key, 8)
    sc = 0.05
    w1 = jax.random.normal(ks[0], (16, 1, 8, 8), jnp.float32) * sc
    b1 = jax.random.normal(ks[1], (16,), jnp.float32) * sc
    w2 = jax.random.normal(ks[2], (32, 16, 4, 4), jnp.float32) * sc
    b2 = jax.random.normal(ks[3], (32,), jnp.float32) * sc
    wf1 = jax.random.normal(ks[4], (32, 512), jnp.float32) * sc
    bf1 = jax.random.normal(ks[5], (32,), jnp.float32) * sc
    wf2 = jax.random.normal(ks[6], (10, 32), jnp.float32) * sc
    bf2 = jax.random.normal(ks[7], (10,), jnp.float32) * sc
    return (w1, b1, w2, b2, wf1, bf1, wf2, bf2)


def reference_forward(x, params):
    (w1, b1, w2, b2, wf1, bf1, wf2, bf2) = params
    dn = ("NCHW", "OIHW", "NCHW")
    y = lax.conv_general_dilated(x, w1, (2, 2), ((3, 3), (3, 3)),
                                 dimension_numbers=dn)
    y = jnp.maximum(y + b1[None, :, None, None], 0.0)
    y = lax.reduce_window(y, -jnp.inf, lax.max, (1, 1, 2, 2), (1, 1, 1, 1), "VALID")
    y = lax.conv_general_dilated(y, w2, (2, 2), "VALID", dimension_numbers=dn)
    y = jnp.maximum(y + b2[None, :, None, None], 0.0)
    y = lax.reduce_window(y, -jnp.inf, lax.max, (1, 1, 2, 2), (1, 1, 1, 1), "VALID")
    y = y.reshape(y.shape[0], -1)
    y = jnp.maximum(y @ wf1.T + bf1, 0.0)
    y = y @ wf2.T + bf2
    return jax.nn.log_softmax(y, axis=1)


if __name__ == "__main__":
    key = jax.random.PRNGKey(0)
    kp, kx = jax.random.split(key)
    params = init_params(kp)
    # Spatial size must be 28 so the flatten hits 32*4*4 = 512 features.
    x = jax.random.normal(kx, (2, 1, 28, 28), jnp.float32)

    out = jax.jit(cnn_mnist_forward)(x, params)
    out = jax.block_until_ready(out)

    ref = reference_forward(x, params)
    assert out.shape == (2, 10), out.shape
    err = float(jnp.max(jnp.abs(out - ref)))
    assert jnp.allclose(out, ref, atol=1e-4, rtol=1e-4), f"max abs err {err}"
    print("KERNEL_OK")
</pallas_src>

<mosaic_0001>
module attributes {stable_mosaic.version = 11 : i64} {
  func.func @fused_cnn_kernel(%arg0: i32, %arg1: memref<1x196x64xf32, #tpu.memory_space<vmem>>, %arg2: memref<64x16xf32, #tpu.memory_space<vmem>>, %arg3: memref<1x16xf32, #tpu.memory_space<vmem>>, %arg4: memref<256x32xf32, #tpu.memory_space<vmem>>, %arg5: memref<1x32xf32, #tpu.memory_space<vmem>>, %arg6: memref<2048x32xf32, #tpu.memory_space<vmem>>, %arg7: memref<1x32xf32, #tpu.memory_space<vmem>>, %arg8: memref<32x10xf32, #tpu.memory_space<vmem>>, %arg9: memref<1x10xf32, #tpu.memory_space<vmem>>, %arg10: memref<1x1x10xf32, #tpu.memory_space<vmem>>) attributes {dimension_semantics = [#tpu.dimension_semantics<parallel>], iteration_bounds = array<i64: 2>, scalar_prefetch = 0 : i64, scratch_operands = 0 : i64, tpu.core_type = #tpu.core_type<tc>, window_params = [{transform_indices = @transform_0, window_bounds = array<i64: 1, 196, 64>}, {pipeline_mode = #tpu.pipeline_mode<synchronous>, transform_indices = @transform_1, window_bounds = array<i64: 64, 16>}, {pipeline_mode = #tpu.pipeline_mode<synchronous>, transform_indices = @transform_2, window_bounds = array<i64: 1, 16>}, {pipeline_mode = #tpu.pipeline_mode<synchronous>, transform_indices = @transform_3, window_bounds = array<i64: 256, 32>}, {pipeline_mode = #tpu.pipeline_mode<synchronous>, transform_indices = @transform_4, window_bounds = array<i64: 1, 32>}, {pipeline_mode = #tpu.pipeline_mode<synchronous>, transform_indices = @transform_5, window_bounds = array<i64: 2048, 32>}, {pipeline_mode = #tpu.pipeline_mode<synchronous>, transform_indices = @transform_6, window_bounds = array<i64: 1, 32>}, {pipeline_mode = #tpu.pipeline_mode<synchronous>, transform_indices = @transform_7, window_bounds = array<i64: 32, 10>}, {pipeline_mode = #tpu.pipeline_mode<synchronous>, transform_indices = @transform_8, window_bounds = array<i64: 1, 10>}, {transform_indices = @transform_9, window_bounds = array<i64: 1, 1, 10>}]} {
    %c0 = arith.constant 0 : index
    %c0_0 = arith.constant 0 : index
    %c0_1 = arith.constant 0 : index
    %0 = vector.load %arg1[%c0, %c0_0, %c0_1] : memref<1x196x64xf32, #tpu.memory_space<vmem>>, vector<1x196x64xf32>
    %1 = vector.shape_cast %0 : vector<1x196x64xf32> to vector<196x64xf32>
    %c0_2 = arith.constant 0 : index
    %c0_3 = arith.constant 0 : index
    %2 = vector.load %arg2[%c0_2, %c0_3] : memref<64x16xf32, #tpu.memory_space<vmem>>, vector<64x16xf32>
    %cst = arith.constant dense<0.000000e+00> : vector<196x16xf32>
    %3 = tpu.matmul %1, %2, %cst {dimension_numbers = #tpu.dot_dimension_numbers<[1], [0], [0], [1], [0, 0, 1, 1], [], []>} : vector<196x64xf32>, vector<64x16xf32>, vector<196x16xf32> -> vector<196x16xf32>
    %c0_4 = arith.constant 0 : index
    %c0_5 = arith.constant 0 : index
    %4 = vector.load %arg3[%c0_4, %c0_5] : memref<1x16xf32, #tpu.memory_space<vmem>>, vector<1x16xf32>
    %5 = vector.broadcast %4 : vector<1x16xf32> to vector<196x16xf32>
    %6 = arith.addf %3, %5 : vector<196x16xf32>
    %cst_6 = arith.constant 0.000000e+00 : f32
    %7 = vector.broadcast %cst_6 : f32 to vector<196x16xf32>
    %8 = arith.maximumf %6, %7 : vector<196x16xf32>
    %9 = vector.shape_cast %8 : vector<196x16xf32> to vector<14x14x16xf32>
    %10 = vector.extract_strided_slice %9 {offsets = [0, 0, 0], sizes = [13, 13, 16], strides = [1, 1, 1]} : vector<14x14x16xf32> to vector<13x13x16xf32>
    %11 = vector.extract_strided_slice %9 {offsets = [0, 1, 0], sizes = [13, 13, 16], strides = [1, 1, 1]} : vector<14x14x16xf32> to vector<13x13x16xf32>
    %12 = arith.maximumf %10, %11 : vector<13x13x16xf32>
    %13 = vector.extract_strided_slice %9 {offsets = [1, 0, 0], sizes = [13, 13, 16], strides = [1, 1, 1]} : vector<14x14x16xf32> to vector<13x13x16xf32>
    %14 = vector.extract_strided_slice %9 {offsets = [1, 1, 0], sizes = [13, 13, 16], strides = [1, 1, 1]} : vector<14x14x16xf32> to vector<13x13x16xf32>
    %15 = arith.maximumf %13, %14 : vector<13x13x16xf32>
    %16 = arith.maximumf %12, %15 : vector<13x13x16xf32>
    %17 = vector.extract_strided_slice %16 {offsets = [0, 0, 0], sizes = [10, 10, 16], strides = [1, 1, 1]} : vector<13x13x16xf32> to vector<10x10x16xf32>
    %18 = vector.extract_strided_slice %16 {offsets = [0, 1, 0], sizes = [10, 10, 16], strides = [1, 1, 1]} : vector<13x13x16xf32> to vector<10x10x16xf32>
    %19 = vector.extract_strided_slice %16 {offsets = [0, 2, 0], sizes = [10, 10, 16], strides = [1, 1, 1]} : vector<13x13x16xf32> to vector<10x10x16xf32>
    %20 = vector.extract_strided_slice %16 {offsets = [0, 3, 0], sizes = [10, 10, 16], strides = [1, 1, 1]} : vector<13x13x16xf32> to vector<10x10x16xf32>
    %21 = vector.extract_strided_slice %16 {offsets = [1, 0, 0], sizes = [10, 10, 16], strides = [1, 1, 1]} : vector<13x13x16xf32> to vector<10x10x16xf32>
    %22 = vector.extract_strided_slice %16 {offsets = [1, 1, 0], sizes = [10, 10, 16], strides = [1, 1, 1]} : vector<13x13x16xf32> to vector<10x10x16xf32>
    %23 = vector.extract_strided_slice %16 {offsets = [1, 2, 0], sizes = [10, 10, 16], strides = [1, 1, 1]} : vector<13x13x16xf32> to vector<10x10x16xf32>
    %24 = vector.extract_strided_slice %16 {offsets = [1, 3, 0], sizes = [10, 10, 16], strides = [1, 1, 1]} : vector<13x13x16xf32> to vector<10x10x16xf32>
    %25 = vector.extract_strided_slice %16 {offsets = [2, 0, 0], sizes = [10, 10, 16], strides = [1, 1, 1]} : vector<13x13x16xf32> to vector<10x10x16xf32>
    %26 = vector.extract_strided_slice %16 {offsets = [2, 1, 0], sizes = [10, 10, 16], strides = [1, 1, 1]} : vector<13x13x16xf32> to vector<10x10x16xf32>
    %27 = vector.extract_strided_slice %16 {offsets = [2, 2, 0], sizes = [10, 10, 16], strides = [1, 1, 1]} : vector<13x13x16xf32> to vector<10x10x16xf32>
    %28 = vector.extract_strided_slice %16 {offsets = [2, 3, 0], sizes = [10, 10, 16], strides = [1, 1, 1]} : vector<13x13x16xf32> to vector<10x10x16xf32>
    %29 = vector.extract_strided_slice %16 {offsets = [3, 0, 0], sizes = [10, 10, 16], strides = [1, 1, 1]} : vector<13x13x16xf32> to vector<10x10x16xf32>
    %30 = vector.extract_strided_slice %16 {offsets = [3, 1, 0], sizes = [10, 10, 16], strides = [1, 1, 1]} : vector<13x13x16xf32> to vector<10x10x16xf32>
    %31 = vector.extract_strided_slice %16 {offsets = [3, 2, 0], sizes = [10, 10, 16], strides = [1, 1, 1]} : vector<13x13x16xf32> to vector<10x10x16xf32>
    %32 = vector.extract_strided_slice %16 {offsets = [3, 3, 0], sizes = [10, 10, 16], strides = [1, 1, 1]} : vector<13x13x16xf32> to vector<10x10x16xf32>
    %33 = tpu.concatenate %17, %18, %19, %20, %21, %22, %23, %24, %25, %26, %27, %28, %29, %30, %31, %32 in 2 : vector<10x10x16xf32>, vector<10x10x16xf32>, vector<10x10x16xf32>, vector<10x10x16xf32>, vector<10x10x16xf32>, vector<10x10x16xf32>, vector<10x10x16xf32>, vector<10x10x16xf32>, vector<10x10x16xf32>, vector<10x10x16xf32>, vector<10x10x16xf32>, vector<10x10x16xf32>, vector<10x10x16xf32>, vector<10x10x16xf32>, vector<10x10x16xf32>, vector<10x10x16xf32> -> vector<10x10x256xf32>
    %34 = vector.shape_cast %33 : vector<10x10x256xf32> to vector<100x256xf32>
    %c0_7 = arith.constant 0 : index
    %c0_8 = arith.constant 0 : index
    %35 = vector.load %arg4[%c0_7, %c0_8] : memref<256x32xf32, #tpu.memory_space<vmem>>, vector<256x32xf32>
    %cst_9 = arith.constant dense<0.000000e+00> : vector<100x32xf32>
    %36 = tpu.matmul %34, %35, %cst_9 {dimension_numbers = #tpu.dot_dimension_numbers<[1], [0], [0], [1], [0, 0, 1, 1], [], []>} : vector<100x256xf32>, vector<256x32xf32>, vector<100x32xf32> -> vector<100x32xf32>
    %c0_10 = arith.constant 0 : index
    %c0_11 = arith.constant 0 : index
    %37 = vector.load %arg5[%c0_10, %c0_11] : memref<1x32xf32, #tpu.memory_space<vmem>>, vector<1x32xf32>
    %38 = vector.broadcast %37 : vector<1x32xf32> to vector<100x32xf32>
    %39 = arith.addf %36, %38 : vector<100x32xf32>
    %cst_12 = arith.constant 0.000000e+00 : f32
    %40 = vector.broadcast %cst_12 : f32 to vector<100x32xf32>
    %41 = arith.maximumf %39, %40 : vector<100x32xf32>
    %42 = vector.shape_cast %41 : vector<100x32xf32> to vector<10x10x32xf32>
    %43 = vector.extract_strided_slice %42 {offsets = [0, 0, 0], sizes = [8, 8, 32], strides = [1, 1, 1]} : vector<10x10x32xf32> to vector<8x8x32xf32>
    %44 = vector.extract_strided_slice %42 {offsets = [0, 2, 0], sizes = [8, 8, 32], strides = [1, 1, 1]} : vector<10x10x32xf32> to vector<8x8x32xf32>
    %45 = arith.maximumf %43, %44 : vector<8x8x32xf32>
    %46 = vector.extract_strided_slice %42 {offsets = [2, 0, 0], sizes = [8, 8, 32], strides = [1, 1, 1]} : vector<10x10x32xf32> to vector<8x8x32xf32>
    %47 = vector.extract_strided_slice %42 {offsets = [2, 2, 0], sizes = [8, 8, 32], strides = [1, 1, 1]} : vector<10x10x32xf32> to vector<8x8x32xf32>
    %48 = arith.maximumf %46, %47 : vector<8x8x32xf32>
    %49 = arith.maximumf %45, %48 : vector<8x8x32xf32>
    %50 = vector.extract_strided_slice %49 {offsets = [0, 0, 0], sizes = [1, 8, 32], strides = [1, 1, 1]} : vector<8x8x32xf32> to vector<1x8x32xf32>
    %51 = vector.shape_cast %50 : vector<1x8x32xf32> to vector<8x32xf32>
    %52 = vector.extract_strided_slice %49 {offsets = [1, 0, 0], sizes = [1, 8, 32], strides = [1, 1, 1]} : vector<8x8x32xf32> to vector<1x8x32xf32>
    %53 = vector.shape_cast %52 : vector<1x8x32xf32> to vector<8x32xf32>
    %54 = vector.extract_strided_slice %49 {offsets = [2, 0, 0], sizes = [1, 8, 32], strides = [1, 1, 1]} : vector<8x8x32xf32> to vector<1x8x32xf32>
    %55 = vector.shape_cast %54 : vector<1x8x32xf32> to vector<8x32xf32>
    %56 = vector.extract_strided_slice %49 {offsets = [3, 0, 0], sizes = [1, 8, 32], strides = [1, 1, 1]} : vector<8x8x32xf32> to vector<1x8x32xf32>
    %57 = vector.shape_cast %56 : vector<1x8x32xf32> to vector<8x32xf32>
    %58 = vector.extract_strided_slice %49 {offsets = [4, 0, 0], sizes = [1, 8, 32], strides = [1, 1, 1]} : vector<8x8x32xf32> to vector<1x8x32xf32>
    %59 = vector.shape_cast %58 : vector<1x8x32xf32> to vector<8x32xf32>
    %60 = vector.extract_strided_slice %49 {offsets = [5, 0, 0], sizes = [1, 8, 32], strides = [1, 1, 1]} : vector<8x8x32xf32> to vector<1x8x32xf32>
    %61 = vector.shape_cast %60 : vector<1x8x32xf32> to vector<8x32xf32>
    %62 = vector.extract_strided_slice %49 {offsets = [6, 0, 0], sizes = [1, 8, 32], strides = [1, 1, 1]} : vector<8x8x32xf32> to vector<1x8x32xf32>
    %63 = vector.shape_cast %62 : vector<1x8x32xf32> to vector<8x32xf32>
    %64 = vector.extract_strided_slice %49 {offsets = [7, 0, 0], sizes = [1, 8, 32], strides = [1, 1, 1]} : vector<8x8x32xf32> to vector<1x8x32xf32>
    %65 = vector.shape_cast %64 : vector<1x8x32xf32> to vector<8x32xf32>
    %66 = tpu.concatenate %51, %53, %55, %57, %59, %61, %63, %65 in 1 : vector<8x32xf32>, vector<8x32xf32>, vector<8x32xf32>, vector<8x32xf32>, vector<8x32xf32>, vector<8x32xf32>, vector<8x32xf32>, vector<8x32xf32> -> vector<8x256xf32>
    %67 = vector.extract_strided_slice %66 {offsets = [0, 0], sizes = [1, 256], strides = [1, 1]} : vector<8x256xf32> to vector<1x256xf32>
    %68 = vector.extract_strided_slice %66 {offsets = [1, 0], sizes = [1, 256], strides = [1, 1]} : vector<8x256xf32> to vector<1x256xf32>
    %69 = vector.extract_strided_slice %66 {offsets = [2, 0], sizes = [1, 256], strides = [1, 1]} : vector<8x256xf32> to vector<1x256xf32>
    %70 = vector.extract_strided_slice %66 {offsets = [3, 0], sizes = [1, 256], strides = [1, 1]} : vector<8x256xf32> to vector<1x256xf32>
    %71 = vector.extract_strided_slice %66 {offsets = [4, 0], sizes = [1, 256], strides = [1, 1]} : vector<8x256xf32> to vector<1x256xf32>
    %72 = vector.extract_strided_slice %66 {offsets = [5, 0], sizes = [1, 256], strides = [1, 1]} : vector<8x256xf32> to vector<1x256xf32>
    %73 = vector.extract_strided_slice %66 {offsets = [6, 0], sizes = [1, 256], strides = [1, 1]} : vector<8x256xf32> to vector<1x256xf32>
    %74 = vector.extract_strided_slice %66 {offsets = [7, 0], sizes = [1, 256], strides = [1, 1]} : vector<8x256xf32> to vector<1x256xf32>
    %75 = tpu.concatenate %67, %68, %69, %70, %71, %72, %73, %74 in 1 : vector<1x256xf32>, vector<1x256xf32>, vector<1x256xf32>, vector<1x256xf32>, vector<1x256xf32>, vector<1x256xf32>, vector<1x256xf32>, vector<1x256xf32> -> vector<1x2048xf32>
    %c0_13 = arith.constant 0 : index
    %c0_14 = arith.constant 0 : index
    %76 = vector.load %arg6[%c0_13, %c0_14] : memref<2048x32xf32, #tpu.memory_space<vmem>>, vector<2048x32xf32>
    %cst_15 = arith.constant dense<0.000000e+00> : vector<1x32xf32>
    %77 = tpu.matmul %75, %76, %cst_15 {dimension_numbers = #tpu.dot_dimension_numbers<[1], [0], [0], [1], [0, 0, 1, 1], [], []>} : vector<1x2048xf32>, vector<2048x32xf32>, vector<1x32xf32> -> vector<1x32xf32>
    %c0_16 = arith.constant 0 : index
    %c0_17 = arith.constant 0 : index
    %78 = vector.load %arg7[%c0_16, %c0_17] : memref<1x32xf32, #tpu.memory_space<vmem>>, vector<1x32xf32>
    %79 = arith.addf %77, %78 : vector<1x32xf32>
    %cst_18 = arith.constant 0.000000e+00 : f32
    %80 = vector.broadcast %cst_18 : f32 to vector<1x32xf32>
    %81 = arith.maximumf %79, %80 : vector<1x32xf32>
    %c0_19 = arith.constant 0 : index
    %c0_20 = arith.constant 0 : index
    %82 = vector.load %arg8[%c0_19, %c0_20] : memref<32x10xf32, #tpu.memory_space<vmem>>, vector<32x10xf32>
    %cst_21 = arith.constant dense<0.000000e+00> : vector<1x10xf32>
    %83 = tpu.matmul %81, %82, %cst_21 {dimension_numbers = #tpu.dot_dimension_numbers<[1], [0], [0], [1], [0, 0, 1, 1], [], []>} : vector<1x32xf32>, vector<32x10xf32>, vector<1x10xf32> -> vector<1x10xf32>
    %c0_22 = arith.constant 0 : index
    %c0_23 = arith.constant 0 : index
    %84 = vector.load %arg9[%c0_22, %c0_23] : memref<1x10xf32, #tpu.memory_space<vmem>>, vector<1x10xf32>
    %85 = arith.addf %83, %84 : vector<1x10xf32>
    %cst_24 = arith.constant dense<0xFF800000> : vector<1xf32>
    %86 = vector.multi_reduction <maximumf>, %85, %cst_24 [1] : vector<1x10xf32> to vector<1xf32>
    %87 = vector.shape_cast %86 : vector<1xf32> to vector<1x1xf32>
    %88 = vector.broadcast %87 : vector<1x1xf32> to vector<1x10xf32>
    %89 = arith.subf %85, %88 : vector<1x10xf32>
    %90 = math.exp %89 : vector<1x10xf32>
    %cst_25 = arith.constant dense<0.000000e+00> : vector<1xf32>
    %91 = vector.multi_reduction <add>, %90, %cst_25 [1] : vector<1x10xf32> to vector<1xf32>
    %92 = vector.shape_cast %91 : vector<1xf32> to vector<1x1xf32>
    %93 = math.log %92 : vector<1x1xf32>
    %94 = arith.addf %93, %87 : vector<1x1xf32>
    %95 = vector.broadcast %94 : vector<1x1xf32> to vector<1x10xf32>
    %96 = arith.subf %85, %95 : vector<1x10xf32>
    %c0_26 = arith.constant 0 : index
    %c0_27 = arith.constant 0 : index
    %c0_28 = arith.constant 0 : index
    %97 = vector.load %arg10[%c0_26, %c0_27, %c0_28] : memref<1x1x10xf32, #tpu.memory_space<vmem>>, vector<1x1x10xf32>
    %98 = vector.shape_cast %97 : vector<1x1x10xf32> to vector<1x10xf32>
    %99 = vector.shape_cast %96 : vector<1x10xf32> to vector<1x1x10xf32>
    tpu.vector_store %arg10[%c0_26, %c0_27, %c0_28], %99 {strides = array<i32>} : memref<1x1x10xf32, #tpu.memory_space<vmem>>, vector<1x1x10xf32>,
    return
  }
  func.func @transform_0(%arg0: i32) -> (i32, i32, i32) {
    %c0_i32 = arith.constant 0 : i32
    %c0_i32_0 = arith.constant 0 : i32
    %c0_i32_1 = arith.constant 0 : i32
    return %arg0, %c0_i32, %c0_i32_0 : i32, i32, i32
  }
  func.func @transform_1(%arg0: i32) -> (i32, i32) {
    %c0_i32 = arith.constant 0 : i32
    %c0_i32_0 = arith.constant 0 : i32
    %c0_i32_1 = arith.constant 0 : i32
    return %c0_i32, %c0_i32_0 : i32, i32
  }
  func.func @transform_2(%arg0: i32) -> (i32, i32) {
    %c0_i32 = arith.constant 0 : i32
    %c0_i32_0 = arith.constant 0 : i32
    %c0_i32_1 = arith.constant 0 : i32
    return %c0_i32, %c0_i32_0 : i32, i32
  }
  func.func @transform_3(%arg0: i32) -> (i32, i32) {
    %c0_i32 = arith.constant 0 : i32
    %c0_i32_0 = arith.constant 0 : i32
    %c0_i32_1 = arith.constant 0 : i32
    return %c0_i32, %c0_i32_0 : i32, i32
  }
  func.func @transform_4(%arg0: i32) -> (i32, i32) {
    %c0_i32 = arith.constant 0 : i32
    %c0_i32_0 = arith.constant 0 : i32
    %c0_i32_1 = arith.constant 0 : i32
    return %c0_i32, %c0_i32_0 : i32, i32
  }
  func.func @transform_5(%arg0: i32) -> (i32, i32) {
    %c0_i32 = arith.constant 0 : i32
    %c0_i32_0 = arith.constant 0 : i32
    %c0_i32_1 = arith.constant 0 : i32
    return %c0_i32, %c0_i32_0 : i32, i32
  }
  func.func @transform_6(%arg0: i32) -> (i32, i32) {
    %c0_i32 = arith.constant 0 : i32
    %c0_i32_0 = arith.constant 0 : i32
    %c0_i32_1 = arith.constant 0 : i32
    return %c0_i32, %c0_i32_0 : i32, i32
  }
  func.func @transform_7(%arg0: i32) -> (i32, i32) {
    %c0_i32 = arith.constant 0 : i32
    %c0_i32_0 = arith.constant 0 : i32
    %c0_i32_1 = arith.constant 0 : i32
    return %c0_i32, %c0_i32_0 : i32, i32
  }
  func.func @transform_8(%arg0: i32) -> (i32, i32) {
    %c0_i32 = arith.constant 0 : i32
    %c0_i32_0 = arith.constant 0 : i32
    %c0_i32_1 = arith.constant 0 : i32
    return %c0_i32, %c0_i32_0 : i32, i32
  }
  func.func @transform_9(%arg0: i32) -> (i32, i32, i32) {
    %c0_i32 = arith.constant 0 : i32
    %c0_i32_0 = arith.constant 0 : i32
    %c0_i32_1 = arith.constant 0 : i32
    return %arg0, %c0_i32, %c0_i32_0 : i32, i32, i32
  }
}

</mosaic_0001>

<bundles_post_ra>
// kernel: cnn_mnist_forward.1
= control target key start
LH: loop header
LB: loop body
LE: loop exit
PB: predicated region body
PF: predicated region fallthrough
CT: control target
= control target key end

     0   :  { %14 = vsyncpa [#allocation3], 0  ;;  %s10287_s0 = inlined_call_operand.vmem [shape: f32[2,196,64], index: 0, kind: input, shape index: {}]   ;;  %s10288_s1 = inlined_call_operand.vmem [shape: f32[64,16], index: 1, kind: input, shape index: {}]   ;;  %s10289_s2 = inlined_call_operand.vmem [shape: f32[1,16], index: 2, kind: input, shape index: {}]   ;;  %s10290_s3 = inlined_call_operand.vmem [shape: f32[256,32], index: 3, kind: input, shape index: {}]   ;;  %s10291_s4 = inlined_call_operand.vmem [shape: f32[1,32], index: 4, kind: input, shape index: {}]   ;;  %s10292_s5 = inlined_call_operand.vmem [shape: f32[2048,32], index: 5, kind: input, shape index: {}]   ;;  %s10293_s6 = inlined_call_operand.vmem [shape: f32[1,32], index: 6, kind: input, shape index: {}]   ;;  %s10294_s7 = inlined_call_operand.vmem [shape: f32[32,10], index: 7, kind: input, shape index: {}]   ;;  %s10295_s8 = inlined_call_operand.vmem [shape: f32[1,10], index: 8, kind: input, shape index: {}]   ;;  %s10296_s9 = inlined_call_operand.hbm [shape: f32[2,1,10], index: 9, kind: output, shape index: {}]  }
   0x1   :  { %16 = vsyncpa [#allocation3 + $0x1], 0  ;;  %s6479_s30 = smov 0   ;;  %s6481_s10 = smov 0  }
   0x2   :  { %s6483_s11 = smov 0   ;;  %s6485_s12 = smov 0  }
   0x3 LB: > { %s6500_s13 = sadd.s32 4294967295, %s6416_s12   ;;  %s5745_s14 = sadd.s32 4294967294, %s6416_s12   ;;  %s6416_s12 = sphi %s6485_s12, %s10570_s12   ;;  %s6412_s11 = sphi %s6483_s11, %s10569_s11   ;;  %s6408_s10 = sphi %s6481_s10, %s10568_s10   ;;  %s6404_s30 = sphi %s6479_s30, %s10567_s30  }
   0x4   : > { %s6504_s15 = sadd.s32 1, %s6416_s12   ;;  %s223_s16 = sadd.s32 1, %s6412_s11 }
   0x5   : > { %s220_s17 = ssub.s32 %s6416_s12, %s6504_s15  ;;  %p233_p0 = scmp.ne.s32.totalorder %s6412_s11, %s6408_s10 }
   0x6   : > { %p221_p1 = scmp.eq.s32.totalorder %s220_s17, 0  ;;  %p234_p2 = scmp.eq.s32.totalorder %s6500_s13, 1 }
   0x7   : > { %p239_p3 = scmp.ne.s32.totalorder %s6408_s10, %s6404_s30  ;;  %p240_p4 = scmp.eq.s32.totalorder %s5745_s14, 1 }
   0x8   : > { %s6515_s18 = scalar_select %p221_p1, %s6412_s11, %s223_s16  }
   0x9   : > { %p6517_p5 = por %p234_p2, %p233_p0  ;;  %p6521_p6 = por %p240_p4, %p239_p3 }
   0xa   : > { %p5748_p7 = scmp.ge.s32.totalorder %s6416_s12, 1  ;;  %p290_p8 = scmp.lt.s32.totalorder %s6416_s12, 3 }
   0xc   : > { %p291_p9 = pnand %p5748_p7, %p290_p8 }
   0xe   : > { %294 = sbr.rel (%p291_p9) target bundleno = 1913 (0x779), region = 56 }
  0x13   : > { %v362_v0 = vld [vmem:[%s10288_s1 + $0x38] sm:$0xff]  ;;  %p325_p10 = scmp.lt.s32.totalorder %s6500_s13, 1  ;;  %v10297_v1 = vmov 0.0   ;;  %v361_v2 = vld [vmem:[%s10288_s1 + $0x30] sm:$0xff]  ;;  %vm6419_vm0 = vmmov 0   ;;  %v360_v3 = vld [vmem:[%s10288_s1 + $0x28] sm:$0xff]  ;;  %v690_v34 = vlaneseq }
  0x14   : > { %6184 = vmatprep.subr.mxu0 %v10297_v1  ;;  %6200 = vmatprep.mubr.msk.f32.mxu0 %vm6419_vm0, %v10297_v1  ;;  %v359_v4 = vld [vmem:[%s10288_s1 + $0x20] sm:$0xff]  ;;  %v358_v5 = vld [vmem:[%s10288_s1 + $0x18] sm:$0xff]  ;;  %v357_v6 = vld [vmem:[%s10288_s1 + $0x10] sm:$0xff]  ;;  %vm370_vm1 = vcmask 523264   ;;  %v6420_v32 = vmov 1983009808  }
  0x15   : > { %6185 = vmatpush3.msra.mxu0 %v362_v0  ;;  %s326_s27 = scalar_select %p325_p10, %s6500_s13, 1  ;;  %v356_v7 = vld [vmem:[%s10288_s1 + $0x8] sm:$0xff]  ;;  %v355_v8 = vld [vmem:[%s10288_s1] sm:$0xff]  ;;  %v688_v33 = vunpack.c.l.s4 %v6420_v32  ;;  %v691_v37 = vshrl.u32 %v690_v34, 7  ;;  %vm1200_vm2 = vcmask 1040384   ;;  %vm1201_vm3 = vcmask 1042434  }
  0x16   : > { %6186 = vmatprep.subr.mxu0 %v10297_v1  ;;  %v6667_v38 = vld [vmem:[%s10289_s2] ss:$0 sm:$0xff]  ;;  %vm1202_vm4 = vmor %vm1200_vm2, %vm1201_vm3  ;;  %vm1203_vm5 = vcmask 1044484   ;;  %vm1205_vm7 = vcmask 1046534   ;;  %vm2174_vm9 = vcmask 1046528   ;;  %s6422_s21 = smov 16  }
  0x17   : > { %6187 = vmatpush3.msra.mxu0 %v361_v2  ;;  %s6286_s17 = smul.u32 200, %s326_s27  ;;  %v689_v36 = vunpack.c.0.s8 %v688_v33  ;;  %vm1204_vm6 = vmor %vm1202_vm4, %vm1203_vm5  ;;  %s6423_s22 = smov 48   ;;  %vm3304_vm10 = vcmask 130048   ;;  %vm3325_vm11 = vcmask 261120   ;;  %vm3346_vm12 = vcmask 392192  }
  0x18   : > { %6188 = vmatprep.subr.mxu0 %v10297_v1  ;;  %vm6695_vm8 = vmor %vm1204_vm6, %vm1205_vm7  ;;  %s10371_s23 = smov 64   ;;  %s6425_s24 = smov 80   ;;  %vm3387_vm13 = vcmask 654336   ;;  %vm3408_vm14 = vcmask 785408   ;;  %vm3429_vm15 = vcmask 916480  }
  0x19   : > { %6189 = vmatpush3.msra.mxu0 %v360_v3  ;;  %s6561_s28 = scalar_lea.vmem %s10287_s0, %s6286_s17  ;;  %v6672_v42 = vsub.s32 %v689_v36, %v691_v37  ;;  %s6421_s17 = smov 32  }
  0x1a   : > { %6190 = vmatprep.subr.mxu0 %v10297_v1  ;;  %v330_v9 = vld [vmem:[%s6561_s28] sm:$0xff]  ;;  %v331_v10 = vld [vmem:[%s6561_s28 + $0x8] sm:$0xff]  ;;  %v332_v11 = vld [vmem:[%s6561_s28 + $0x10] sm:$0xff]  ;;  %s10322_s25 = smov 96   ;;  %s6427_s26 = smov 112  }
  0x1b   : > { %6191 = vmatpush3.msra.mxu0 %v359_v4  ;;  %v333_v12 = vld [vmem:[%s6561_s28 + $0x18] sm:$0xff]  ;;  %v334_v13 = vld [vmem:[%s6561_s28 + $0x20] sm:$0xff]  ;;  %v335_v14 = vld [vmem:[%s6561_s28 + $0x28] sm:$0xff]  ;;  %s10443_s16 = smov 96   ;;  %s6428_s14 = smov [#allocation2]  }
  0x1c   : > { %6192 = vmatprep.subr.mxu0 %v10297_v1  ;;  %v336_v15 = vld [vmem:[%s6561_s28 + $0x30] sm:$0xff]  ;;  %v337_v16 = vld [vmem:[%s6561_s28 + $0x38] sm:$0xff]  ;;  %v338_v17 = vld [vmem:[%s6561_s28 + $0x40] sm:$0xff] }
  0x1d   : > { %6193 = vmatpush3.msra.mxu0 %v358_v5  ;;  %v339_v18 = vld [vmem:[%s6561_s28 + $0x48] sm:$0xff]  ;;  %v340_v19 = vld [vmem:[%s6561_s28 + $0x50] sm:$0xff]  ;;  %v341_v20 = vld [vmem:[%s6561_s28 + $0x58] sm:$0xff] }
  0x1e   : > { %6194 = vmatprep.subr.mxu0 %v10297_v1  ;;  %v342_v21 = vld [vmem:[%s6561_s28 + $0x60] sm:$0xff]  ;;  %v343_v22 = vld [vmem:[%s6561_s28 + $0x68] sm:$0xff]  ;;  %v344_v23 = vld [vmem:[%s6561_s28 + $0x70] sm:$0xff] }
  0x1f   : > { %6195 = vmatpush3.msra.mxu0 %v357_v6  ;;  %v345_v24 = vld [vmem:[%s6561_s28 + $0x78] sm:$0xff]  ;;  %v346_v25 = vld [vmem:[%s6561_s28 + $0x80] sm:$0xff]  ;;  %v347_v26 = vld [vmem:[%s6561_s28 + $0x88] sm:$0xff] }
  0x20   : > { %6196 = vmatprep.subr.mxu0 %v10297_v1  ;;  %v348_v27 = vld [vmem:[%s6561_s28 + $0x90] sm:$0xff]  ;;  %v349_v28 = vld [vmem:[%s6561_s28 + $0x98] sm:$0xff]  ;;  %v350_v29 = vld [vmem:[%s6561_s28 + $0xa0] sm:$0xff] }
  0x21   : > { %6197 = vmatpush3.msra.mxu0 %v356_v7  ;;  %v351_v30 = vld [vmem:[%s6561_s28 + $0xa8] sm:$0xff]  ;;  %v352_v31 = vld [vmem:[%s6561_s28 + $0xb0] sm:$0xff]  ;;  %v353_v35 = vld [vmem:[%s6561_s28 + $0xb8] sm:$0xff] }
  0x22   : > { %6198 = vmatprep.subr.mxu0 %v10297_v1  ;;  %v354_v39 = vld [vmem:[%s6561_s28 + $0xc0] sm:$0xf]  ;;  %s6360_s28 = sshll.u32 %s6428_s14, 4  ;;  %s6361_s28 = int_to_ptr.vmem [resolvable:$false] %s6360_s28 }
  0x23   : > { %6199 = vmatpush3.msra.mxu0 %v355_v8 }
  0x24   : > { %6201 = vmatmul.mubr.msk.f32.vlgmr.msra.gmra.mxu0 %vm370_vm1, %v330_v9 }
  0x25   : > { %6203 = vmatprep.mubr.msk.f32.mxu0 %vm6419_vm0, %v10297_v1 }
  0x28   : > { %6204 = vmatmul.mubr.msk.f32.gmra.mxu0 %vm370_vm1, %v331_v10 }
  0x29   : > { %6206 = vmatprep.mubr.msk.f32.mxu0 %vm6419_vm0, %v10297_v1 }
  0x2c   : > { %6207 = vmatmul.mubr.msk.f32.gmra.mxu0 %vm370_vm1, %v332_v11 }
  0x2d   : > { %6209 = vmatprep.mubr.msk.f32.mxu0 %vm6419_vm0, %v10297_v1 }
  0x30   : > { %6210 = vmatmul.mubr.msk.f32.gmra.mxu0 %vm370_vm1, %v333_v12 }
  0x31   : > { %6212 = vmatprep.mubr.msk.f32.mxu0 %vm6419_vm0, %v10297_v1 }
  0x34   : > { %6213 = vmatmul.mubr.msk.f32.gmra.mxu0 %vm370_vm1, %v334_v13 }
  0x35   : > { %6215 = vmatprep.mubr.msk.f32.mxu0 %vm6419_vm0, %v10297_v1 }
  0x38   : > { %6216 = vmatmul.mubr.msk.f32.gmra.mxu0 %vm370_vm1, %v335_v14 }
  0x39   : > { %6218 = vmatprep.mubr.msk.f32.mxu0 %vm6419_vm0, %v10297_v1 }
  0x3c   : > { %6219 = vmatmul.mubr.msk.f32.gmra.mxu0 %vm370_vm1, %v336_v15 }
  0x3d   : > { %6221 = vmatprep.mubr.msk.f32.mxu0 %vm6419_vm0, %v10297_v1 }
  0x40   : > { %6222 = vmatmul.mubr.msk.f32.gmra.mxu0 %vm370_vm1, %v337_v16 }
  0x41   : > { %6224 = vmatprep.mubr.msk.f32.mxu0 %vm6419_vm0, %v10297_v1 }
  0x44   : > { %6225 = vmatmul.mubr.msk.f32.gmra.mxu0 %vm370_vm1, %v338_v17 }
  0x45   : > { %6227 = vmatprep.mubr.msk.f32.mxu0 %vm6419_vm0, %v10297_v1 }
  0x48   : > { %6228 = vmatmul.mubr.msk.f32.gmra.mxu0 %vm370_vm1, %v339_v18 }
  0x49   : > { %6230 = vmatprep.mubr.msk.f32.mxu0 %vm6419_vm0, %v10297_v1 }
  0x4c   : > { %6231 = vmatmul.mubr.msk.f32.gmra.mxu0 %vm370_vm1, %v340_v19 }
  0x4d   : > { %6233 = vmatprep.mubr.msk.f32.mxu0 %vm6419_vm0, %v10297_v1 }
  0x50   : > { %6234 = vmatmul.mubr.msk.f32.gmra.mxu0 %vm370_vm1, %v341_v20 }
  0x51   : > { %6236 = vmatprep.mubr.msk.f32.mxu0 %vm6419_vm0, %v10297_v1 }
  0x54   : > { %6237 = vmatmul.mubr.msk.f32.gmra.mxu0 %vm370_vm1, %v342_v21 }
  0x55   : > { %6239 = vmatprep.mubr.msk.f32.mxu0 %vm6419_vm0, %v10297_v1 }
  0x58   : > { %6240 = vmatmul.mubr.msk.f32.gmra.mxu0 %vm370_vm1, %v343_v22 }
  0x59   : > { %6242 = vmatprep.mubr.msk.f32.mxu0 %vm6419_vm0, %v10297_v1 }
  0x5c   : > { %6243 = vmatmul.mubr.msk.f32.gmra.mxu0 %vm370_vm1, %v344_v23 }
  0x5d   : > { %6245 = vmatprep.mubr.msk.f32.mxu0 %vm6419_vm0, %v10297_v1 }
  0x60   : > { %6246 = vmatmul.mubr.msk.f32.gmra.mxu0 %vm370_vm1, %v345_v24 }
  0x61   : > { %6248 = vmatprep.mubr.msk.f32.mxu0 %vm6419_vm0, %v10297_v1 }
  0x64   : > { %6249 = vmatmul.mubr.msk.f32.gmra.mxu0 %vm370_vm1, %v346_v25 }
  0x65   : > { %6251 = vmatprep.mubr.msk.f32.mxu0 %vm6419_vm0, %v10297_v1 }
  0x68   : > { %6252 = vmatmul.mubr.msk.f32.gmra.mxu0 %vm370_vm1, %v347_v26 }
  0x69   : > { %6254 = vmatprep.mubr.msk.f32.mxu0 %vm6419_vm0, %v10297_v1 }
  0x6c   : > { %6255 = vmatmul.mubr.msk.f32.gmra.mxu0 %vm370_vm1, %v348_v27 }
  0x6d   : > { %6257 = vmatprep.mubr.msk.f32.mxu0 %vm6419_vm0, %v10297_v1 }
  0x70   : > { %6258 = vmatmul.mubr.msk.f32.gmra.mxu0 %vm370_vm1, %v349_v28 }
  0x71   : > { %6260 = vmatprep.mubr.msk.f32.mxu0 %vm6419_vm0, %v10297_v1 }
  0x74   : > { %6261 = vmatmul.mubr.msk.f32.gmra.mxu0 %vm370_vm1, %v350_v29 }
  0x75   : > { %6263 = vmatprep.mubr.msk.f32.mxu0 %vm6419_vm0, %v10297_v1 }
  0x78   : > { %6264 = vmatmul.mubr.msk.f32.gmra.mxu0 %vm370_vm1, %v351_v30 }
  0x79   : > { %6266 = vmatprep.mubr.msk.f32.mxu0 %vm6419_vm0, %v10297_v1 }
  0x7c   : > { %6267 = vmatmul.mubr.msk.f32.gmra.mxu0 %vm370_vm1, %v352_v31 }
  0x7d   : > { %6269 = vmatprep.mubr.msk.f32.mxu0 %vm6419_vm0, %v10297_v1 }
  0x80   : > { %6270 = vmatmul.mubr.msk.f32.gmra.mxu0 %vm370_vm1, %v353_v35 }
  0x81   : > { %6272 = vmatprep.mubr.msk.f32.mxu0 %vm6419_vm0, %v10297_v1 }
  0x84   : > { %6273 = vmatmul.mubr.msk.f32.gmra.mxu0 %vm370_vm1, %v354_v39 }
  0xe4   : > { %v512_v40 = vpop.f32.mrf.mxu0 }
  0xe5   : > { %v513_v41 = vadd.f32 %v6667_v38, %v512_v40 }
  0xe6   : > { %v6202_v43 = vpop.f32.mrf.mxu0 }
  0xe7   : > { %v636_v44 = vmax.f32 %v513_v41, 0.0 }
  0xe8   : > { %v517_v45 = vpop.f32.mrf.mxu0 }
  0xe9   : > { %v686_v46 = vcombine.high %v636_v44, %v636_v44  ;;  %v6675_v47 = vrot.slane %v636_v44, %v6672_v42  ;;  %v518_v48 = vadd.f32 %v6667_v38, %v517_v45 }
  0xea   : > { %v6205_v49 = vpop.f32.mrf.mxu0 }
  0xeb   : > { %v637_v50 = vmax.f32 %v518_v48, 0.0  ;;  %v6679_v52 = vrot.slane %v686_v46, %v6672_v42  ;;  %v6683_v53 = vcombine.high %v6675_v47, %v6675_v47  ;;  %v5776_v0 = vrot.slane %v6675_v47, 9 }
  0xec   : > { %v522_v51 = vpop.f32.mrf.mxu0 }
  0xed   : > { %v703_v54 = vcombine.high %v637_v50, %v637_v50  ;;  %v6686_v55 = vrot.slane %v637_v50, %v6672_v42  ;;  %v523_v56 = vadd.f32 %v6667_v38, %v522_v51  ;;  %v6691_v59 = vcombine.high %v6679_v52, %v6679_v52 }
  0xee   : > { %v6208_v57 = vpop.f32.mrf.mxu0  ;;  %v1209_v60 = vrot.slane %v6683_v53, 7  ;;  %v1212_v2 = vrot.slane %v6679_v52, 7 }
  0xef   : > { %v638_v61 = vmax.f32 %v523_v56, 0.0  ;;  %v6702_v3 = vrot.slane %v703_v54, %v6672_v42  ;;  %v6706_v4 = vcombine.high %v6686_v55, %v6686_v55  ;;  %v1218_v6 = vrot.slane %v6686_v55, 7 }
  0xf0   : > { %v527_v58 = vpop.f32.mrf.mxu0  ;;  %v6714_v11 = vsel %vm6695_vm8, %v5776_v0, %v1209_v60  ;;  %v1215_v12 = vrot.slane %v6691_v59, 7  ;;  %v1211_v19 = vrot.slane %v1209_v60, 2  ;;  %v1214_v20 = vrot.slane %v1212_v2, 2 }
  0xf1   : > { %v528_v62 = vadd.f32 %v6667_v38, %v527_v58  ;;  %v720_v7 = vcombine.high %v638_v61, %v638_v61  ;;  %v6710_v8 = vrot.slane %v638_v61, %v6672_v42  ;;  %v719_v14 = vcombine.high %v6702_v3, %v6702_v3 }
  0xf2   : > { %v6211_v5 = vpop.f32.mrf.mxu0  ;;  %v1220_v21 = vrot.slane %v1218_v6, 2  ;;  %v1221_v22 = vrot.slane %v6706_v4, 7  ;;  %v1224_v28 = vrot.slane %v6702_v3, 7  ;;  %v6744_v30 = vrot.slane %v1215_v12, 2 }
  0xf3   : > { %v639_v9 = vmax.f32 %v528_v62, 0.0  ;;  %v6718_v13 = vrot.slane %v720_v7, %v6672_v42  ;;  %v6724_v15 = vcombine.high %v6710_v8, %v6710_v8  ;;  %v1229_v24 = vrot.slane %v6710_v8, 7 }
  0xf4   : > { %v532_v10 = vpop.f32.mrf.mxu0  ;;  %v5777_v31 = vrot.slane %v719_v14, 9  ;;  %v6751_v35 = vsel %vm6695_vm8, %v1220_v21, %v1221_v22  ;;  %v6756_v37 = vsel %vm6695_vm8, %v1211_v19, %v1212_v2  ;;  %v6760_v39 = vsel %vm6695_vm8, %v1214_v20, %v1215_v12 }
  0xf5   : > { %v737_v16 = vcombine.high %v639_v9, %v639_v9  ;;  %v6727_v17 = vrot.slane %v639_v9, %v6672_v42  ;;  %v6734_v23 = vcombine.high %v6718_v13, %v6718_v13  ;;  %v533_v25 = vadd.f32 %v6667_v38, %v532_v10 }
  0xf6   : > { %v6214_v18 = vpop.f32.mrf.mxu0  ;;  %v1232_v32 = vrot.slane %v6724_v15, 7  ;;  %v1223_v40 = vrot.slane %v1221_v22, 2  ;;  %v1231_v41 = vrot.slane %v1229_v24, 2  ;;  %v6765_v46 = vrot.slane %v1224_v28, 2 }
  0xf7   : > { %v6742_v29 = vrot.slane %v737_v16, %v6672_v42  ;;  %v752_v33 = vcombine.high %v6727_v17, %v6727_v17  ;;  %v1241_v36 = vrot.slane %v6727_v17, 7  ;;  %v1238_v43 = vrot.slane %v6734_v23, 7 }
  0xf8   : > { %v537_v26 = vpop.f32.mrf.mxu0  ;;  %v640_v44 = vmax.f32 %v533_v25, 0.0  ;;  %v1230_v51 = vsel %vm6695_vm8, %v5777_v31, %v1229_v24  ;;  %v1234_v54 = vrot.slane %v1232_v32, 2  ;;  %v1235_v56 = vrot.slane %v6718_v13, 7 }
  0xf9   : > { %v6769_v48 = vcombine.high %v6742_v29, %v6742_v29  ;;  %v538_v49 = vadd.f32 %v6667_v38, %v537_v26  ;;  %v1244_v57 = vrot.slane %v752_v33, 7  ;;  %v1243_v60 = vrot.slane %v1241_v36, 2 }
  0xfa   : > { %v6217_v34 = vpop.f32.mrf.mxu0  ;;  %v754_v61 = vcombine.high %v640_v44, %v640_v44  ;;  %v6777_v62 = vrot.slane %v640_v44, %v6672_v42  ;;  %v1233_v5 = vsel %vm6695_vm8, %v1231_v41, %v1232_v32  ;;  %v1240_v7 = vrot.slane %v1238_v43, 2 }
  0xfb   : > { %10376 = vst [vmem:[#allocation5_spill] sm:$0xff] %v6769_v48  ;;  %v641_v0 = vmax.f32 %v538_v49, 0.0  ;;  %v5778_v9 = vrot.slane %v6742_v29, 9  ;;  %v1249_v12 = vrot.slane %v6769_v48, 7  ;;  %v1236_v21 = vsel %vm6695_vm8, %v1234_v54, %v1235_v56 }
  0xfc   : > { %v542_v45 = vpop.f32.mrf.mxu0  ;;  %v6789_v16 = vcombine.high %v6777_v62, %v6777_v62  ;;  %v6795_v22 = vmax.f32 %v719_v14, %v1230_v51  ;;  %v1252_v24 = vrot.slane %v6777_v62, 7  ;;  %v1237_v26 = vrot.slane %v1235_v56, 2 }
  0xfd   : > { %v543_v50 = vadd.f32 %v6667_v38, %v542_v45  ;;  %v771_v18 = vcombine.high %v641_v0, %v641_v0  ;;  %v1245_v31 = vsel %vm6695_vm8, %v1243_v60, %v1244_v57  ;;  %v6801_v32 = vrot.slane %v754_v61, %v6672_v42 }
  0xfe   : > { %v6220_v58 = vpop.f32.mrf.mxu0  ;;  %v6804_v34 = vrot.slane %v641_v0, %v6672_v42  ;;  %v6807_v41 = vmax.f32 %v6710_v8, %v1233_v5  ;;  %v1246_v44 = vrot.slane %v1244_v57, 2  ;;  %v1255_v14 = vrot.slane %v6789_v16, 7 }
  0xff   : > { %v642_v19 = vmax.f32 %v543_v50, 0.0  ;;  %v6811_v45 = vrot.slane %v771_v18, %v6672_v42  ;;  %v6814_v50 = vmax.f32 %v6724_v15, %v1236_v21  ;;  %v6818_v51 = vsel %vm6695_vm8, %v1240_v7, %v1241_v36 }
 0x100   : > { %v547_v10 = vpop.f32.mrf.mxu0  ;;  %v1250_v54 = vsel %vm6695_vm8, %v5778_v9, %v1249_v12  ;;  %v1251_v8 = vrot.slane %v1249_v12, 2  ;;  %v6823_v57 = vmax.f32 %v6727_v17, %v1245_v31  ;;  %v1254_v58 = vrot.slane %v1252_v24, 2 }
 0x101   : > { %v788_v56 = vcombine.high %v642_v19, %v642_v19  ;;  %v6826_v60 = vrot.slane %v642_v19, %v6672_v42  ;;  %v6830_v15 = vcombine.high %v6801_v32, %v6801_v32  ;;  %v1258_v36 = vrot.slane %v6801_v32, 7 }
 0x102   : > { %v6223_v25 = vpop.f32.mrf.mxu0  ;;  %v786_v0 = vcombine.high %v6804_v34, %v6804_v34  ;;  %v548_v5 = vadd.f32 %v6667_v38, %v547_v10  ;;  %v6836_v7 = vmax.f32 %v752_v33, %v1246_v44  ;;  %v1257_v17 = vrot.slane %v1255_v14, 2 }
 0x103   : > { %v6840_v9 = vcombine.high %v6811_v45, %v6811_v45  ;;  %v1269_v12 = vrot.slane %v6811_v45, 7  ;;  %v6846_v19 = vmax.f32 %v6742_v29, %v1250_v54  ;;  %v6849_v21 = vrot.slane %v788_v56, %v6672_v42 }
 0x104   : > { %v552_v49 = vpop.f32.mrf.mxu0  ;;  %v1225_v33 = vsel %vm6695_vm8, %v1223_v40, %v1224_v28  ;;  %v6860_v10 = vsel %vm6695_vm8, %v6744_v30, %v1218_v6  ;;  %v1256_v25 = vsel %vm6695_vm8, %v1254_v58, %v1255_v14  ;;  %v10301_v29 = vrot.slane %v6804_v34, 7 }
 0x105   : > { %10377 = vst [vmem:[#allocation6_spill] sm:$0xff] %v6840_v9  ;;  %v6867_v31 = vcombine.high %v6826_v60, %v6826_v60  ;;  %v1239_v28 = vsel %vm6695_vm8, %v1237_v26, %v1238_v43  ;;  %v1260_v44 = vrot.slane %v1258_v36, 2  ;;  %v1261_v54 = vrot.slane %v6830_v15, 7 }
 0x106   : > { %v6226_v61 = vpop.f32.mrf.mxu0  ;;  %v5779_v6 = vrot.slane %v786_v0, 9  ;;  %v643_v30 = vmax.f32 %v548_v5, 0.0  ;;  %v1259_v14 = vsel %vm6695_vm8, %v1257_v17, %v1258_v36  ;;  %v1271_v56 = vrot.slane %v1269_v12, 2 }
 0x107   : > { %v1272_v58 = vrot.slane %v6840_v9, 7  ;;  %v1275_v61 = vrot.slane %v6826_v60, 7  ;;  %v6882_v20 = vcombine.high %v6849_v21, %v6849_v21  ;;  %v1278_v43 = vrot.slane %v6867_v31, 7 }
 0x108   : > { %v6843_v18 = vpop.f32.mrf.mxu0  ;;  %v1281_v26 = vrot.slane %v6849_v21, 7  ;;  %v6888_v5 = vsel %vm6695_vm8, %v1251_v8, %v1252_v24  ;;  %v6891_v36 = vmax.f32 %v6777_v62, %v1256_v25  ;;  %v1266_v17 = vrot.slane %v10301_v29, 2 }
 0x109   : > { %10379 = vst [vmem:[#allocation8_spill] sm:$0xff] %v6882_v20  ;;  %v6896_v2 = vrot.slane %v643_v30, %v6672_v42  ;;  %v1262_v9 = vsel %vm6695_vm8, %v1260_v44, %v1261_v54  ;;  %v1270_v48 = vsel %vm6695_vm8, %v5779_v6, %v1269_v12  ;;  %v6908_v62 = vmax.f32 %v6789_v16, %v1259_v14 }
 0x10a   : > { %v6229_v40 = vpop.f32.mrf.mxu0  ;;  %10380 = vst [vmem:[#allocation9_spill] sm:$0xff] %v6891_v36  ;;  %v1273_v8 = vsel %vm6695_vm8, %v1271_v56, %v1272_v58  ;;  %v1277_v25 = vrot.slane %v1275_v61, 2  ;;  %v1280_v44 = vrot.slane %v1278_v43, 2  ;;  %v1274_v6 = vrot.slane %v1272_v58, 2 }
 0x10b   : > { %v805_v40 = vcombine.high %v643_v30, %v643_v30  ;;  %v6918_v12 = vcombine.high %v6896_v2, %v6896_v2  ;;  %v553_v14 = vadd.f32 %v6667_v38, %v552_v49  ;;  %v6942_v58 = vmax.f32 %v6811_v45, %v1273_v8 }
 0x10c   : > { %v6878_v1 = vpop.f32.mrf.mxu0  ;;  %v6962_v8 = vsel %vm6695_vm8, %v1274_v6, %v1275_v61 }
 0x10d   : > { %10378 = vst [vmem:[#allocation7_spill] sm:$0xff] %v6878_v1  ;;  %v6900_v1 = vrot.slane %v1261_v54, 2  ;;  %v6905_v24 = vrot.slane %v805_v40, %v6672_v42  ;;  %v1283_v54 = vrot.slane %v1281_v26, 2  ;;  %v6920_v40 = vmax.f32 %v786_v0, %v1270_v48 }
 0x10e   : > { %v6232_v27 = vpop.f32.mrf.mxu0  ;;  %v6939_v0 = vmax.f32 %v6804_v34, %v1266_v17  ;;  %v1289_v45 = vrot.slane %v6918_v12, 7 }
 0x10f   : > { %v1563_v27 = vmax.f32 %v6706_v4, %v1225_v33  ;;  %v6927_v4 = vmax.f32 %v6801_v32, %v1262_v9  ;;  %v6931_v33 = vmax.f32 %v6814_v50, %v6891_v36  ;;  %v6935_v29 = vcombine.high %v6905_v24, %v6905_v24 }
 0x110   : > { %v6913_v30 = vpop.f32.mrf.mxu0  ;;  %v1292_v48 = vrot.slane %v6905_v24, 7  ;;  %v1279_v32 = vsel %vm6695_vm8, %v1277_v25, %v1278_v43  ;;  %v5780_v36 = vrot.slane %v6896_v2, 9  ;;  %v1559_v25 = vmax.f32 %v6683_v53, %v6756_v37 }
 0x111   : > { %v6923_v16 = vmax.f32 %v1563_v27, %v6823_v57  ;;  %v1282_v27 = vsel %vm6695_vm8, %v1280_v44, %v1281_v26  ;;  %v644_v26 = vmax.f32 %v553_v14, 0.0  ;;  %v6972_v43 = vmax.f32 %v6718_v13, %v1239_v28 }
 0x112   : > { %v6235_v56 = vpop.f32.mrf.mxu0  ;;  %v6975_v61 = vmax.f32 %v6867_v31, %v1282_v27  ;;  %v1560_v14 = vmax.f32 %v6679_v52, %v6760_v39  ;;  %v1569_v53 = vmax.f32 %v6734_v23, %v6818_v51  ;;  %v1561_v13 = vmax.f32 %v6691_v59, %v6860_v10 }
 0x113   : > { %v2288_v49 = vrot.slane %v6923_v16, %v6672_v42  ;;  %v10381_v56 = vrot.slane %v6882_v20, 7  ;;  %v1295_v20 = vrot.slane %v6935_v29, 7  ;;  %v1684_v31 = vmax.f32 %v1559_v25, %v6807_v41 }
 0x114   : > { %v6948_v9 = vpop.f32.mrf.mxu0  ;;  %v822_v28 = vcombine.high %v644_v26, %v644_v26  ;;  %v10382_v52 = vmax.f32 %v6675_v47, %v6714_v11  ;;  %v1685_v39 = vmax.f32 %v1560_v14, %v6814_v50  ;;  %v1686_v10 = vmax.f32 %v1561_v13, %v6972_v43 }
 0x115   : > { %v1285_v17 = vsel %vm6695_vm8, %v1283_v54, %v10381_v56  ;;  %2507 = vrot.lane.b32.xlu0 %v2288_v49, %s6421_s17  ;;  %v6968_v54 = vmax.f32 %v6826_v60, %v1279_v32  ;;  %v1294_v56 = vrot.slane %v1292_v48, 2  ;;  %v1290_v60 = vsel %vm6695_vm8, %v5780_v36, %v1289_v45 }
 0x116   : > { %v6238_v44 = vpop.f32.mrf.mxu0  ;;  %v6978_v6 = vmax.f32 %v6849_v21, %v1285_v17  ;;  %v1291_v32 = vrot.slane %v1289_v45, 2  ;;  %v6992_v21 = vrot.slane %v644_v26, %v6672_v42  ;;  %v1683_v23 = vmax.f32 %v10382_v52, %v6795_v22 }
 0x117   : > { %v7001_v36 = vmax.f32 %v6908_v62, %v6968_v54  ;;  %v1296_v59 = vsel %vm6695_vm8, %v1294_v56, %v1295_v20  ;;  %v10383_v49 = vmax.f32 %v6686_v55, %v6751_v35  ;;  %v1297_v47 = vrot.slane %v1295_v20, 2 }
 0x118   : > { %v6984_v37 = vpop.f32.mrf.mxu0  ;;  %v7012_v11 = vmax.f32 %v6896_v2, %v1290_v60  ;;  %v1824_v50 = vcombine.low %v1683_v23, %v1684_v31  ;;  %v2265_v17 = vcombine.low %v1684_v31, %v1685_v39  ;;  %v1293_v26 = vsel %vm6695_vm8, %v1291_v32, %v1292_v48 }
 0x119   : > { %v7009_v27 = vmax.f32 %v10383_v49, %v1569_v53  ;;  %v1825_v25 = vcombine.low %v1685_v39, %v1686_v10  ;;  %v7022_v35 = vrot.slane %v822_v28, %v6672_v42  ;;  %v1298_v20 = vrot.slane %v6992_v21, 7 }
 0x11a   : > { %v6241_v51 = vpop.f32.mrf.mxu0  ;;  %v2273_v2 = vrot.slane %v2265_v17, %v6672_v42  ;;  %v10385_v56 = vmax.f32 %v6702_v3, %v6765_v46  ;;  %v1832_v13 = vrot.slane %v1824_v50, %v6672_v42  ;;  %v10386_v23 = vrot.slane %v6804_v34, 7 }
 0x11b   : > { %10384 = vst [vmem:[#allocation10_spill] sm:$0xff] %v7009_v27  ;;  %v2266_v44 = vcombine.low %v1686_v10, %v7009_v27  ;;  %v2094_v55 = vcombine.low %v7009_v27, %v6923_v16  ;;  %v1839_v31 = vrot.slane %v1825_v25, %v6672_v42  ;;  %v838_v28 = vcombine.high %v7022_v35, %v7022_v35 }
 0x11c   : > { %v7014_v45 = vpop.f32.mrf.mxu0  ;;  %v1689_v14 = vmax.f32 %v10385_v56, %v6836_v7  ;;  %v1265_v3 = vsel %vm6695_vm8, %v6900_v1, %v10386_v23  ;;  %v558_v46 = vadd.f32 %v6667_v38, %v6843_v18  ;;  %v1299_v51 = vsel %vm6695_vm8, %v1297_v47, %v1298_v20 }
 0x11d   : > { %v2280_v48 = vrot.slane %v2266_v44, %v6672_v42  ;;  %v2101_v32 = vrot.slane %v2094_v55, %v6672_v42  ;;  %v7050_v50 = vcombine.low %v1832_v13, %v1839_v31  ;;  %v7057_v1 = vmax.f32 %v6830_v15, %v1265_v3 }
 0x11e   : > { %v6244_v60 = vpop.f32.mrf.mxu0  ;;  %v2575_v52 = vcombine.low %v6923_v16, %v1689_v14  ;;  %v7054_v16 = vmax.f32 %v1569_v53, %v6927_v4  ;;  %v645_v18 = vmax.f32 %v558_v46, 0.0  ;;  %v7060_v25 = vmax.f32 %v6918_v12, %v1293_v26 }
 0x11f   : > { %v2281_v10 = vcombine.low %v2273_v2, %v2280_v48  ;;  %v2176_v49 = vrot.slane %v2101_v32, 1  ;;  %10387 = vst [vmem:[#allocation11_spill] sm:$0xff] %v7050_v50  ;;  %v7063_v44 = vmax.f32 %v6905_v24, %v1296_v59  ;;  %v2175_v53 = vrot.slane %v7050_v50, 1  ;;  %v10389_v60 = vld [vmem:[#allocation5_spill] sm:$0xff] }
 0x120   : > { %v7044_v39 = vpop.f32.mrf.mxu0  ;;  %v2582_v34 = vrot.slane %v2575_v52, %v6672_v42  ;;  %v1695_v15 = vmax.f32 %v6823_v57, %v7057_v1  ;;  %v1696_v12 = vmax.f32 %v6836_v7, %v6939_v0  ;;  %v839_v26 = vcombine.high %v645_v18, %v645_v18 }
 0x121   : > { %2505 = vrot.lane.b32.xlu1 %v2281_v10, %s6421_s17  ;;  %2207 = vrot.lane.b32.xlu0 %v2176_v49, %s6422_s21  ;;  %v846_v24 = vrot.slane %v645_v18, %v6672_v42  ;;  %v7077_v59 = vcombine.high %v6992_v21, %v6992_v21  ;;  %v5781_v55 = vrot.slane %v838_v28, 9  ;;  %v7080_v2 = vmax.f32 %v6935_v29, %v1299_v51 }
 0x122   : > { %v6247_v17 = vpop.f32.mrf.mxu0  ;;  %v2656_v56 = vrot.slane %v2582_v34, 1  ;;  %v2177_v14 = vsel %vm2174_vm9, %v2175_v53, %v2176_v49  ;;  %v7085_v57 = vrot.slane %v7054_v16, %v6672_v42  ;;  %v2102_v7 = vcombine.low %v7054_v16, %v1695_v15 }
 0x123   : > { %v7090_v48 = vmax.f32 %v10389_v60, %v6888_v5  ;;  %v853_v29 = vrot.slane %v839_v26, %v6672_v42  ;;  %v854_v32 = vcombine.high %v846_v24, %v846_v24  ;;  %v1309_v13 = vrot.slane %v846_v24, 7  ;;  %v10392_v26 = vld [vmem:[#allocation7_spill] sm:$0xff] }
 0x124   : > { %10388 = vst [vmem:[#allocation12_spill] sm:$0xff] %v7085_v57  ;;  %v7097_v31 = vmax.f32 %v6972_v43, %v6908_v62  ;;  %v2655_v52 = vrot.slane %v2281_v10, 1  ;;  %v2312_v23 = vrot.slane %v1695_v15, %v6672_v42  ;;  %v2109_v3 = vrot.slane %v2102_v7, %v6672_v42 }
 0x125   : > { %2687 = vrot.lane.b32.xlu1 %v2656_v56, %s6423_s22  ;;  %2205 = vrot.lane.b32.xlu0 %v2177_v14, %s6422_s21  ;;  %v2583_v5 = vcombine.low %v1695_v15, %v1696_v12  ;;  %v7101_v46 = vcombine.high %v853_v29, %v853_v29  ;;  %v1310_v51 = vsel %vm6695_vm8, %v5781_v55, %v1309_v13  ;;  %v1311_v49 = vrot.slane %v1309_v13, 2 }
 0x126   : > { %v1312_v34 = vrot.slane %v854_v32, 7  ;;  %v1315_v18 = vrot.slane %v853_v29, 7  ;;  %v7105_v17 = vmax.f32 %v838_v28, %v1310_v51  ;;  %v1690_v62 = vmax.f32 %v6795_v22, %v6846_v19 }
 0x127   : > { %v1691_v43 = vmax.f32 %v6807_v41, %v7090_v48  ;;  %v10305_v15 = vrot.slane %v7101_v46, 7  ;;  %v1849_v28 = vcombine.low %v6931_v33, %v7097_v31  ;;  %v563_v55 = vadd.f32 %v6667_v38, %v10392_v26 }
 0x128   : > { %10390 = vst [vmem:[#allocation5_spill] sm:$0xff] %v7105_v17  ;;  %v1313_v10 = vsel %vm6695_vm8, %v1311_v49, %v1312_v34  ;;  %v1314_v53 = vrot.slane %v1312_v34, 2  ;;  %v1317_v12 = vrot.slane %v1315_v18, 2  ;;  %v1711_v41 = vmax.f32 %v7012_v11, %v7105_v17 }
 0x129   : > { %2776 = vrot.lane.b32.xlu0 %v7085_v57, %s10371_s23  ;;  %2511 = vrot.lane.b32.xlu1 %v2312_v23, %s6421_s17  ;;  %v7119_v22 = vmax.f32 %v846_v24, %v1313_v10  ;;  %v2657_v14 = vsel %vm2174_vm9, %v2655_v52, %v2656_v56  ;;  %v7126_v7 = vrot.slane %v2109_v3, 1  ;;  %v2590_v60 = vrot.slane %v2583_v5, %v6672_v42 }
 0x12a   : > { %v1316_v13 = vsel %vm6695_vm8, %v1314_v53, %v1315_v18  ;;  %v1319_v24 = vsel %vm6695_vm8, %v1317_v12, %v10305_v15  ;;  %v646_v34 = vmax.f32 %v563_v55, 0.0  ;;  %v1848_v52 = vcombine.low %v1690_v62, %v1691_v43  ;;  %v7168_v12 = vpop.f32.mrf.mxu0 }
 0x12b   : > { %10391 = vst [vmem:[#allocation13_spill] sm:$0xff] %v7119_v22  ;;  %v7135_v51 = vmax.f32 %v854_v32, %v1316_v13  ;;  %v7139_v49 = vmax.f32 %v7060_v25, %v7119_v22  ;;  %v7144_v56 = vmax.f32 %v853_v29, %v1319_v24  ;;  %v7148_v3 = vmax.f32 %v7057_v1, %v6978_v6 }
 0x12c   : > { %v856_v18 = vcombine.high %v646_v34, %v646_v34  ;;  %v2290_v10 = vcombine.low %v7097_v31, %v7054_v16  ;;  %v7159_v53 = vrot.slane %v2590_v60, 1  ;;  %v1863_v1 = vrot.slane %v1849_v28, %v6672_v42  ;;  %10394 = vst [vmem:[#allocation14_spill] sm:$0xff] %v7168_v12  ;;  %v6250_v13 = vpop.f32.mrf.mxu0 }
 0x12d   : > { %2685 = vrot.lane.b32.xlu0 %v2657_v14, %s6423_s22  ;;  %2848 = vrot.lane.b32.xlu1 %v7126_v7, %s6425_s24  ;;  %10393 = vst [vmem:[#allocation7_spill] sm:$0xff] %v7144_v56  ;;  %v7152_v32 = vmax.f32 %v7063_v44, %v7135_v51  ;;  %v7155_v5 = vcombine.low %v1711_v41, %v7139_v49  ;;  %v1304_v41 = vrot.slane %v7022_v35, 7  ;;  %v10395_v14 = vld [vmem:[#allocation6_spill] sm:$0xff] }
 0x12e   : > { %v7163_v29 = vmax.f32 %v7080_v2, %v7144_v56  ;;  %v568_v62 = vadd.f32 %v6667_v38, %v6913_v30  ;;  %v7172_v26 = vrot.slane %v646_v34, %v6672_v42  ;;  %v7175_v16 = vrot.slane %v856_v18, %v6672_v42  ;;  %v10398_v30 = vld [vmem:[#allocation9_spill] sm:$0xff] }
 0x12f   : > { %v2289_v31 = vcombine.low %v1691_v43, %v6931_v33  ;;  %v1856_v28 = vrot.slane %v1848_v52, %v6672_v42  ;;  %v7186_v60 = vmax.f32 %v10395_v14, %v6962_v8  ;;  %v1300_v33 = vrot.slane %v1298_v20, 2 }
 0x130   : > { %v647_v55 = vmax.f32 %v568_v62, 0.0  ;;  %v7193_v43 = vcombine.high %v7175_v16, %v7175_v16  ;;  %v2304_v24 = vrot.slane %v2290_v10, %v6672_v42  ;;  %v2336_v52 = vrot.slane %v7148_v3, %v6672_v42 }
 0x131   : > { %2932 = vrot.lane.b32.xlu0 %v2312_v23, %s10322_s25  ;;  %3004 = vrot.lane.b32.xlu1 %v7159_v53, %s6427_s26  ;;  %v1301_v23 = vrot.slane %v7077_v59, 7  ;;  %v7196_v34 = vcombine.low %v1856_v28, %v1863_v1  ;;  %v1701_v8 = vmax.f32 %v6927_v4, %v6975_v61  ;;  %v7205_v20 = vcombine.high %v7172_v26, %v7172_v26  ;;  %v7210_v1 = vpop.f32.mrf.mxu0 }
 0x132   : > { %v880_v18 = vrot.slane %v647_v55, %v6672_v42  ;;  %v10310_v14 = vrot.slane %v7193_v43, 7  ;;  %v2297_v10 = vrot.slane %v2289_v31, %v6672_v42  ;;  %10397 = vst [vmem:[#allocation15_spill] sm:$0xff] %v7210_v1  ;;  %v873_v4 = vcombine.high %v647_v55, %v647_v55 }
 0x133   : > { %10396 = vst [vmem:[#allocation6_spill] sm:$0xff] %v7196_v34  ;;  %v1699_v47 = vmax.f32 %v10398_v30, %v7186_v60  ;;  %v1306_v15 = vrot.slane %v1304_v41, 2  ;;  %v1698_v31 = vmax.f32 %v7090_v48, %v6942_v58  ;;  %v6253_v27 = vpop.f32.mrf.mxu0  ;;  %v7226_v50 = vrot.slane %v1701_v8, %v6672_v42 }
 0x134   : > { %v7215_v28 = vcombine.high %v880_v18, %v880_v18  ;;  %v1332_v13 = vrot.slane %v880_v18, 7  ;;  %v1331_v62 = vrot.slane %v10310_v14, 2  ;;  %v7221_v57 = vcombine.low %v2297_v10, %v2304_v24 }
 0x135   : > { %2774 = vrot.lane.b32.xlu0 %v7196_v34, %s10371_s23  ;;  %2515 = vrot.lane.b32.xlu1 %v2336_v52, %s6421_s17  ;;  %10399 = vst [vmem:[#allocation9_spill] sm:$0xff] %v7226_v50  ;;  %v2314_v12 = vcombine.low %v7001_v36, %v1701_v8  ;;  %v1302_v30 = vsel %vm6695_vm8, %v1300_v33, %v1301_v23  ;;  %v1303_v22 = vrot.slane %v1301_v23, 2  ;;  %v10400_v14 = vrot.slane %v7172_v26, 7  ;;  %v7238_v27 = vpop.f32.mrf.mxu0 }
 0x136   : > { %v1334_v55 = vrot.slane %v1332_v13, 2  ;;  %v1335_v1 = vrot.slane %v7215_v28, 7  ;;  %v7236_v10 = vsel %vm6695_vm8, %v1331_v62, %v1332_v13  ;;  %10402 = vst [vmem:[#allocation17_spill] sm:$0xff] %v7238_v27  ;;  %v1324_v48 = vrot.slane %v7205_v20, 7 }
 0x137   : > { %v1323_v24 = vrot.slane %v10400_v14, 2  ;;  %10401 = vst [vmem:[#allocation16_spill] sm:$0xff] %v7236_v10  ;;  %v7246_v33 = vrot.slane %v873_v4, %v6672_v42  ;;  %v2313_v14 = vcombine.low %v1698_v31, %v1699_v47  ;;  %v10404_v62 = vmax.f32 %v6846_v19, %v6920_v40  ;;  %v6256_v10 = vpop.f32.mrf.mxu0 }
 0x138   : > { %v1336_v23 = vsel %vm6695_vm8, %v1334_v55, %v1335_v1  ;;  %v1873_v27 = vcombine.low %v1699_v47, %v7001_v36  ;;  %v573_v56 = vadd.f32 %v6667_v38, %v6948_v9  ;;  %v7262_v4 = vmax.f32 %v7022_v35, %v1306_v15 }
 0x139   : > { %2509 = vrot.lane.b32.xlu0 %v7221_v57, %s6421_s17  ;;  %2780 = vrot.lane.b32.xlu1 %v7226_v50, %s10371_s23  ;;  %v7250_v17 = vmax.f32 %v880_v18, %v1336_v23  ;;  %v1872_v13 = vcombine.low %v10404_v62, %v1698_v31  ;;  %v7259_v50 = vmax.f32 %v6992_v21, %v1302_v30  ;;  %v5782_v31 = vrot.slane %v7175_v16, 9 }
 0x13a   : > { %v2328_v55 = vrot.slane %v2314_v12, %v6672_v42  ;;  %v2110_v18 = vcombine.low %v1701_v8, %v7148_v3  ;;  %v1305_v19 = vsel %vm6695_vm8, %v1303_v22, %v1304_v41  ;;  %v1338_v36 = vrot.slane %v7246_v33, 7  ;;  %v7284_v22 = vpop.f32.mrf.mxu0  ;;  %v10406_v8 = vld [vmem:[#allocation8_spill] sm:$0xff] }
 0x13b   : > { %10403 = vst [vmem:[#allocation18_spill] sm:$0xff] %v7250_v17  ;;  %v7272_v9 = vmax.f32 %v7135_v51, %v7250_v17  ;;  %v1325_v21 = vsel %vm6695_vm8, %v1323_v24, %v1324_v48  ;;  %v7278_v35 = vcombine.high %v7246_v33, %v7246_v33  ;;  %v2321_v47 = vrot.slane %v2313_v14, %v6672_v42 }
 0x13c   : > { %v648_v15 = vmax.f32 %v573_v56, 0.0  ;;  %v1337_v12 = vrot.slane %v1335_v1, 2  ;;  %v1880_v51 = vrot.slane %v1872_v13, %v6672_v42  ;;  %v1887_v41 = vrot.slane %v1873_v27, %v6672_v42 }
 0x13d   : > { %10405 = vst [vmem:[#allocation19_spill] sm:$0xff] %v7272_v9  ;;  %2930 = vrot.lane.b32.xlu0 %v7221_v57, %s10322_s25  ;;  %2936 = vrot.lane.b32.xlu1 %v2336_v52, %s10322_s25  ;;  %v10407_v30 = vrot.slane %v10406_v8, 7  ;;  %v1326_v10 = vrot.slane %v1324_v48, 2  ;;  %v7290_v23 = vcombine.low %v2321_v47, %v2328_v55  ;;  %v2117_v17 = vrot.slane %v2110_v18, %v6672_v42  ;;  %v6259_v52 = vpop.f32.mrf.mxu0 }
 0x13e   : > { %v890_v62 = vcombine.high %v648_v15, %v648_v15  ;;  %v1340_v9 = vrot.slane %v1338_v36, 2  ;;  %v7294_v56 = vrot.slane %v648_v15, %v6672_v42  ;;  %v7296_v14 = vcombine.low %v1880_v51, %v1887_v41 }
 0x13f   : > { %v1286_v24 = vrot.slane %v10407_v30, 2  ;;  %v10409_v27 = vrot.slane %v7193_v43, 7  ;;  %v1341_v13 = vrot.slane %v7278_v35, 7  ;;  %v2178_v18 = vrot.slane %v7196_v34, 1 }
 0x140   : > { %10408 = vst [vmem:[#allocation8_spill] sm:$0xff] %v7296_v14  ;;  %v7311_v55 = vrot.slane %v890_v62, %v6672_v42  ;;  %v1591_v47 = vmax.f32 %v7077_v59, %v1305_v19  ;;  %v1339_v15 = vsel %vm6695_vm8, %v1337_v12, %v1338_v36  ;;  %v10410_v41 = vrot.slane %v7101_v46, 7 }
 0x141   : > { %v7299_v1 = vmax.f32 %v10406_v8, %v1286_v24  ;;  %v1330_v48 = vsel %vm6695_vm8, %v5782_v31, %v10409_v27  ;;  %2211 = vrot.lane.b32.xlu0 %v7126_v7, %s6422_s21  ;;  %2513 = vrot.lane.b32.xlu1 %v7290_v23, %s6421_s17  ;;  %v7319_v31 = vcombine.high %v7294_v56, %v7294_v56  ;;  %v7331_v59 = vrot.slane %v2117_v17, 1 }
 0x142   : > { %v1320_v8 = vrot.slane %v10410_v41, 2  ;;  %v7326_v30 = vmax.f32 %v7172_v26, %v1325_v21  ;;  %v7329_v24 = vmax.f32 %v7205_v20, %v1326_v10  ;;  %v7334_v19 = vmax.f32 %v7175_v16, %v1330_v48 }
 0x143   : > { %v1703_v51 = vmax.f32 %v6939_v0, %v7299_v1  ;;  %v1342_v36 = vsel %vm6695_vm8, %v1340_v9, %v1341_v13  ;;  %v2181_v12 = vrot.slane %v7296_v14, 1  ;;  %v7340_v62 = vrot.slane %v1341_v13, 2 }
 0x144   : > { %v7343_v21 = vmax.f32 %v7215_v28, %v1339_v15  ;;  %v7347_v20 = vcombine.high %v7311_v55, %v7311_v55  ;;  %v2180_v17 = vsel %vm2174_vm9, %v2178_v18, %v7126_v7  ;;  %v2658_v16 = vrot.slane %v7221_v57, 1 }
 0x145   : > { %v2591_v0 = vcombine.low %v7148_v3, %v1703_v51  ;;  %2691 = vrot.lane.b32.xlu0 %v7159_v53, %s6423_s22  ;;  %2215 = vrot.lane.b32.xlu1 %v7331_v59, %s6422_s21  ;;  %v5783_v3 = vrot.slane %v7319_v31, 9  ;;  %v7359_v28 = vmax.f32 %v6975_v61, %v7259_v50  ;;  %v7362_v9 = vmax.f32 %v6978_v6, %v1591_v47 }
 0x146   : > { %v7365_v10 = vmax.f32 %v7246_v33, %v1342_v36  ;;  %v10316_v52 = vrot.slane %v7294_v56, 7  ;;  %v1707_v7 = vmax.f32 %v6968_v54, %v7080_v2  ;;  %v1349_v48 = vrot.slane %v7311_v55, 7 }
 0x147   : > { %v2598_v27 = vrot.slane %v2591_v0, %v6672_v42  ;;  %v7374_v57 = vsel %vm2174_vm9, %v2181_v12, %v7331_v59  ;;  %v2661_v61 = vrot.slane %v7290_v23, 1  ;;  %v1705_v6 = vmax.f32 %v6942_v58, %v7060_v25 }
 0x148   : > { %v1346_v33 = vrot.slane %v10316_v52, 2  ;;  %v1352_v13 = vrot.slane %v7347_v20, 7  ;;  %v1706_v54 = vmax.f32 %v7186_v60, %v7063_v44  ;;  %v578_v2 = vadd.f32 %v6667_v38, %v6984_v37 }
 0x149   : > { %2209 = vrot.lane.b32.xlu0 %v2180_v17, %s6422_s21  ;;  %2850 = vrot.lane.b32.xlu1 %v7374_v57, %s6425_s24  ;;  %v1350_v18 = vsel %vm6695_vm8, %v5783_v3, %v1349_v48  ;;  %v2660_v58 = vsel %vm2174_vm9, %v2658_v16, %v7159_v53  ;;  %v7395_v25 = vrot.slane %v7359_v28, %v6672_v42  ;;  %v7401_v51 = vrot.slane %v2598_v27, 1 }
 0x14a   : > { %v7399_v15 = vrot.slane %v7362_v9, %v6672_v42  ;;  %v1897_v44 = vcombine.low %v1706_v54, %v1707_v7  ;;  %v649_v60 = vmax.f32 %v578_v2, 0.0  ;;  %v10412_v37 = vrot.slane %v7172_v26, 7 }
 0x14b   : > { %10411 = vst [vmem:[#allocation20_spill] sm:$0xff] %v7395_v25  ;;  %v1351_v36 = vrot.slane %v1349_v48, 2  ;;  %v10413_v53 = vmax.f32 %v6920_v40, %v7012_v11  ;;  %v7414_v3 = vmax.f32 %v1591_v47, %v7326_v30  ;;  %v1354_v16 = vrot.slane %v1352_v13, 2 }
 0x14c   : > { %v1322_v41 = vsel %vm6695_vm8, %v1320_v8, %v10412_v37  ;;  %v7417_v27 = vmax.f32 %v7294_v56, %v1346_v33  ;;  %v2338_v26 = vcombine.low %v1707_v7, %v7359_v28  ;;  %v914_v40 = vrot.slane %v649_v60, %v6672_v42 }
 0x14d   : > { %v1896_v12 = vcombine.low %v10413_v53, %v1705_v6  ;;  %v7411_v0 = vmax.f32 %v7101_v46, %v1322_v41  ;;  %2846 = vrot.lane.b32.xlu0 %v2180_v17, %s6425_s24  ;;  %3008 = vrot.lane.b32.xlu1 %v7401_v51, %s6427_s26  ;;  %v2337_v11 = vcombine.low %v1705_v6, %v1706_v54 }
 0x14e   : > { %v907_v8 = vcombine.high %v649_v60, %v649_v60  ;;  %v1928_v47 = vrot.slane %v7155_v5, %v6672_v42  ;;  %v1911_v48 = vrot.slane %v1897_v44, %v6672_v42  ;;  %v7431_v33 = vcombine.high %v914_v40, %v914_v40 }
 0x14f   : > { %v7426_v46 = vmax.f32 %v7259_v50, %v7411_v0  ;;  %v1355_v17 = vrot.slane %v914_v40, 7  ;;  %v10414_v7 = vcombine.low %v7152_v32, %v7163_v29  ;;  %v1353_v6 = vsel %vm6695_vm8, %v1351_v36, %v1352_v13 }
 0x150   : > { %v1904_v54 = vrot.slane %v1896_v12, %v6672_v42  ;;  %v2118_v50 = vcombine.low %v7359_v28, %v7362_v9  ;;  %v2352_v44 = vrot.slane %v2338_v26, %v6672_v42  ;;  %v1358_v37 = vrot.slane %v7431_v33, 7 }
 0x151   : > { %v1935_v2 = vrot.slane %v10414_v7, %v6672_v42  ;;  %2689 = vrot.lane.b32.xlu0 %v2660_v58, %s6423_s22  ;;  %2784 = vrot.lane.b32.xlu1 %v7395_v25, %s10371_s23  ;;  %v7450_v60 = vsel %vm6695_vm8, %v1354_v16, %v1355_v17  ;;  %v1357_v13 = vrot.slane %v1355_v17, 2  ;;  %v7454_v41 = vmax.f32 %v7319_v31, %v1350_v18 }
 0x152   : > { %v7457_v28 = vrot.slane %v907_v8, %v6672_v42  ;;  %v1710_v36 = vmax.f32 %v7299_v1, %v7262_v4  ;;  %v7463_v12 = vcombine.low %v1904_v54, %v1911_v48  ;;  %v2345_v26 = vrot.slane %v2337_v11, %v6672_v42 }
 0x153   : > { %v7461_v53 = vcombine.low %v1928_v47, %v1935_v2  ;;  %v1359_v16 = vsel %vm6695_vm8, %v1357_v13, %v1358_v37  ;;  %v583_v17 = vadd.f32 %v6667_v38, %v7014_v45  ;;  %v7471_v31 = vmax.f32 %v7311_v55, %v1353_v6 }
 0x154   : > { %10416 = vst [vmem:[#allocation22_spill] sm:$0xff] %v7463_v12  ;;  %v2663_v18 = vsel %vm2174_vm9, %v2661_v61, %v7401_v51  ;;  %v7475_v8 = vmax.f32 %v914_v40, %v1359_v16  ;;  %v2125_v1 = vrot.slane %v2118_v50, %v6672_v42  ;;  %v7480_v11 = vcombine.low %v2345_v26, %v2352_v44 }
 0x155   : > { %10415 = vst [vmem:[#allocation21_spill] sm:$0xff] %v7461_v53  ;;  %3002 = vrot.lane.b32.xlu0 %v2660_v58, %s6427_s26  ;;  %2693 = vrot.lane.b32.xlu1 %v2663_v18, %s6423_s22  ;;  %v650_v47 = vmax.f32 %v583_v17, 0.0  ;;  %v588_v45 = vadd.f32 %v6667_v38, %v7044_v39  ;;  %v2361_v55 = vcombine.low %v7139_v49, %v7152_v32  ;;  %v1361_v40 = vrot.slane %v7457_v28, 7 }
 0x156   : > { %v7488_v61 = vcombine.high %v7457_v28, %v7457_v28  ;;  %v7493_v58 = vmax.f32 %v7343_v21, %v7475_v8  ;;  %v2599_v48 = vcombine.low %v7362_v9, %v1710_v36  ;;  %v2184_v7 = vrot.slane %v7463_v12, 1  ;;  %v7513_v36 = vpop.f32.mrf.mxu0 }
 0x157   : > { %v924_v2 = vcombine.high %v650_v47, %v650_v47  ;;  %v931_v38 = vrot.slane %v650_v47, %v6672_v42  ;;  %v651_v39 = vmax.f32 %v588_v45, 0.0  ;;  %v7498_v6 = vrot.slane %v2125_v1, 1 }
 0x158   : > { %v2362_v49 = vcombine.low %v7163_v29, %v7426_v46  ;;  %v2369_v32 = vrot.slane %v2361_v55, %v6672_v42  ;;  %v1717_v54 = vmax.f32 %v7262_v4, %v7329_v24  ;;  %v1360_v9 = vrot.slane %v1358_v37, 2  ;;  %v6262_v47 = vpop.f32.mrf.mxu0 }
 0x159   : > { %2778 = vrot.lane.b32.xlu0 %v7296_v14, %s10371_s23  ;;  %3006 = vrot.lane.b32.xlu1 %v2663_v18, %s6427_s26  ;;  %v7509_v50 = vrot.slane %v924_v2, %v6672_v42  ;;  %v7511_v44 = vcombine.high %v931_v38, %v931_v38  ;;  %v5784_v13 = vrot.slane %v931_v38, 9  ;;  %v1363_v29 = vrot.slane %v1361_v40, 2 }
 0x15a   : > { %v10319_v26 = vrot.slane %v7488_v61, 7  ;;  %v2376_v16 = vrot.slane %v2362_v49, %v6672_v42  ;;  %v2607_v4 = vcombine.low %v7414_v3, %v1717_v54  ;;  %v7523_v1 = vrot.slane %v651_v39, %v6672_v42 }
 0x15b   : > { %v940_v17 = vcombine.high %v7509_v50, %v7509_v50  ;;  %v1369_v37 = vrot.slane %v7511_v44, 7  ;;  %v1372_v18 = vrot.slane %v7509_v50, 7  ;;  %v2606_v45 = vrot.slane %v2599_v48, %v6672_v42 }
 0x15c   : > { %v7529_v2 = vrot.slane %v7414_v3, %v6672_v42  ;;  %v7531_v49 = vcombine.low %v2369_v32, %v2376_v16  ;;  %v1362_v54 = vsel %vm6695_vm8, %v1360_v9, %v1361_v40  ;;  %v7541_v48 = vsel %vm2174_vm9, %v2184_v7, %v7498_v6 }
 0x15d   : > { %2934 = vrot.lane.b32.xlu0 %v7290_v23, %s10322_s25  ;;  %2940 = vrot.lane.b32.xlu1 %v7399_v15, %s10322_s25  ;;  %v1370_v47 = vsel %vm6695_vm8, %v5784_v13, %v1369_v37  ;;  %v1375_v55 = vrot.slane %v940_v17, 7  ;;  %v1365_v32 = vsel %vm6695_vm8, %v1363_v29, %v10319_v26  ;;  %v941_v16 = vcombine.high %v651_v39, %v651_v39 }
 0x15e   : > { %v7549_v23 = vmax.f32 %v931_v38, %v1370_v47  ;;  %v2614_v52 = vrot.slane %v2607_v4, %v6672_v42  ;;  %v1371_v5 = vrot.slane %v1369_v37, 2  ;;  %v1374_v40 = vrot.slane %v1372_v18, 2  ;;  %v3793_v37 = vld [vmem:[%s10290_s3 + $0xf8] sm:$0xff] }
 0x15f   : > { %v1377_v9 = vrot.slane %v1375_v55, 2  ;;  %v1378_v7 = vrot.slane %v7523_v1, 7  ;;  %v7555_v25 = vrot.slane %v7426_v46, %v6672_v42  ;;  %v10418_v13 = vcombine.low %v7426_v46, %v7414_v3  ;;  %5828 = vmatprep.subr.mxu1 %v3793_v37 }
 0x160   : > { %v7565_v39 = vcombine.high %v7523_v1, %v7523_v1  ;;  %v7572_v29 = vmax.f32 %v7431_v33, %v1362_v54  ;;  %v7575_v4 = vmax.f32 %v7457_v28, %v1365_v32  ;;  %v7577_v3 = vrot.slane %v2606_v45, 1 }
 0x161   : > { %10417 = vst [vmem:[#allocation23_spill] sm:$0xff] %v7555_v25  ;;  %v2133_v34 = vrot.slane %v10418_v13, %v6672_v42  ;;  %2852 = vrot.lane.b32.xlu0 %v7331_v59, %s6425_s24  ;;  %2782 = vrot.lane.b32.xlu1 %v7463_v12, %s10371_s23  ;;  %v1379_v46 = vsel %vm6695_vm8, %v1377_v9, %v1378_v7  ;;  %v3777_v59 = vld [vmem:[%s10290_s3 + $0x78] sm:$0xff]  ;;  %v7592_v28 = vrot.slane %v2614_v52, 1  ;;  %v2667_v45 = vrot.slane %v7531_v49, 1 }
 0x162   : > { %v7588_v47 = vrot.slane %v941_v16, %v6672_v42  ;;  %v7590_v33 = vmax.f32 %v940_v17, %v1379_v46  ;;  %v1373_v54 = vsel %vm6695_vm8, %v1371_v5, %v1372_v18  ;;  %v1376_v32 = vsel %vm6695_vm8, %v1374_v40, %v1375_v55  ;;  %5829 = vmatpush3.msra.mxu1 %v3777_v59  ;;  %v10422_v18 = vld [vmem:[#allocation16_spill] sm:$0xff]  ;;  %v10423_v40 = vld [vmem:[#allocation7_spill] sm:$0xff] }
 0x163   : > { %v1380_v9 = vrot.slane %v1378_v7, 2  ;;  %v10419_v13 = vrot.slane %v7294_v56, 7  ;;  %v1381_v52 = vrot.slane %v7565_v39, 7  ;;  %v7607_v17 = vsel %vm2174_vm9, %v2667_v45, %v7592_v28  ;;  %v3792_v56 = vld [vmem:[%s10290_s3 + $0xf0] sm:$0xff] }
 0x164   : > { %10420 = vst [vmem:[#allocation24_spill] sm:$0xff] %v7607_v17  ;;  %v7614_v5 = vmax.f32 %v7411_v0, %v7365_v10  ;;  %v7630_v0 = vcombine.high %v7588_v47, %v7588_v47  ;;  %v7634_v55 = vmax.f32 %v7193_v43, %v10422_v18  ;;  %v1721_v7 = vmax.f32 %v10423_v40, %v7343_v21  ;;  %v10425_v43 = vld [vmem:[#allocation5_spill] sm:$0xff]  ;;  %v10427_v18 = vld [vmem:[#allocation19_spill] sm:$0xff] }
 0x165   : > { %v1345_v16 = vsel %vm6695_vm8, %v7340_v62, %v10419_v13  ;;  %v3776_v62 = vld [vmem:[%s10290_s3 + $0x70] sm:$0xff]  ;;  %2213 = vrot.lane.b32.xlu0 %v7374_v57, %s6422_s21  ;;  %2517 = vrot.lane.b32.xlu1 %v7480_v11, %s6421_s17  ;;  %v3791_v57 = vld [vmem:[%s10290_s3 + $0xe8] sm:$0xff]  ;;  %v7642_v37 = vmax.f32 %v7511_v44, %v1373_v54  ;;  %v1718_v45 = vmax.f32 %v10425_v43, %v7334_v19  ;;  %v1383_v38 = vrot.slane %v1381_v52, 2 }
 0x166   : > { %v7610_v46 = vmax.f32 %v7278_v35, %v1345_v16  ;;  %10421 = vst [vmem:[#allocation25_spill] sm:$0xff] %v7614_v5  ;;  %v7626_v35 = vrot.slane %v2133_v34, 1  ;;  %v7645_v34 = vmax.f32 %v7509_v50, %v1376_v32  ;;  %5830 = vmatprep.subr.mxu1 %v3792_v56  ;;  %v10426_v21 = vld [vmem:[#allocation13_spill] sm:$0xff]  ;;  %v2386_v16 = vcombine.low %v1721_v7, %v7614_v5  ;;  %v7669_v32 = vld [vmem:[%s10289_s2] ss:$0 sm:$0xff]  ;;  %v10428_v56 = vld [vmem:[#allocation14_spill] sm:$0xff] }
 0x167   : > { %v1719_v13 = vmax.f32 %v10426_v21, %v7634_v55  ;;  %v1945_v40 = vcombine.low %v10427_v18, %v1721_v7  ;;  %v1724_v44 = vmax.f32 %v7329_v24, %v7417_v27  ;;  %5831 = vmatpush3.msra.mxu1 %v3776_v62  ;;  %v1382_v50 = vsel %vm6695_vm8, %v1380_v9, %v1381_v52  ;;  %v10429_v24 = vld [vmem:[#allocation15_spill] sm:$0xff]  ;;  %v3774_v52 = vld [vmem:[%s10290_s3 + $0x60] sm:$0xff] }
 0x168   : > { %v7649_v59 = vmax.f32 %v7326_v30, %v7610_v46  ;;  %v3775_v30 = vld [vmem:[%s10290_s3 + $0x68] sm:$0xff]  ;;  %v593_v7 = vadd.f32 %v7669_v32, %v10428_v56  ;;  %v598_v62 = vadd.f32 %v7669_v32, %v10429_v24  ;;  %5832 = vmatprep.subr.mxu1 %v3791_v57  ;;  %v1384_v9 = vrot.slane %v7588_v47, 7 }
 0x169   : > { %2695 = vrot.lane.b32.xlu0 %v7401_v51, %s6423_s22  ;;  %2938 = vrot.lane.b32.xlu1 %v7480_v11, %s10322_s25  ;;  %v2385_v43 = vcombine.low %v1719_v13, %v10427_v18  ;;  %v2400_v21 = vrot.slane %v2386_v16, %v6672_v42  ;;  %v1944_v54 = vcombine.low %v1718_v45, %v1719_v13  ;;  %v3790_v45 = vld [vmem:[%s10290_s3 + $0xe0] sm:$0xff]  ;;  %v5785_v13 = vrot.slane %v7630_v0, 9 }
 0x16a   : > { %10424 = vst [vmem:[#allocation16_spill] sm:$0xff] %v7649_v59  ;;  %v1959_v56 = vrot.slane %v1945_v40, %v6672_v42  ;;  %v2615_v26 = vcombine.low %v7649_v59, %v1724_v44  ;;  %v652_v24 = vmax.f32 %v593_v7, 0.0  ;;  %5833 = vmatpush3.msra.mxu1 %v3775_v30  ;;  %v653_v12 = vmax.f32 %v598_v62, 0.0  ;;  %v3773_v7 = vld [vmem:[%s10290_s3 + $0x58] sm:$0xff] }
 0x16b   : > { %v2393_v57 = vrot.slane %v2385_v43, %v6672_v42  ;;  %v1952_v51 = vrot.slane %v1944_v54, %v6672_v42  ;;  %v7688_v14 = vmax.f32 %v7365_v10, %v7572_v29  ;;  %5834 = vmatprep.subr.mxu1 %v3790_v45  ;;  %v3789_v10 = vld [vmem:[%s10290_s3 + $0xd8] sm:$0xff]  ;;  %v1386_v44 = vrot.slane %v1384_v9, 2 }
 0x16c   : > { %v2622_v16 = vrot.slane %v2615_v26, %v6672_v42  ;;  %v958_v18 = vcombine.high %v652_v24, %v652_v24  ;;  %v965_v40 = vrot.slane %v652_v24, %v6672_v42  ;;  %v975_v26 = vcombine.high %v653_v12, %v653_v12  ;;  %5835 = vmatpush3.msra.mxu1 %v3774_v52 }
 0x16d   : > { %10430 = vst [vmem:[#allocation7_spill] sm:$0xff] %v7688_v14  ;;  %2519 = vrot.lane.b32.xlu0 %v7399_v15, %s6421_s17  ;;  %2219 = vrot.lane.b32.xlu1 %v7498_v6, %s6422_s21  ;;  %v7706_v30 = vcombine.low %v2393_v57, %v2400_v21  ;;  %v7708_v54 = vcombine.low %v1952_v51, %v1959_v56  ;;  %v3788_v51 = vld [vmem:[%s10290_s3 + $0xd0] sm:$0xff] }
 0x16e   : > { %v7713_v62 = vrot.slane %v2622_v16, 1  ;;  %v972_v43 = vrot.slane %v958_v18, %v6672_v42  ;;  %v973_v24 = vcombine.high %v965_v40, %v965_v40  ;;  %v1389_v45 = vrot.slane %v965_v40, 7  ;;  %5836 = vmatprep.subr.mxu1 %v3789_v10 }
 0x16f   : > { %10431 = vst [vmem:[#allocation5_spill] sm:$0xff] %v7706_v30  ;;  %10432 = vst [vmem:[#allocation13_spill] sm:$0xff] %v7708_v54  ;;  %v7717_v15 = vmax.f32 %v7523_v1, %v1382_v50  ;;  %v2670_v21 = vrot.slane %v7706_v30, 1  ;;  %v982_v56 = vrot.slane %v653_v12, %v6672_v42  ;;  %v7722_v57 = vrot.slane %v975_v26, %v6672_v42  ;;  %v3772_v1 = vld [vmem:[%s10290_s3 + $0x50] sm:$0xff]  ;;  %v3787_v26 = vld [vmem:[%s10290_s3 + $0xc8] sm:$0xff] }
 0x170   : > { %10433 = vst [vmem:[#allocation19_spill] sm:$0xff] %v7713_v62  ;;  %v974_v16 = vcombine.high %v972_v43, %v972_v43  ;;  %v1390_v18 = vsel %vm6695_vm8, %v5785_v13, %v1389_v45  ;;  %v1391_v52 = vrot.slane %v1389_v45, 2  ;;  %v1392_v54 = vrot.slane %v973_v24, 7  ;;  %5837 = vmatpush3.msra.mxu1 %v3773_v7  ;;  %v7748_v7 = vpop.f32.mrf.mxu0 }
 0x171   : > { %2856 = vrot.lane.b32.xlu0 %v7498_v6, %s6425_s24  ;;  %2699 = vrot.lane.b32.xlu1 %v7577_v3, %s6423_s22  ;;  %v1385_v12 = vsel %vm6695_vm8, %v1383_v38, %v1384_v9  ;;  %v7740_v50 = vsel %vm2174_vm9, %v2670_v21, %v7713_v62  ;;  %v1395_v13 = vrot.slane %v972_v43, 7  ;;  %v7743_v10 = vmax.f32 %v7630_v0, %v1390_v18 }
 0x172   : > { %10434 = vst [vmem:[#allocation14_spill] sm:$0xff] %v7740_v50  ;;  %10435 = vst [vmem:[#allocation15_spill] sm:$0xff] %v7748_v7  ;;  %v1393_v6 = vsel %vm6695_vm8, %v1391_v52, %v1392_v54  ;;  %v1394_v45 = vrot.slane %v1392_v54, 2  ;;  %v1398_v30 = vrot.slane %v974_v16, 7  ;;  %v990_v38 = vcombine.high %v982_v56, %v982_v56  ;;  %5838 = vmatprep.subr.mxu1 %v3788_v51  ;;  %v3771_v50 = vld [vmem:[%s10290_s3 + $0x48] sm:$0xff]  ;;  %v6265_v62 = vpop.f32.mrf.mxu0 }
 0x173   : > { %v1397_v9 = vrot.slane %v1395_v13, 2  ;;  %v7752_v21 = vmax.f32 %v965_v40, %v1393_v6  ;;  %v7756_v0 = vcombine.high %v7722_v57, %v7722_v57  ;;  %v1401_v18 = vrot.slane %v982_v56, 7  ;;  %5839 = vmatpush3.msra.mxu1 %v3772_v1  ;;  %v3786_v40 = vld [vmem:[%s10290_s3 + $0xc0] sm:$0xff] }
 0x174   : > { %v1396_v54 = vsel %vm6695_vm8, %v1394_v45, %v1395_v13  ;;  %v1400_v52 = vrot.slane %v1398_v30, 2  ;;  %v1404_v7 = vrot.slane %v990_v38, 7  ;;  %v5786_v51 = vrot.slane %v7722_v57, 9  ;;  %5840 = vmatprep.subr.mxu1 %v3787_v26  ;;  %v3770_v6 = vld [vmem:[%s10290_s3 + $0x40] sm:$0xff]  ;;  %v7782_v45 = vpop.f32.mrf.mxu0 }
 0x175   : > { %10436 = vst [vmem:[#allocation26_spill] sm:$0xff] %v7752_v21  ;;  %3012 = vrot.lane.b32.xlu0 %v7577_v3, %s6427_s26  ;;  %2217 = vrot.lane.b32.xlu1 %v7541_v48, %s6422_s21  ;;  %v1399_v62 = vsel %vm6695_vm8, %v1397_v9, %v1398_v30  ;;  %v7773_v1 = vmax.f32 %v973_v24, %v1396_v54  ;;  %v1403_v26 = vrot.slane %v1401_v18, 2  ;;  %v1409_v30 = vrot.slane %v7756_v0, 7 }
 0x176   : > { %v7777_v13 = vmax.f32 %v7642_v37, %v7752_v21  ;;  %v7784_v5 = vmax.f32 %v972_v43, %v1399_v62  ;;  %v1402_v59 = vsel %vm6695_vm8, %v1400_v52, %v1401_v18  ;;  %v1406_v17 = vrot.slane %v1404_v7, 2  ;;  %5841 = vmatpush3.msra.mxu1 %v3771_v50  ;;  %v3785_v43 = vld [vmem:[%s10290_s3 + $0xb8] sm:$0xff]  ;;  %v6268_v18 = vpop.f32.mrf.mxu0 }
 0x177   : > { %v7790_v24 = vmax.f32 %v7588_v47, %v1386_v44  ;;  %v7794_v9 = vmax.f32 %v7645_v34, %v7773_v1  ;;  %v1405_v54 = vsel %vm6695_vm8, %v1403_v26, %v1404_v7  ;;  %v7798_v21 = vmax.f32 %v974_v16, %v1402_v59  ;;  %5842 = vmatprep.subr.mxu1 %v3786_v40  ;;  %v3769_v59 = vld [vmem:[%s10290_s3 + $0x38] sm:$0xff]  ;;  %v3784_v7 = vld [vmem:[%s10290_s3 + $0xb0] sm:$0xff] }
 0x178   : > { %v7804_v50 = vmax.f32 %v7565_v39, %v1385_v12  ;;  %v7808_v47 = vmax.f32 %v7590_v33, %v7784_v5  ;;  %v1410_v44 = vsel %vm6695_vm8, %v5786_v51, %v1409_v30  ;;  %v7812_v52 = vmax.f32 %v982_v56, %v1405_v54  ;;  %5843 = vmatpush3.msra.mxu1 %v3770_v6  ;;  %v10440_v51 = vld [vmem:[#allocation17_spill] sm:$0xff] }
 0x179   : > { %2854 = vrot.lane.b32.xlu1 %v7541_v48, %s6425_s24  ;;  %2788 = vrot.lane.b32.xlu0 %v7555_v25, %s10371_s23  ;;  %v2187_v39 = vrot.slane %v7461_v53, 1  ;;  %v7822_v16 = vmax.f32 %v990_v38, %v1406_v17  ;;  %v7825_v12 = vmax.f32 %v7722_v57, %v1410_v44  ;;  %v7829_v56 = vmax.f32 %v7717_v15, %v7798_v21  ;;  %v3783_v44 = vld [vmem:[%s10290_s3 + $0xa8] sm:$0xff] }
 0x17a   : > { %10437 = vst [vmem:[#allocation27_spill] sm:$0xff] %v7812_v52  ;;  %v7836_v48 = vmax.f32 %v7804_v50, %v7812_v52  ;;  %v603_v40 = vadd.f32 %v7669_v32, %v10440_v51  ;;  %v7842_v17 = vmax.f32 %v7610_v46, %v7575_v4  ;;  %v7846_v57 = vmax.f32 %v7347_v20, %v7450_v60  ;;  %v3768_v46 = vld [vmem:[%s10290_s3 + $0x30] sm:$0xff] }
 0x17b   : > { %10438 = vst [vmem:[#allocation28_spill] sm:$0xff] %v7829_v56  ;;  %5844 = vmatprep.subr.mxu1 %v3785_v43  ;;  %v1726_v26 = vmax.f32 %v7634_v55, %v7471_v31  ;;  %v2410_v6 = vcombine.low %v7493_v58, %v7688_v14  ;;  %v10441_v20 = vrot.slane %v7480_v11, 1  ;;  %v10442_v43 = vld [vmem:[#allocation18_spill] sm:$0xff]  ;;  %v1725_v55 = vmax.f32 %v7334_v19, %v7454_v41 }
 0x17c   : > { %10439 = vst [vmem:[#allocation29_spill] sm:$0xff] %v7836_v48  ;;  %5845 = vmatpush3.msra.mxu1 %v3769_v59  ;;  %v654_v54 = vmax.f32 %v603_v40, 0.0  ;;  %v1727_v18 = vmax.f32 %v10442_v43, %v7846_v57  ;;  %v1411_v11 = vrot.slane %v1409_v30, 2  ;;  %v3767_v19 = vld [vmem:[%s10290_s3 + $0x28] sm:$0xff]  ;;  %v2189_v43 = vsel %vm2174_vm9, %v2187_v39, %v7626_v35  ;;  %v3782_v59 = vld [vmem:[%s10290_s3 + $0xa0] sm:$0xff] }
 0x17d   : > { %v2666_v60 = vsel %vm2174_vm9, %v10441_v20, %v7577_v3  ;;  %5846 = vmatprep.subr.mxu1 %v3784_v7  ;;  %2944 = vrot.lane.b32.xlu0 %v7529_v2, %s10443_s16  ;;  %v608_v3 = vadd.f32 %v7669_v32, %v7284_v22  ;;  %v1968_v20 = vcombine.low %v1725_v55, %v1726_v26  ;;  %v3766_v39 = vld [vmem:[%s10290_s3 + $0x20] sm:$0xff] }
 0x17e   : > { %2697 = vrot.lane.b32.xlu1 %v2666_v60, %s6423_s22  ;;  %v992_v7 = vcombine.high %v654_v54, %v654_v54  ;;  %v999_v51 = vrot.slane %v654_v54, %v6672_v42  ;;  %v2409_v40 = vcombine.low %v1726_v26, %v1727_v18  ;;  %5847 = vmatpush3.msra.mxu1 %v3768_v46 }
 0x17f   : > { %v2424_v30 = vrot.slane %v2410_v6, %v6672_v42  ;;  %v1969_v22 = vcombine.low %v1727_v18, %v7493_v58  ;;  %v655_v62 = vmax.f32 %v608_v3, 0.0  ;;  %5848 = vmatprep.subr.mxu1 %v3783_v44  ;;  %v1976_v58 = vrot.slane %v1968_v20, %v6672_v42  ;;  %v3781_v44 = vld [vmem:[%s10290_s3 + $0x98] sm:$0xff] }
 0x180   : > { %v1006_v38 = vrot.slane %v992_v7, %v6672_v42  ;;  %v1007_v25 = vcombine.high %v999_v51, %v999_v51  ;;  %v1412_v54 = vrot.slane %v999_v51, 7  ;;  %v2417_v26 = vrot.slane %v2409_v40, %v6672_v42  ;;  %5849 = vmatpush3.msra.mxu1 %v3767_v19 }
 0x181   : > { %2223 = vrot.lane.b32.xlu0 %v7626_v35, %s6422_s21  ;;  %v1983_v6 = vrot.slane %v1969_v22, %v6672_v42  ;;  %v1009_v46 = vcombine.high %v655_v62, %v655_v62  ;;  %v10444_v18 = vrot.slane %v7488_v61, 7  ;;  %5850 = vmatprep.subr.mxu1 %v3782_v59  ;;  %v1016_v59 = vrot.slane %v655_v62, %v6672_v42  ;;  %v3764_v62 = vld [vmem:[%s10290_s3 + $0x10] sm:$0xff] }
 0x182   : > { %3010 = vrot.lane.b32.xlu1 %v2666_v60, %s6427_s26  ;;  %v1008_v3 = vcombine.high %v1006_v38, %v1006_v38  ;;  %v1413_v19 = vsel %vm6695_vm8, %v1411_v11, %v1412_v54  ;;  %v1414_v60 = vrot.slane %v1412_v54, 2  ;;  %v1415_v7 = vrot.slane %v1007_v25, 7  ;;  %5851 = vmatpush3.msra.mxu1 %v3766_v39 }
 0x183   : > { %v1366_v55 = vrot.slane %v10444_v18, 2  ;;  %v1418_v40 = vrot.slane %v1006_v38, 7  ;;  %v7906_v20 = vmax.f32 %v7756_v0, %v1413_v19  ;;  %v7908_v22 = vcombine.low %v2417_v26, %v2424_v30  ;;  %v3765_v18 = vld [vmem:[%s10290_s3 + $0x18] sm:$0xff]  ;;  %5852 = vmatprep.subr.mxu1 %v3781_v44  ;;  %v3780_v0 = vld [vmem:[%s10290_s3 + $0x90] sm:$0xff] }
 0x184   : > { %v7910_v14 = vcombine.low %v1976_v58, %v1983_v6  ;;  %v1416_v52 = vsel %vm6695_vm8, %v1414_v60, %v1415_v7  ;;  %v1417_v11 = vrot.slane %v1415_v7, 2  ;;  %v1421_v54 = vrot.slane %v1008_v3, 7  ;;  %5853 = vmatpush3.msra.mxu1 %v3765_v18 }
 0x185   : > { %2221 = vrot.lane.b32.xlu0 %v2189_v43, %s6422_s21  ;;  %v1420_v30 = vrot.slane %v1418_v40, 2  ;;  %v7924_v26 = vmax.f32 %v999_v51, %v1416_v52  ;;  %v1023_v39 = vrot.slane %v1009_v46, %v6672_v42  ;;  %v1613_v58 = vmax.f32 %v7488_v61, %v1366_v55  ;;  %5854 = vmatprep.subr.mxu1 %v3780_v0  ;;  %v3779_v46 = vld [vmem:[%s10290_s3 + $0x88] sm:$0xff] }
 0x186   : > { %10445 = vst [vmem:[#allocation17_spill] sm:$0xff] %v7910_v14  ;;  %2523 = vrot.lane.b32.xlu1 %v7529_v2, %s6421_s17  ;;  %v1419_v6 = vsel %vm6695_vm8, %v1417_v11, %v1418_v40  ;;  %v1423_v44 = vrot.slane %v1421_v54, 2  ;;  %v1024_v19 = vcombine.high %v1016_v59, %v1016_v59  ;;  %v1424_v60 = vrot.slane %v1016_v59, 7  ;;  %5855 = vmatpush3.msra.mxu1 %v3764_v62 }
 0x187   : > { %v1422_v2 = vsel %vm6695_vm8, %v1420_v30, %v1421_v54  ;;  %v7935_v52 = vmax.f32 %v1007_v25, %v1419_v6  ;;  %v7939_v51 = vmax.f32 %v7773_v1, %v7924_v26  ;;  %v7941_v61 = vcombine.high %v1023_v39, %v1023_v39  ;;  %v3763_v25 = vld [vmem:[%s10290_s3 + $0x8] sm:$0xff]  ;;  %v3778_v54 = vld [vmem:[%s10290_s3 + $0x80] sm:$0xff]  ;;  %5856 = vmatprep.subr.mxu1 %v3779_v46 }
 0x188   : > { %v7946_v55 = vmax.f32 %v1006_v38, %v1422_v2  ;;  %v1425_v7 = vsel %vm6695_vm8, %v1423_v44, %v1424_v60  ;;  %v1426_v40 = vrot.slane %v1424_v60, 2  ;;  %v5787_v18 = vrot.slane %v1024_v19, 9  ;;  %5857 = vmatpush3.msra.mxu1 %v3763_v25 }
 0x189   : > { %2858 = vrot.lane.b32.xlu0 %v2189_v43, %s6425_s24  ;;  %v7958_v1 = vmax.f32 %v7784_v5, %v7935_v52  ;;  %v1429_v38 = vrot.slane %v1023_v39, 7  ;;  %v7960_v11 = vmax.f32 %v1008_v3, %v1425_v7  ;;  %v1731_v62 = vmax.f32 %v7417_v27, %v1613_v58  ;;  %5858 = vmatprep.subr.mxu1 %v3778_v54 }
 0x18a   : > { %2786 = vrot.lane.b32.xlu1 %v7461_v53, %s10371_s23  ;;  %v7967_v0 = vmax.f32 %v7798_v21, %v7946_v55  ;;  %v7969_v30 = vmax.f32 %v1016_v59, %v1426_v40  ;;  %v1432_v3 = vrot.slane %v7941_v61, 7  ;;  %v7977_v6 = vmax.f32 %v7572_v29, %v7717_v15  ;;  %v3762_v21 = vld [vmem:[%s10290_s3] sm:$0xff]  ;;  %v7991_v29 = vpop.permute.xlu0 %2507 }
 0x18b   : > { %v1430_v5 = vsel %vm6695_vm8, %v5787_v18, %v1429_v38  ;;  %v1431_v43 = vrot.slane %v1429_v38, 2  ;;  %v2623_v44 = vcombine.low %v7842_v17, %v1731_v62  ;;  %10447 = vst [vmem:[#allocation30_spill] sm:$0xff] %v7991_v29  ;;  %v1733_v60 = vmax.f32 %v7471_v31, %v7642_v37  ;;  %5859 = vmatpush3.msra.mxu1 %v3762_v21 }
 0x18c   : > { %10446 = vst [vmem:[#allocation18_spill] sm:$0xff] %v7967_v0  ;;  %v7982_v59 = vmax.f32 %v1024_v19, %v1430_v5  ;;  %v2673_v19 = vrot.slane %v7908_v22, 1  ;;  %v1734_v40 = vmax.f32 %v7846_v57, %v7645_v34  ;;  %v1735_v18 = vmax.f32 %v7475_v8, %v7590_v33 }
 0x18d   : > { %3016 = vrot.lane.b32.xlu0 %v7592_v28, %s6427_s26  ;;  %v1433_v15 = vsel %vm6695_vm8, %v1431_v43, %v1432_v3  ;;  %v2630_v7 = vrot.slane %v2623_v44, %v6672_v42  ;;  %v8009_v25 = vmax.f32 %v7575_v4, %v7804_v50  ;;  %v1738_v31 = vmax.f32 %v1613_v58, %v7790_v24  ;;  %v10449_v4 = vld [vmem:[#allocation24_spill] sm:$0xff] }
 0x18e   : > { %2521 = vrot.lane.b32.xlu1 %v7531_v49, %s6421_s17  ;;  %v7998_v2 = vmax.f32 %v1023_v39, %v1433_v15  ;;  %v613_v37 = vadd.f32 %v7669_v32, %v7513_v36  ;;  %v2433_v34 = vcombine.low %v1733_v60, %v1734_v40  ;;  %v10448_v57 = vmax.f32 %v7454_v41, %v7549_v23 }
 0x18f   : > { %v8018_v38 = vrot.slane %v2630_v7, 1  ;;  %v2434_v33 = vcombine.low %v1735_v18, %v7977_v6  ;;  %v2631_v36 = vcombine.low %v8009_v25, %v1738_v31  ;;  %v1993_v62 = vcombine.low %v1734_v40, %v1735_v18  ;;  %v10452_v18 = vld [vmem:[#allocation16_spill] sm:$0xff] }
 0x190   : > { %v8016_v39 = vmax.f32 %v7906_v20, %v7998_v2  ;;  %v1992_v8 = vcombine.low %v10448_v57, %v1733_v60  ;;  %v656_v50 = vmax.f32 %v613_v37, 0.0  ;;  %v2441_v54 = vrot.slane %v2433_v34, %v6672_v42 }
 0x191   : > { %2701 = vrot.lane.b32.xlu0 %v10449_v4, %s6423_s22  ;;  %v8031_v58 = vsel %vm2174_vm9, %v2673_v19, %v8018_v38  ;;  %v2448_v43 = vrot.slane %v2434_v33, %v6672_v42  ;;  %v2638_v21 = vrot.slane %v2631_v36, %v6672_v42  ;;  %v1434_v60 = vrot.slane %v1432_v3, 2 }
 0x192   : > { %2942 = vrot.lane.b32.xlu1 %v7531_v49, %s10443_s16  ;;  %v2000_v41 = vrot.slane %v1992_v8, %v6672_v42  ;;  %v1026_v44 = vcombine.high %v656_v50, %v656_v50  ;;  %v1033_v15 = vrot.slane %v656_v50, %v6672_v42  ;;  %v2007_v19 = vrot.slane %v1993_v62, %v6672_v42 }
 0x193   : > { %v8035_v5 = vpop.permute.xlu1 %2505  ;;  %v8037_v49 = vpop.permute.xlu0 %2207  ;;  %v1739_v40 = vmax.f32 %v7549_v23, %v7743_v10  ;;  %v2408_v31 = vrot.slane %v10452_v18, %v6672_v42  ;;  %v8053_v37 = vcombine.low %v2441_v54, %v2448_v43  ;;  %v8056_v34 = vrot.slane %v2638_v21, 1 }
 0x194   : > { %10450 = vst [vmem:[#allocation24_spill] sm:$0xff] %v8035_v5  ;;  %10451 = vst [vmem:[#allocation31_spill] sm:$0xff] %v8037_v49  ;;  %v1040_v3 = vrot.slane %v1026_v44, %v6672_v42  ;;  %v1041_v57 = vcombine.high %v1033_v15, %v1033_v15  ;;  %v1435_v8 = vrot.slane %v1033_v15, 7  ;;  %v8058_v33 = vcombine.low %v2000_v41, %v2007_v19  ;;  %v10456_v41 = vld [vmem:[#allocation25_spill] sm:$0xff] }
 0x195   : > { %3014 = vrot.lane.b32.xlu0 %v10449_v4, %s6427_s26  ;;  %v2676_v50 = vrot.slane %v8053_v37, 1  ;;  %v2016_v54 = vcombine.low %v1739_v40, %v7777_v13  ;;  %v10457_v21 = vcombine.low %v10456_v41, %v10452_v18  ;;  %v8091_v27 = vrot.slane %v10456_v41, %v6672_v42 }
 0x196   : > { %2860 = vrot.lane.b32.xlu1 %v7626_v35, %s6425_s24  ;;  %10453 = vst [vmem:[#allocation16_spill] sm:$0xff] %v8058_v33  ;;  %v8064_v35 = vcombine.high %v1040_v3, %v1040_v3  ;;  %v1441_v4 = vrot.slane %v1040_v3, 7  ;;  %v1436_v62 = vsel %vm6695_vm8, %v1434_v60, %v1435_v8  ;;  %v1437_v43 = vrot.slane %v1435_v8, 2 }
 0x197   : > { %v8060_v23 = vpop.permute.xlu1 %2687  ;;  %v8062_v36 = vpop.permute.xlu0 %2205  ;;  %v2141_v44 = vrot.slane %v10457_v21, %v6672_v42  ;;  %v1438_v19 = vrot.slane %v1041_v57, 7  ;;  %v8079_v40 = vmax.f32 %v7941_v61, %v1436_v62  ;;  %v8083_v60 = vsel %vm2174_vm9, %v2676_v50, %v8056_v34  ;;  %10461 = vst [vmem:[#allocation36_spill] sm:$0xff] %v8091_v27  ;;  %v10462_v50 = vld [vmem:[#allocation5_spill] sm:$0xff] }
 0x198   : > { %10454 = vst [vmem:[#allocation32_spill] sm:$0xff] %v8060_v23  ;;  %10455 = vst [vmem:[#allocation33_spill] sm:$0xff] %v8062_v36  ;;  %v1443_v7 = vrot.slane %v1441_v4, 2  ;;  %v1444_v46 = vrot.slane %v8064_v35, 7 }
 0x199   : > { %2527 = vrot.lane.b32.xlu0 %v2408_v31, %s6421_s17  ;;  %10458 = vst [vmem:[#allocation25_spill] sm:$0xff] %v8083_v60  ;;  %v1439_v18 = vsel %vm6695_vm8, %v1437_v43, %v1438_v19  ;;  %v1440_v21 = vrot.slane %v1438_v19, 2  ;;  %v2017_v43 = vcombine.low %v7794_v9, %v7808_v47 }
 0x19a   : > { %2703 = vrot.lane.b32.xlu1 %v7592_v28, %s6423_s22  ;;  %v1445_v61 = vsel %vm6695_vm8, %v1443_v7, %v1444_v46  ;;  %v8097_v62 = vmax.f32 %v1033_v15, %v1439_v18 }
 0x19b   : > { %v8085_v8 = vpop.permute.xlu0 %2776  ;;  %v8087_v28 = vpop.permute.xlu1 %2511  ;;  %v8099_v53 = vmax.f32 %v1040_v3, %v1445_v61  ;;  %v1442_v41 = vsel %vm6695_vm8, %v1440_v21, %v1441_v4  ;;  %v2024_v3 = vrot.slane %v2016_v54, %v6672_v42  ;;  %v2031_v4 = vrot.slane %v2017_v43, %v6672_v42 }
 0x19c   : > { %10459 = vst [vmem:[#allocation34_spill] sm:$0xff] %v8085_v8  ;;  %10460 = vst [vmem:[#allocation35_spill] sm:$0xff] %v8087_v28  ;;  %v8105_v28 = vrot.slane %v2141_v44, 1  ;;  %v8111_v19 = vmax.f32 %v1041_v57, %v1442_v41  ;;  %v8115_v15 = vmax.f32 %v7935_v52, %v8097_v62  ;;  %v2457_v57 = vcombine.low %v7777_v13, %v7794_v9  ;;  %v10465_v52 = vld [vmem:[#allocation15_spill] sm:$0xff] }
 0x19d   : > { %2525 = vrot.lane.b32.xlu0 %v10462_v50, %s6421_s17  ;;  %v8119_v7 = vmax.f32 %v7960_v11, %v8099_v53  ;;  %v2458_v21 = vcombine.low %v7808_v47, %v7829_v56  ;;  %v618_v61 = vadd.f32 %v7669_v32, %v10465_v52  ;;  %v8140_v54 = vcombine.low %v2024_v3, %v2031_v4  ;;  %v10467_v47 = vld [vmem:[#allocation13_spill] sm:$0xff]  ;;  %v10472_v8 = vld [vmem:[#allocation27_spill] sm:$0xff] }
 0x19e   : > { %2792 = vrot.lane.b32.xlu1 %v8091_v27, %s10371_s23  ;;  %v8135_v41 = vmax.f32 %v7946_v55, %v8111_v19  ;;  %v2465_v43 = vrot.slane %v2457_v57, %v6672_v42  ;;  %v2190_v27 = vrot.slane %v10467_v47, 1  ;;  %v10468_v52 = vmax.f32 %v7790_v24, %v7822_v16 }
 0x19f   : > { %v8122_v44 = vpop.permute.xlu0 %2685  ;;  %v8124_v18 = vpop.permute.xlu1 %2848  ;;  %10466 = vst [vmem:[#allocation15_spill] sm:$0xff] %v8140_v54  ;;  %v2472_v13 = vrot.slane %v2458_v21, %v6672_v42  ;;  %v657_v9 = vmax.f32 %v618_v61, 0.0  ;;  %v8162_v24 = vmax.f32 %v10472_v8, %v7960_v11 }
 0x1a0   : > { %10463 = vst [vmem:[#allocation5_spill] sm:$0xff] %v8122_v44  ;;  %10464 = vst [vmem:[#allocation37_spill] sm:$0xff] %v8124_v18  ;;  %v2639_v55 = vcombine.low %v7836_v48, %v10468_v52 }
 0x1a1   : > { %2864 = vrot.lane.b32.xlu0 %v8105_v28, %s6425_s24  ;;  %v8157_v57 = vcombine.low %v2465_v43, %v2472_v13  ;;  %v1043_v21 = vcombine.high %v657_v9, %v657_v9  ;;  %v1050_v61 = vrot.slane %v657_v9, %v6672_v42  ;;  %v8174_v9 = vsel %vm2174_vm9, %v2190_v27, %v8105_v28 }
 0x1a2   : > { %2948 = vrot.lane.b32.xlu1 %v2408_v31, %s10443_s16  ;;  %v623_v31 = vadd.f32 %v7669_v32, %v7782_v45  ;;  %v2646_v52 = vrot.slane %v2639_v55, %v6672_v42  ;;  %v10473_v45 = vld [vmem:[#allocation19_spill] sm:$0xff] }
 0x1a3   : > { %v8153_v3 = vpop.permute.xlu0 %2932  ;;  %v8155_v4 = vpop.permute.xlu1 %3004  ;;  %10471 = vst [vmem:[#allocation40_spill] sm:$0xff] %v8157_v57  ;;  %v1057_v18 = vrot.slane %v1043_v21, %v6672_v42  ;;  %v1058_v43 = vcombine.high %v1050_v61, %v1050_v61  ;;  %v5788_v13 = vrot.slane %v1050_v61, 9  ;;  %v2679_v36 = vrot.slane %v8157_v57, 1 }
 0x1a4   : > { %10469 = vst [vmem:[#allocation38_spill] sm:$0xff] %v8153_v3  ;;  %10470 = vst [vmem:[#allocation39_spill] sm:$0xff] %v8155_v4  ;;  %v658_v23 = vmax.f32 %v623_v31, 0.0  ;;  %v8170_v4 = vpop.f32.mrf.mxu0  ;;  %v8181_v21 = vrot.slane %v2646_v52, 1 }
 0x1a5   : > { %2707 = vrot.lane.b32.xlu0 %v10473_v45, %s6423_s22  ;;  %v1059_v3 = vcombine.high %v1057_v18, %v1057_v18  ;;  %v1449_v29 = vrot.slane %v1058_v43, 7  ;;  %v1452_v49 = vrot.slane %v1057_v18, 7 }
 0x1a6   : > { %2790 = vrot.lane.b32.xlu1 %v10467_v47, %s10371_s23  ;;  %v1060_v11 = vcombine.high %v658_v23, %v658_v23  ;;  %v1067_v8 = vrot.slane %v658_v23, %v6672_v42  ;;  %v1446_v47 = vrot.slane %v1444_v46, 2  ;;  %v6271_v27 = vpop.f32.mrf.mxu0 }
 0x1a7   : > { %v8177_v55 = vpop.permute.xlu0 %2774  ;;  %v8179_v31 = vpop.permute.xlu1 %2515  ;;  %v1450_v46 = vsel %vm6695_vm8, %v5788_v13, %v1449_v29  ;;  %v1451_v23 = vrot.slane %v1449_v29, 2 }
 0x1a8   : > { %10474 = vst [vmem:[#allocation27_spill] sm:$0xff] %v8177_v55  ;;  %10475 = vst [vmem:[#allocation19_spill] sm:$0xff] %v8179_v31  ;;  %v8184_v48 = vrot.slane %v1060_v11, %v6672_v42  ;;  %v1075_v56 = vcombine.high %v1067_v8, %v1067_v8  ;;  %v1458_v44 = vrot.slane %v1067_v8, 7  ;;  %v1454_v31 = vrot.slane %v1452_v49, 2  ;;  %v632_v54 = vpop.f32.mrf.mxu0 }
 0x1a9   : > { %2862 = vrot.lane.b32.xlu0 %v8174_v9, %s6425_s24  ;;  %v1455_v55 = vrot.slane %v1059_v3, 7  ;;  %v8192_v52 = vmax.f32 %v1050_v61, %v1450_v46 }
 0x1aa   : > { %2946 = vrot.lane.b32.xlu1 %v10462_v50, %s10443_s16  ;;  %v1460_v5 = vrot.slane %v1458_v44, 2  ;;  %v1461_v11 = vrot.slane %v1075_v56, 7  ;;  %v1453_v50 = vsel %vm6695_vm8, %v1451_v23, %v1452_v49  ;;  %v1464_v33 = vrot.slane %v8184_v48, 7  ;;  %v10478_v49 = vld [vmem:[#allocation14_spill] sm:$0xff] }
 0x1ab   : > { %v8195_v27 = vpop.permute.xlu0 %2509  ;;  %v8197_v60 = vpop.permute.xlu1 %2780  ;;  %v1456_v13 = vsel %vm6695_vm8, %v1454_v31, %v1455_v55  ;;  %v1457_v29 = vrot.slane %v1455_v55, 2  ;;  %v8204_v61 = vmax.f32 %v1058_v43, %v1453_v50  ;;  %v8221_v23 = vmax.f32 %v8064_v35, %v1446_v47 }
 0x1ac   : > { %10476 = vst [vmem:[#allocation41_spill] sm:$0xff] %v8195_v27  ;;  %10477 = vst [vmem:[#allocation42_spill] sm:$0xff] %v8197_v60  ;;  %v8206_v46 = vmax.f32 %v1057_v18, %v1456_v13  ;;  %v1462_v27 = vsel %vm6695_vm8, %v1460_v5, %v1461_v11  ;;  %v6274_v60 = vpop.f32.mrf.mxu0  ;;  %v1463_v43 = vrot.slane %v1461_v11, 2  ;;  %v1466_v31 = vrot.slane %v1464_v33, 2  ;;  %v10480_v11 = vld [vmem:[#allocation26_spill] sm:$0xff] }
 0x1ad   : > { %3018 = vrot.lane.b32.xlu0 %v10478_v49, %s6427_s26  ;;  %v1459_v55 = vsel %vm6695_vm8, %v1457_v29, %v1458_v44  ;;  %v8218_v18 = vmax.f32 %v1067_v8, %v1462_v27  ;;  %v8225_v5 = vmax.f32 %v7998_v2, %v8204_v61  ;;  %v8248_v47 = vsel %vm2174_vm9, %v2679_v36, %v8181_v21 }
 0x1ae   : > { %2227 = vrot.lane.b32.xlu1 %v8105_v28, %s6422_s21  ;;  %v8229_v60 = vmax.f32 %v8079_v40, %v8206_v46  ;;  %v8231_v28 = vmax.f32 %v1059_v3, %v1459_v55  ;;  %v1465_v8 = vsel %vm6695_vm8, %v1463_v43, %v1464_v33  ;;  %v8240_v35 = vmax.f32 %v8184_v48, %v1466_v31  ;;  %v10483_v55 = vld [vmem:[#allocation7_spill] sm:$0xff] }
 0x1af   : > { %v8233_v50 = vpop.permute.xlu0 %2930  ;;  %v8235_v44 = vpop.permute.xlu1 %2936  ;;  %v8244_v2 = vmax.f32 %v8111_v19, %v8218_v18  ;;  %v8250_v3 = vmax.f32 %v1075_v56, %v1465_v8  ;;  %v1747_v27 = vmax.f32 %v10480_v11, %v7906_v20  ;;  %v2041_v19 = vcombine.low %v7939_v51, %v7958_v1 }
 0x1b0   : > { %10479 = vst [vmem:[#allocation14_spill] sm:$0xff] %v8235_v44  ;;  %v2482_v36 = vcombine.low %v7958_v1, %v7967_v0  ;;  %v10481_v20 = vmax.f32 %v7743_v10, %v7825_v12  ;;  %v8278_v43 = vrot.slane %v10483_v55, %v6672_v42 }
 0x1b1   : > { %2705 = vrot.lane.b32.xlu0 %v10478_v49, %s6423_s22  ;;  %v8266_v56 = vmax.f32 %v8099_v53, %v8250_v3  ;;  %v2481_v13 = vcombine.low %v1747_v27, %v7939_v51  ;;  %v2055_v1 = vrot.slane %v2041_v19, %v6672_v42  ;;  %v10485_v51 = vmax.f32 %v7822_v16, %v7969_v30 }
 0x1b2   : > { %3020 = vrot.lane.b32.xlu1 %v10473_v45, %s6427_s26  ;;  %v2040_v45 = vcombine.low %v10481_v20, %v1747_v27  ;;  %10484 = vst [vmem:[#allocation7_spill] sm:$0xff] %v8278_v43  ;;  %v2496_v31 = vrot.slane %v2482_v36, %v6672_v42  ;;  %v10486_v27 = vcombine.low %v10483_v55, %v7842_v17 }
 0x1b3   : > { %v8272_v29 = vpop.permute.xlu0 %2211  ;;  %v8274_v49 = vpop.permute.xlu1 %2513  ;;  %v2489_v8 = vrot.slane %v2481_v13, %v6672_v42  ;;  %v2647_v11 = vcombine.low %v8162_v24, %v10485_v51  ;;  %v8300_v36 = vcombine.high %v8184_v48, %v8184_v48  ;;  %v628_v16 = vadd.f32 %v7669_v32, %v8170_v4 }
 0x1b4   : > { %10482 = vst [vmem:[#allocation26_spill] sm:$0xff] %v8272_v29  ;;  %v2048_v10 = vrot.slane %v2040_v45, %v6672_v42  ;;  %v2149_v19 = vrot.slane %v10486_v27, %v6672_v42  ;;  %v8311_v13 = vmax.f32 %v7924_v26, %v8079_v40  ;;  %v2432_v48 = vrot.slane %v7842_v17, %v6672_v42 }
 0x1b5   : > { %2796 = vrot.lane.b32.xlu0 %v8278_v43, %s10371_s23  ;;  %v8306_v45 = vcombine.low %v2489_v8, %v2496_v31  ;;  %v659_v27 = vmax.f32 %v628_v16, 0.0  ;;  %v10490_v4 = vmax.f32 %v7825_v12, %v7982_v59  ;;  %v633_v31 = vadd.f32 %v7669_v32, %v632_v54 }
 0x1b6   : > { %2225 = vrot.lane.b32.xlu1 %v8174_v9, %s6422_s21  ;;  %v8304_v20 = vcombine.low %v2048_v10, %v2055_v1  ;;  %v2654_v9 = vrot.slane %v2647_v11, %v6672_v42  ;;  %v8328_v26 = vrot.slane %v2149_v19, 1  ;;  %v5789_v17 = vrot.slane %v8300_v36, 9 }
 0x1b7   : > { %10488 = vst [vmem:[#allocation44_spill] sm:$0xff] %v8306_v45  ;;  %v8313_v51 = vpop.permute.xlu0 %2691  ;;  %v8315_v55 = vpop.permute.xlu1 %2215  ;;  %v2750_v1 = vcombine.low %v10490_v4, %v8016_v39  ;;  %v2682_v40 = vrot.slane %v8306_v45, 1  ;;  %v1077_v8 = vcombine.high %v659_v27, %v659_v27  ;;  %v1084_v11 = vrot.slane %v659_v27, %v6672_v42 }
 0x1b8   : > { %10487 = vst [vmem:[#allocation43_spill] sm:$0xff] %v8304_v20  ;;  %10489 = vst [vmem:[#allocation45_spill] sm:$0xff] %v8313_v51  ;;  %v8324_v10 = vrot.slane %v2654_v9, 1  ;;  %v2751_v12 = vcombine.low %v8311_v13, %v8115_v15  ;;  %v2906_v4 = vcombine.low %v8016_v39, %v8311_v13  ;;  %v2193_v27 = vrot.slane %v7910_v14, 1 }
 0x1b9   : > { %2952 = vrot.lane.b32.xlu0 %v2432_v48, %s10443_s16  ;;  %v2758_v32 = vrot.slane %v2750_v1, %v6672_v42  ;;  %v1091_v9 = vrot.slane %v1077_v8, %v6672_v42  ;;  %v1092_v53 = vcombine.high %v1084_v11, %v1084_v11  ;;  %v1651_v33 = vrot.slane %v1084_v11, 7 }
 0x1ba   : > { %10491 = vst [vmem:[#allocation46_spill] sm:$0xff] %v8324_v10  ;;  %2531 = vrot.lane.b32.xlu1 %v2432_v48, %s6421_s17  ;;  %v8342_v19 = vsel %vm2174_vm9, %v2682_v40, %v8324_v10  ;;  %v660_v48 = vmax.f32 %v633_v31, 0.0  ;;  %v2765_v1 = vrot.slane %v2751_v12, %v6672_v42 }
 0x1bb   : > { %v8336_v54 = vpop.permute.xlu0 %2209  ;;  %v8338_v16 = vpop.permute.xlu1 %2850  ;;  %10492 = vst [vmem:[#allocation47_spill] sm:$0xff] %v8342_v19  ;;  %v1093_v40 = vcombine.high %v1091_v9, %v1091_v9  ;;  %v1657_v57 = vrot.slane %v1091_v9, 7  ;;  %v8356_v31 = vsel %vm6695_vm8, %v5789_v17, %v1651_v33  ;;  %v1653_v39 = vrot.slane %v1651_v33, 2 }
 0x1bc   : > { %v1100_v8 = vrot.slane %v660_v48, %v6672_v42  ;;  %v1654_v13 = vrot.slane %v1092_v53, 7  ;;  %v8358_v43 = vcombine.low %v2758_v32, %v2765_v1  ;;  %v2195_v48 = vsel %vm2174_vm9, %v2193_v27, %v8328_v26 }
 0x1bd   : > { %2794 = vrot.lane.b32.xlu0 %v7910_v14, %s10371_s23  ;;  %v1659_v10 = vrot.slane %v1657_v57, 2  ;;  %v1660_v44 = vrot.slane %v1093_v40, 7 }
 0x1be   : > { %2529 = vrot.lane.b32.xlu1 %v7908_v22, %s6421_s17  ;;  %10493 = vst [vmem:[#allocation48_spill] sm:$0xff] %v8358_v43  ;;  %v1101_v51 = vcombine.high %v1100_v8, %v1100_v8  ;;  %v1655_v17 = vsel %vm6695_vm8, %v1653_v39, %v1654_v13  ;;  %v1656_v33 = vrot.slane %v1654_v13, 2  ;;  %v1663_v0 = vrot.slane %v1100_v8, 7 }
 0x1bf   : > { %v8360_v19 = vpop.permute.xlu0 %2846  ;;  %v8362_v12 = vpop.permute.xlu1 %3008  ;;  %v1661_v32 = vsel %vm6695_vm8, %v1659_v10, %v1660_v44  ;;  %v1662_v1 = vrot.slane %v1660_v44, 2  ;;  %v1677_v43 = vmax.f32 %v1084_v11, %v1655_v17  ;;  %v2907_v44 = vcombine.low %v8115_v15, %v8135_v41 }
 0x1c0   : > { %10494 = vst [vmem:[#allocation49_spill] sm:$0xff] %v8362_v12  ;;  %v1658_v14 = vsel %vm6695_vm8, %v1656_v33, %v1657_v57  ;;  %v1679_v12 = vmax.f32 %v1091_v9, %v1661_v32  ;;  %v1665_v27 = vrot.slane %v1663_v0, 2  ;;  %v1666_v29 = vrot.slane %v1101_v51, 7 }
 0x1c1   : > { %2950 = vrot.lane.b32.xlu0 %v7908_v22, %s10443_s16  ;;  %v1678_v13 = vmax.f32 %v1092_v53, %v1658_v14  ;;  %v8382_v22 = vmax.f32 %v8204_v61, %v1677_v43  ;;  %v1664_v20 = vsel %vm6695_vm8, %v1662_v1, %v1663_v0  ;;  %v2914_v15 = vrot.slane %v2906_v4, %v6672_v42 }
 0x1c2   : > { %2866 = vrot.lane.b32.xlu1 %v2195_v48, %s6425_s24  ;;  %v8389_v10 = vmax.f32 %v8231_v28, %v1679_v12  ;;  %v1667_v57 = vsel %vm6695_vm8, %v1665_v27, %v1666_v29  ;;  %v1668_v11 = vrot.slane %v1666_v29, 2  ;;  %v1680_v61 = vmax.f32 %v1093_v40, %v1664_v20 }
 0x1c3   : > { %v8377_v45 = vpop.permute.xlu0 %2689  ;;  %v8379_v39 = vpop.permute.xlu1 %2784  ;;  %v8397_v14 = vmax.f32 %v8206_v46, %v1678_v13  ;;  %v1681_v0 = vmax.f32 %v1100_v8, %v1667_v57  ;;  %v2921_v53 = vrot.slane %v2907_v44, %v6672_v42  ;;  %v1759_v4 = vmax.f32 %v7969_v30, %v8221_v23 }
 0x1c4   : > { %v1682_v43 = vmax.f32 %v1101_v51, %v1668_v11  ;;  %v8406_v29 = vmax.f32 %v8218_v18, %v1680_v61  ;;  %v1763_v18 = vmax.f32 %v8097_v62, %v8231_v28  ;;  %v10497_v40 = vmax.f32 %v7982_v59, %v8192_v52 }
 0x1c5   : > { %2868 = vrot.lane.b32.xlu0 %v8328_v26, %s6425_s24  ;;  %v8409_v12 = vmax.f32 %v8250_v3, %v1681_v0  ;;  %v8416_v51 = vcombine.low %v2914_v15, %v2921_v53  ;;  %v2991_v3 = vcombine.low %v8119_v7, %v1759_v4  ;;  %v8437_v30 = vrot.slane %v7977_v6, %v6672_v42 }
 0x1c6   : > { %2229 = vrot.lane.b32.xlu1 %v2195_v48, %s6422_s21  ;;  %10495 = vst [vmem:[#allocation50_spill] sm:$0xff] %v8406_v29  ;;  %v8414_v20 = vmax.f32 %v8240_v35, %v1682_v43  ;;  %v3067_v8 = vcombine.low %v10497_v40, %v8225_v5  ;;  %v3119_v62 = vcombine.low %v8225_v5, %v8229_v60 }
 0x1c7   : > { %v8401_v9 = vpop.permute.xlu0 %3002  ;;  %v8403_v63 = vpop.permute.xlu1 %2693  ;;  %10496 = vst [vmem:[#allocation51_spill] sm:$0xff] %v8409_v12  ;;  %v3120_v28 = vcombine.low %v1763_v18, %v8244_v2  ;;  %v2998_v33 = vrot.slane %v2991_v3, %v6672_v42  ;;  %v2999_v59 = vrot.slane %v8416_v51, 1 }
 0x1c8   : > { %v3075_v32 = vrot.slane %v3067_v8, %v6672_v42  ;;  %v10499_v8 = vcombine.low %v7977_v6, %v8009_v25  ;;  %v10501_v6 = vmax.f32 %v8300_v36, %v8356_v31 }
 0x1c9   : > { %2231 = vrot.lane.b32.xlu0 %v8328_v26, %s6422_s21  ;;  %v3068_v26 = vcombine.low %v8229_v60, %v1763_v18  ;;  %v8453_v5 = vrot.slane %v2998_v33, 1  ;;  %v3127_v60 = vrot.slane %v3119_v62, %v6672_v42  ;;  %v3134_v13 = vrot.slane %v3120_v28, %v6672_v42  ;;  %v10500_v33 = vld [vmem:[#allocation16_spill] sm:$0xff] }
 0x1ca   : > { %3024 = vrot.lane.b32.xlu1 %v8018_v38, %s6427_s26 }
 0x1cb   : > { %v8431_v48 = vpop.permute.xlu0 %2778  ;;  %v8433_v17 = vpop.permute.xlu1 %3006  ;;  %v3082_v27 = vrot.slane %v3068_v26, %v6672_v42  ;;  %v8469_v0 = vsel %vm2174_vm9, %v2999_v59, %v8453_v5  ;;  %v8471_v43 = vcombine.low %v3127_v60, %v3134_v13  ;;  %v2157_v26 = vrot.slane %v10499_v8, %v6672_v42 }
 0x1cc   : > { %v2196_v59 = vrot.slane %v10500_v33, 1  ;;  %v3244_v60 = vcombine.low %v8382_v22, %v8397_v14  ;;  %v3245_v13 = vcombine.low %v8389_v10, %v8406_v29 }
 0x1cd   : > { %2711 = vrot.lane.b32.xlu0 %v8018_v38, %s6423_s22  ;;  %v8461_v11 = vcombine.low %v3075_v32, %v3082_v27  ;;  %v10498_v38 = vmax.f32 %v8221_v23, %v8240_v35  ;;  %v3164_v53 = vrot.slane %v8471_v43, 1  ;;  %v2456_v35 = vrot.slane %v8009_v25, %v6672_v42 }
 0x1ce   : > { %2800 = vrot.lane.b32.xlu1 %v8437_v30, %s10371_s23  ;;  %v2197_v32 = vrot.slane %v2157_v26, 1  ;;  %v1767_v25 = vmax.f32 %v8192_v52, %v10501_v6  ;;  %v3185_v27 = vcombine.low %v8397_v14, %v8389_v10  ;;  %v3252_v52 = vrot.slane %v3244_v60, %v6672_v42 }
 0x1cf   : > { %v8457_v44 = vpop.permute.xlu0 %2934  ;;  %v8459_v57 = vpop.permute.xlu1 %2940  ;;  %v3156_v61 = vcombine.low %v8266_v56, %v10498_v38  ;;  %v3259_v31 = vrot.slane %v3245_v13, %v6672_v42  ;;  %v3281_v6 = vcombine.low %v8409_v12, %v8414_v20 }
 0x1d0   : > { %v2198_v36 = vsel %vm2174_vm9, %v2196_v59, %v2197_v32 }
 0x1d1   : > { %3022 = vrot.lane.b32.xlu0 %v8031_v58, %s6427_s26  ;;  %v3163_v15 = vrot.slane %v3156_v61, %v6672_v42  ;;  %v3184_v61 = vcombine.low %v1767_v25, %v8382_v22  ;;  %v8535_v14 = vcombine.low %v3252_v52, %v3259_v31  ;;  %v3221_v22 = vcombine.low %v8406_v29, %v8409_v12  ;;  %v10504_v25 = vld [vmem:[#allocation8_spill] sm:$0xff] }
 0x1d2   : > { %2709 = vrot.lane.b32.xlu1 %v8031_v58, %s6423_s22 }
 0x1d3   : > { %v8479_v4 = vpop.permute.xlu0 %2852  ;;  %v8481_v23 = vpop.permute.xlu1 %2782  ;;  %v8485_v18 = vrot.slane %v3163_v15, 1  ;;  %v3199_v15 = vrot.slane %v3185_v27, %v6672_v42  ;;  %v3192_v10 = vrot.slane %v3184_v61, %v6672_v42  ;;  %v8546_v26 = vrot.slane %v3221_v22, %v6672_v42  ;;  %v10508_v22 = vld [vmem:[#allocation33_spill] sm:$0xff] }
 0x1d4   : > { %v3289_v52 = vrot.slane %v8535_v14, 1 }
 0x1d5   : > { %2533 = vrot.lane.b32.xlu0 %v8053_v37, %s6421_s17  ;;  %v8492_v58 = vsel %vm2174_vm9, %v3164_v53, %v8485_v18  ;;  %v8543_v8 = vcombine.low %v3192_v10, %v3199_v15  ;;  %10502 = vst [vmem:[#allocation52_spill] sm:$0xff] %v8546_v26  ;;  %v10363_v60 = vrot.slane %v8546_v26, 1  ;;  %v8562_v15 = vrot.slane %v3281_v6, %v6672_v42  ;;  %v10509_v6 = vld [vmem:[#allocation11_spill] sm:$0xff] }
 0x1d6   : > { %2535 = vrot.lane.b32.xlu1 %v2456_v35, %s6421_s17 }
 0x1d7   : > { %v2214_v3 = vpop.permute.xlu0 %2213  ;;  %v8494_v40 = vpop.permute.xlu1 %2517  ;;  %v3229_v59 = vrot.slane %v8543_v8, 1  ;;  %v10366_v10 = vrot.slane %v8562_v15, 1 }
 0x1d8   : > { %v3309_v27 = vsel %vm3304_vm10, %v10504_v25, %v2214_v3  ;;  %v10507_v3 = vld [vmem:[#allocation15_spill] sm:$0xff]  ;;  %v3305_v25 = vsel %vm3304_vm10, %v10509_v6, %v10508_v22  ;;  %v10513_v22 = vld [vmem:[#allocation5_spill] sm:$0xff] }
 0x1d9   : > { %2715 = vrot.lane.b32.xlu0 %v8056_v34, %s6423_s22  ;;  %v8568_v31 = vsel %vm2174_vm9, %v3229_v59, %v10363_v60  ;;  %v3330_v20 = vsel %vm3325_vm11, %v3309_v27, %v8274_v49  ;;  %v8584_v59 = vsel %vm2174_vm9, %v3289_v52, %v10366_v10  ;;  %v10512_v60 = vld [vmem:[#allocation40_spill] sm:$0xff] }
 0x1da   : > { %2956 = vrot.lane.b32.xlu1 %v2456_v35, %s10443_s16  ;;  %10506 = vst [vmem:[#allocation8_spill] sm:$0xff] %v8568_v31  ;;  %10510 = vst [vmem:[#allocation15_spill] sm:$0xff] %v8584_v59  ;;  %v3351_v49 = vsel %vm3346_vm12, %v3330_v20, %v8403_v63 }
 0x1db   : > { %v8503_v62 = vpop.permute.xlu0 %2695  ;;  %v8505_v28 = vpop.permute.xlu1 %2938  ;;  %v3371_v52 = vsel %vm370_vm1, %v3351_v49, %v8481_v23 }
 0x1dd   : > { %3028 = vrot.lane.b32.xlu0 %v8056_v34, %s6427_s26 }
 0x1de   : > { %2798 = vrot.lane.b32.xlu1 %v10500_v33, %s10371_s23  ;;  %v10514_v33 = vld [vmem:[#allocation27_spill] sm:$0xff] }
 0x1df   : > { %v8522_v38 = vpop.permute.xlu0 %2519  ;;  %v8524_v34 = vpop.permute.xlu1 %2219 }
 0x1e1   : > { %2870 = vrot.lane.b32.xlu0 %v2198_v36, %s6425_s24 }
 0x1e2   : > { %2954 = vrot.lane.b32.xlu1 %v8053_v37, %s10443_s16  ;;  %v10503_v37 = vld [vmem:[#allocation25_spill] sm:$0xff] }
 0x1e3   : > { %v8539_v53 = vpop.permute.xlu0 %2856  ;;  %v8541_v35 = vpop.permute.xlu1 %2699  ;;  %10505 = vst [vmem:[#allocation25_spill] sm:$0xff] %v8562_v15 }
 0x1e5   : > { %3026 = vrot.lane.b32.xlu0 %v10503_v37, %s6427_s26 }
 0x1e6   : > { %2235 = vrot.lane.b32.xlu1 %v2197_v32, %s6422_s21 }
 0x1e7   : > { %v8557_v13 = vpop.permute.xlu0 %3012  ;;  %v8559_v61 = vpop.permute.xlu1 %2217 }
 0x1e9   : > { %2802 = vrot.lane.b32.xlu0 %v10507_v3, %s10371_s23 }
 0x1ea   : > { %2872 = vrot.lane.b32.xlu1 %v2197_v32, %s6425_s24  ;;  %v10511_v32 = vld [vmem:[#allocation24_spill] sm:$0xff] }
 0x1eb   : > { %v2855_v1 = vpop.permute.xlu1 %2854  ;;  %v8579_v46 = vpop.permute.xlu0 %2788  ;;  %v3326_v27 = vsel %vm3325_vm11, %v3305_v25, %v10511_v32 }
 0x1ec   : > { %v3347_v6 = vsel %vm3346_vm12, %v3326_v27, %v10513_v22  ;;  %v10517_v27 = vld [vmem:[#allocation29_spill] sm:$0xff] }
 0x1ed   : > { %2537 = vrot.lane.b32.xlu0 %v10512_v60, %s6421_s17  ;;  %v3367_v15 = vsel %vm370_vm1, %v3347_v6, %v10514_v33 }
 0x1ee   : > { %2233 = vrot.lane.b32.xlu1 %v2198_v36, %s6422_s21  ;;  %v3388_v20 = vsel %vm3387_vm13, %v3367_v15, %v8360_v19  ;;  %v3392_v36 = vsel %vm3387_vm13, %v3371_v52, %v2855_v1  ;;  %v10515_v19 = vld [vmem:[#allocation28_spill] sm:$0xff]  ;;  %v10518_v52 = vld [vmem:[#allocation9_spill] sm:$0xff] }
 0x1ef   : > { %v8599_v63 = vpop.permute.xlu0 %2944  ;;  %v3409_v33 = vsel %vm3408_vm14, %v3388_v20, %v8233_v50  ;;  %v3413_v23 = vsel %vm3408_vm14, %v3392_v36, %v8505_v28  ;;  %v8616_v1 = vrot.slane %v10515_v19, %v6672_v42  ;;  %v3310_v20 = vsel %vm3304_vm10, %v10518_v52, %v8315_v55  ;;  %v10519_v36 = vld [vmem:[#allocation10_spill] sm:$0xff] }
 0x1f0   : > { %v2698_v10 = vpop.permute.xlu1 %2697  ;;  %v10522_v52 = vld [vmem:[#allocation6_spill] sm:$0xff]  ;;  %v10523_v29 = vcombine.low %v10515_v19, %v10517_v27 }
 0x1f1   : > { %2958 = vrot.lane.b32.xlu0 %v10512_v60, %s10443_s16  ;;  %10516 = vst [vmem:[#allocation33_spill] sm:$0xff] %v8616_v1 }
 0x1f2   : > { %2713 = vrot.lane.b32.xlu1 %v10503_v37, %s6423_s22  ;;  %v3430_v37 = vsel %vm3429_vm15, %v3409_v33, %v8401_v9  ;;  %v2480_v9 = vrot.slane %v10517_v27, %v6672_v42  ;;  %v1847_v33 = vrot.slane %v10519_v36, %v6672_v42  ;;  %v3307_v36 = vsel %vm3304_vm10, %v10522_v52, %v8336_v54 }
 0x1f3   : > { %v8612_v49 = vpop.permute.xlu0 %2223  ;;  %v2165_v31 = vrot.slane %v10523_v29, %v6672_v42 }
 0x1f4   : > { %v3011_v25 = vpop.permute.xlu1 %3010 }
 0x1f5   : > { %v8621_v60 = vsel %vm3429_vm15, %v3413_v23, %v3011_v25  ;;  %2719 = vrot.lane.b32.xlu0 %v8181_v21, %s6423_s22 }
 0x1f6   : > { %v3502_v15 = vcombine.low %v3430_v37, %v8621_v60  ;;  %v3503_v50 = vcombine.high %v3430_v37, %v8621_v60  ;;  %2804 = vrot.lane.b32.xlu1 %v8616_v1, %s10371_s23  ;;  %v10520_v37 = vld [vmem:[#allocation31_spill] sm:$0xff] }
 0x1f7   : > { %v8631_v32 = vpop.permute.xlu0 %2221  ;;  %v3306_v1 = vsel %vm3304_vm10, %v1847_v33, %v10520_v37  ;;  %v10525_v33 = vld [vmem:[#allocation22_spill] sm:$0xff]  ;;  %v10527_v37 = vld [vmem:[#allocation32_spill] sm:$0xff] }
 0x1f8   : > { %v8629_v28 = vpop.permute.xlu1 %2523  ;;  %v3510_v22 = vrot.slane %v3502_v15, %v6672_v42  ;;  %v3517_v6 = vrot.slane %v3503_v50, %v6672_v42  ;;  %v10521_v15 = vld [vmem:[#allocation19_spill] sm:$0xff] }
 0x1f9   : > { %3032 = vrot.lane.b32.xlu0 %v8181_v21, %s6427_s26  ;;  %v3331_v50 = vsel %vm3325_vm11, %v3310_v20, %v10521_v15  ;;  %v10524_v20 = vld [vmem:[#allocation30_spill] sm:$0xff] }
 0x1fa   : > { %2539 = vrot.lane.b32.xlu1 %v2480_v9, %s6421_s17  ;;  %v3518_v23 = vcombine.high %v3510_v22, %v3510_v22  ;;  %v3519_v25 = vcombine.high %v3517_v6, %v3517_v6  ;;  %v3352_v21 = vsel %vm3346_vm12, %v3331_v50, %v8503_v62  ;;  %v3327_v54 = vsel %vm3325_vm11, %v3306_v1, %v10524_v20 }
 0x1fb   : > { %v2859_v12 = vpop.permute.xlu0 %2858  ;;  %v3311_v62 = vsel %vm3304_vm10, %v10525_v33, %v8559_v61  ;;  %v3372_v29 = vsel %vm370_vm1, %v3352_v21, %v8379_v39  ;;  %v3348_v15 = vsel %vm3346_vm12, %v3327_v54, %v10527_v37  ;;  %v2200_v50 = vrot.slane %v2165_v31, 1  ;;  %v10529_v21 = vld [vmem:[#allocation37_spill] sm:$0xff] }
 0x1fc   : > { %v2787_v26 = vpop.permute.xlu1 %2786  ;;  %v3801_v59 = vcombine.low %v3510_v22, %v3518_v23  ;;  %v3802_v55 = vcombine.low %v3517_v6, %v3519_v25  ;;  %v10526_v23 = vld [vmem:[#allocation41_spill] sm:$0xff]  ;;  %v3393_v61 = vsel %vm3387_vm13, %v3372_v29, %v8539_v53  ;;  %v10530_v53 = vld [vmem:[#allocation38_spill] sm:$0xff] }
 0x1fd   : > { %2717 = vrot.lane.b32.xlu0 %v8248_v47, %s6423_s22  ;;  %v3328_v19 = vsel %vm3325_vm11, %v3307_v36, %v10526_v23  ;;  %v3332_v36 = vsel %vm3325_vm11, %v3311_v62, %v8494_v40 }
 0x1fe   : > { %2960 = vrot.lane.b32.xlu1 %v2480_v9, %s10443_s16  ;;  %v3809_v22 = vrot.slane %v3801_v59, %v6672_v42  ;;  %v3816_v6 = vrot.slane %v3802_v55, %v6672_v42  ;;  %v3349_v1 = vsel %vm3346_vm12, %v3328_v19, %v8377_v45  ;;  %v10528_v55 = vld [vmem:[#allocation34_spill] sm:$0xff] }
 0x1ff   : > { %v8674_v9 = vpop.permute.xlu0 %3016  ;;  %v3368_v52 = vsel %vm370_vm1, %v3348_v15, %v10528_v55  ;;  %v3369_v39 = vsel %vm370_vm1, %v3349_v1, %v8431_v48  ;;  %v3414_v48 = vsel %vm3408_vm14, %v3393_v61, %v8459_v57  ;;  %v2199_v57 = vrot.slane %v10507_v3, 1  ;;  %v10532_v15 = vld [vmem:[#allocation43_spill] sm:$0xff] }
 0x200   : > { %v8672_v27 = vpop.permute.xlu1 %2521  ;;  %v3818_v59 = vcombine.high %v3809_v22, %v3816_v6  ;;  %v3817_v25 = vcombine.low %v3809_v22, %v3816_v6  ;;  %v3389_v45 = vsel %vm3387_vm13, %v3368_v52, %v10529_v21  ;;  %v3353_v22 = vsel %vm3346_vm12, %v3332_v36, %v2698_v10  ;;  %v10533_v36 = vld [vmem:[#allocation44_spill] sm:$0xff]  ;;  %v10534_v21 = vld [vmem:[#allocation26_spill] sm:$0xff] }
 0x201   : > { %3030 = vrot.lane.b32.xlu0 %v8248_v47, %s6427_s26  ;;  %v3410_v31 = vsel %vm3408_vm14, %v3389_v45, %v10530_v53  ;;  %v3373_v40 = vsel %vm370_vm1, %v3353_v22, %v2787_v26  ;;  %v2504_v47 = vrot.slane %v8162_v24, %v6672_v42  ;;  %v3390_v10 = vsel %vm3387_vm13, %v3369_v39, %v8338_v16  ;;  %v10531_v26 = vld [vmem:[#allocation39_spill] sm:$0xff]  ;;  %v10535_v45 = vld [vmem:[#allocation12_spill] sm:$0xff] }
 0x202   : > { %4116 = vmatprep.mubr.f32.mxu1 %v3818_v59  ;;  %2239 = vrot.lane.b32.xlu1 %v2200_v50, %s6422_s21  ;;  %v8707_v54 = vsel %vm3429_vm15, %v3414_v48, %v8557_v13  ;;  %v3411_v33 = vsel %vm3408_vm14, %v3390_v10, %v8457_v44  ;;  %v3431_v62 = vsel %vm3429_vm15, %v3410_v31, %v10531_v26  ;;  %v10536_v53 = vld [vmem:[#allocation20_spill] sm:$0xff]  ;;  %v10537_v10 = vld [vmem:[#allocation18_spill] sm:$0xff] }
 0x203   : > { %4117 = vmatmul.mubr.f32.vlgmr.msra.gmra.mxu1 %v3817_v25  ;;  %v8699_v20 = vpop.permute.xlu0 %2701  ;;  %v3394_v23 = vsel %vm3387_vm13, %v3373_v40, %v2859_v12  ;;  %v3520_v16 = vcombine.low %v3431_v62, %v8707_v54  ;;  %v3432_v44 = vsel %vm3429_vm15, %v3411_v33, %v8433_v17  ;;  %v2201_v12 = vsel %vm2174_vm9, %v2199_v57, %v2200_v50  ;;  %v10539_v62 = vld [vmem:[#allocation35_spill] sm:$0xff] }
 0x204   : > { %v2943_v6 = vpop.permute.xlu1 %2942  ;;  %v3308_v22 = vsel %vm3304_vm10, %v10535_v45, %v10534_v21  ;;  %v3312_v31 = vsel %vm3304_vm10, %v10536_v53, %v8524_v34  ;;  %v10538_v33 = vcombine.low %v10537_v10, %v8162_v24  ;;  %v8759_v26 = vrot.slane %v10537_v10, %v6672_v42 }
 0x205   : > { %2543 = vrot.lane.b32.xlu0 %v2504_v47, %s6421_s17  ;;  %v3415_v19 = vsel %vm3408_vm14, %v3394_v23, %v2943_v6  ;;  %v3527_v1 = vrot.slane %v3520_v16, %v6672_v42  ;;  %v3329_v34 = vsel %vm3325_vm11, %v3308_v22, %v10539_v62  ;;  %v3333_v23 = vsel %vm3325_vm11, %v3312_v31, %v8522_v38  ;;  %v10543_v31 = vld [vmem:[#allocation14_spill] sm:$0xff]  ;;  %v10545_v62 = vld [vmem:[#allocation49_spill] sm:$0xff] }
 0x206   : > { %2876 = vrot.lane.b32.xlu1 %v2200_v50, %s6425_s24  ;;  %v2173_v57 = vrot.slane %v10538_v33, %v6672_v42  ;;  %v2202_v53 = vrot.slane %v10532_v15, 1 }
 0x207   : > { %v3015_v29 = vpop.permute.xlu0 %3014 }
 0x208   : > { %v2861_v13 = vpop.permute.xlu1 %2860  ;;  %v8722_v59 = vsel %vm3429_vm15, %v3415_v19, %v3015_v29  ;;  %v10540_v29 = vld [vmem:[#allocation45_spill] sm:$0xff] }
 0x209   : > { %v3528_v25 = vcombine.low %v3432_v44, %v8722_v59  ;;  %v3529_v37 = vcombine.high %v3432_v44, %v8722_v59  ;;  %2806 = vrot.lane.b32.xlu0 %v10532_v15, %s10371_s23  ;;  %v3350_v24 = vsel %vm3346_vm12, %v3329_v34, %v10540_v29  ;;  %v3354_v44 = vsel %vm3346_vm12, %v3333_v23, %v8541_v35 }
 0x20a   : > { %2237 = vrot.lane.b32.xlu1 %v2201_v12, %s6422_s21 }
 0x20b   : > { %v3536_v61 = vrot.slane %v3528_v25, %v6672_v42  ;;  %v8734_v17 = vpop.permute.xlu0 %2527  ;;  %v8737_v52 = vrot.slane %v3529_v37, %v6672_v42  ;;  %v3374_v25 = vsel %vm370_vm1, %v3354_v44, %v8579_v46 }
 0x20c   : > { %v8732_v55 = vpop.permute.xlu1 %2703 }
 0x20d   : > { %v3544_v39 = vcombine.high %v3536_v61, %v3536_v61  ;;  %2962 = vrot.lane.b32.xlu0 %v10533_v36, %s10443_s16  ;;  %v3819_v50 = vcombine.low %v3527_v1, %v3536_v61  ;;  %v2203_v1 = vrot.slane %v2173_v57, 1  ;;  %v3545_v44 = vcombine.high %v8737_v52, %v8737_v52 }
 0x20e   : > { %2874 = vrot.lane.b32.xlu1 %v2201_v12, %s6425_s24 }
 0x20f   : > { %v8750_v40 = vpop.permute.xlu0 %2525  ;;  %v3820_v6 = vcombine.low %v3544_v39, %v8737_v52  ;;  %v3827_v16 = vrot.slane %v3819_v50, %v6672_v42  ;;  %v3395_v39 = vsel %vm3387_vm13, %v3374_v25, %v2861_v13  ;;  %v10542_v13 = vld [vmem:[#allocation21_spill] sm:$0xff]  ;;  %v2204_v23 = vsel %vm2174_vm9, %v2202_v53, %v2203_v1 }
 0x210   : > { %v8748_v48 = vpop.permute.xlu1 %2792  ;;  %v3416_v46 = vsel %vm3408_vm14, %v3395_v39, %v8599_v63  ;;  %v3313_v22 = vsel %vm3304_vm10, %v10542_v13, %v8631_v32  ;;  %v8839_v13 = vrot.slane %v8135_v41, %v6672_v42 }
 0x211   : > { %2541 = vrot.lane.b32.xlu0 %v10533_v36, %s6421_s17  ;;  %v3834_v19 = vrot.slane %v3820_v6, %v6672_v42  ;;  %v10541_v36 = vld [vmem:[#allocation42_spill] sm:$0xff]  ;;  %v8806_v10 = vsel %vm3429_vm15, %v3416_v46, %v8674_v9 }
 0x212   : > { %2808 = vrot.lane.b32.xlu1 %v8759_v26, %s10371_s23  ;;  %v3370_v50 = vsel %vm370_vm1, %v3350_v24, %v10541_v36 }
 0x213   : > { %v8779_v37 = vpop.permute.xlu0 %2864  ;;  %v3836_v12 = vcombine.high %v3827_v16, %v3834_v19  ;;  %v3835_v61 = vcombine.low %v3827_v16, %v3834_v19  ;;  %v3391_v35 = vsel %vm3387_vm13, %v3370_v50, %v8479_v4  ;;  %v3334_v4 = vsel %vm3325_vm11, %v3313_v22, %v8672_v27  ;;  %v10547_v50 = vld [vmem:[#allocation48_spill] sm:$0xff] }
 0x214   : > { %v8777_v38 = vpop.permute.xlu1 %2948  ;;  %v3412_v6 = vsel %vm3408_vm14, %v3391_v35, %v10543_v31  ;;  %v3355_v63 = vsel %vm3346_vm12, %v3334_v4, %v8699_v20 }
 0x215   : > { %4121 = vmatprep.mubr.f32.mxu1 %v3836_v12  ;;  %2880 = vrot.lane.b32.xlu0 %v2203_v1, %s6425_s24  ;;  %v3433_v34 = vsel %vm3429_vm15, %v3412_v6, %v10545_v62  ;;  %v10546_v12 = vld [vmem:[#allocation47_spill] sm:$0xff] }
 0x216   : > { %2964 = vrot.lane.b32.xlu1 %v2504_v47, %s10443_s16  ;;  %4122 = vmatmul.mubr.f32.gmra.mxu1 %v3835_v61  ;;  %v10544_v47 = vld [vmem:[#allocation46_spill] sm:$0xff]  ;;  %v3546_v16 = vcombine.low %v3433_v34, %v8806_v10 }
 0x217   : > { %v8790_v45 = vpop.permute.xlu0 %2707 }
 0x218   : > { %v2791_v21 = vpop.permute.xlu1 %2790  ;;  %v3553_v24 = vrot.slane %v3546_v16, %v6672_v42 }
 0x219   : > { %3036 = vrot.lane.b32.xlu0 %v10544_v47, %s6427_s26  ;;  %v3375_v32 = vsel %vm370_vm1, %v3355_v63, %v2791_v21  ;;  %v10548_v63 = vcombine.low %v8135_v41, %v8119_v7 }
 0x21a   : > { %2243 = vrot.lane.b32.xlu1 %v2203_v1, %s6422_s21  ;;  %v3837_v35 = vcombine.low %v3545_v44, %v3553_v24  ;;  %v10550_v24 = vld [vmem:[#allocation23_spill] sm:$0xff] }
 0x21b   : > { %v2863_v57 = vpop.permute.xlu0 %2862  ;;  %v3314_v44 = vsel %vm3304_vm10, %v10550_v24, %v8612_v49  ;;  %v8939_v24 = vrot.slane %v8244_v2, %v6672_v42 }
 0x21c   : > { %v2947_v33 = vpop.permute.xlu1 %2946  ;;  %v3396_v27 = vsel %vm3387_vm13, %v3375_v32, %v2863_v57  ;;  %v3845_v22 = vrot.slane %v3837_v35, %v6672_v42  ;;  %v2842_v32 = vrot.slane %v10548_v63, %v6672_v42 }
 0x21d   : > { %2241 = vrot.lane.b32.xlu0 %v2204_v23, %s6422_s21  ;;  %v3417_v20 = vsel %vm3408_vm14, %v3396_v27, %v2947_v33  ;;  %v2929_v33 = vrot.slane %v8119_v7, %v6672_v42  ;;  %v2843_v27 = vrot.slane %v10547_v50, 1 }
 0x21e   : > { %2723 = vrot.lane.b32.xlu1 %v10544_v47, %s6423_s22  ;;  %v2844_v34 = vrot.slane %v2842_v32, 1 }
 0x21f   : > { %v3019_v19 = vpop.permute.xlu0 %3018 }
 0x220   : > { %v2228_v9 = vpop.permute.xlu1 %2227  ;;  %v8820_v29 = vsel %vm3429_vm15, %v3417_v20, %v3019_v19  ;;  %v2845_v7 = vsel %vm2174_vm9, %v2843_v27, %v2844_v34 }
 0x221   : > { %v3554_v25 = vcombine.low %v8621_v60, %v8820_v29  ;;  %3034 = vrot.lane.b32.xlu0 %v10546_v12, %s6427_s26  ;;  %v3555_v35 = vcombine.high %v8621_v60, %v8820_v29 }
 0x222   : > { %2878 = vrot.lane.b32.xlu1 %v2204_v23, %s6425_s24 }
 0x223   : > { %v3562_v1 = vrot.slane %v3554_v25, %v6672_v42  ;;  %v2706_v39 = vpop.permute.xlu0 %2705  ;;  %v10551_v25 = vld [vmem:[#allocation13_spill] sm:$0xff] }
 0x224   : > { %v8831_v61 = vpop.permute.xlu1 %3020 }
 0x225   : > { %v3570_v36 = vcombine.high %v3562_v1, %v3562_v1  ;;  %2810 = vrot.lane.b32.xlu0 %v10547_v50, %s10371_s23 }
 0x226   : > { %2721 = vrot.lane.b32.xlu1 %v10546_v12, %s6423_s22 }
 0x227   : > { %v2797_v46 = vpop.permute.xlu0 %2796  ;;  %v3838_v21 = vcombine.low %v3562_v1, %v3570_v36  ;;  %v3335_v1 = vsel %vm3325_vm11, %v3314_v44, %v8629_v28 }
 0x228   : > { %v2226_v52 = vpop.permute.xlu1 %2225 }
 0x229   : > { %2966 = vrot.lane.b32.xlu0 %v8416_v51, %s10443_s16  ;;  %v3852_v53 = vrot.slane %v3838_v21, %v6672_v42  ;;  %v3315_v12 = vsel %vm3304_vm10, %v10551_v25, %v2226_v52 }
 0x22a   : > { %2812 = vrot.lane.b32.xlu1 %v8839_v13, %s10371_s23  ;;  %v3336_v28 = vsel %vm3325_vm11, %v3315_v12, %v8750_v40 }
 0x22b   : > { %v2953_v6 = vpop.permute.xlu0 %2952  ;;  %v3854_v4 = vcombine.high %v3845_v22, %v3852_v53  ;;  %v3853_v47 = vcombine.low %v3845_v22, %v3852_v53  ;;  %v10552_v53 = vld [vmem:[#allocation7_spill] sm:$0xff] }
 0x22c   : > { %v2532_v31 = vpop.permute.xlu1 %2531 }
 0x22d   : > { %4126 = vmatprep.mubr.f32.mxu1 %v3854_v4  ;;  %3143 = vrot.lane.b32.xlu0 %v8416_v51, %s6421_s17  ;;  %v10549_v51 = vld [vmem:[#allocation36_spill] sm:$0xff]  ;;  %v3357_v4 = vsel %vm3346_vm12, %v3336_v28, %v2706_v39 }
 0x22e   : > { %2968 = vrot.lane.b32.xlu1 %v2929_v33, %s10443_s16  ;;  %4127 = vmatmul.mubr.f32.gmra.mxu1 %v3853_v47  ;;  %v3316_v16 = vsel %vm3304_vm10, %v10549_v51, %v2228_v9  ;;  %v3356_v9 = vsel %vm3346_vm12, %v3335_v1, %v8732_v55 }
 0x22f   : > { %v2795_v62 = vpop.permute.xlu0 %2794  ;;  %v3337_v36 = vsel %vm3325_vm11, %v3316_v16, %v8734_v17  ;;  %v3376_v49 = vsel %vm370_vm1, %v3356_v9, %v8748_v48  ;;  %v8890_v17 = vrot.slane %v8266_v56, %v6672_v42 }
 0x230   : > { %v8856_v57 = vpop.permute.xlu1 %2529  ;;  %v3397_v55 = vsel %vm3387_vm13, %v3376_v49, %v8779_v37  ;;  %v3358_v22 = vsel %vm3346_vm12, %v3337_v36, %v8790_v45  ;;  %v3569_v37 = vrot.slane %v3555_v35, %v6672_v42  ;;  %v3377_v63 = vsel %vm370_vm1, %v3357_v4, %v2795_v62 }
 0x231   : > { %3109 = vrot.lane.b32.xlu0 %v2844_v34, %s6422_s21  ;;  %v3378_v60 = vsel %vm370_vm1, %v3358_v22, %v2797_v46  ;;  %v3418_v45 = vsel %vm3408_vm14, %v3397_v55, %v8777_v38 }
 0x232   : > { %3145 = vrot.lane.b32.xlu1 %v2929_v33, %s6421_s17  ;;  %v8912_v33 = vsel %vm3429_vm15, %v3418_v45, %v8831_v61  ;;  %v10553_v61 = vcombine.low %v8244_v2, %v8266_v56 }
 0x233   : > { %v2951_v41 = vpop.permute.xlu0 %2950 }
 0x234   : > { %v2867_v23 = vpop.permute.xlu1 %2866  ;;  %v3103_v62 = vrot.slane %v10553_v61, %v6672_v42 }
 0x235   : > { %3107 = vrot.lane.b32.xlu0 %v2845_v7, %s6422_s21  ;;  %v3398_v39 = vsel %vm3387_vm13, %v3377_v63, %v2867_v23  ;;  %v3571_v23 = vcombine.high %v3569_v37, %v3569_v37 }
 0x236   : > { %2884 = vrot.lane.b32.xlu1 %v2844_v34, %s6425_s24  ;;  %v3419_v51 = vsel %vm3408_vm14, %v3398_v39, %v2951_v41  ;;  %v3105_v41 = vrot.slane %v3103_v62, 1 }
 0x237   : > { %v2869_v20 = vpop.permute.xlu0 %2868  ;;  %v3855_v1 = vcombine.low %v3569_v37, %v3571_v23 }
 0x238   : > { %v8866_v19 = vpop.permute.xlu1 %2229  ;;  %v3399_v47 = vsel %vm3387_vm13, %v3378_v60, %v2869_v20 }
 0x239   : > { %3167 = vrot.lane.b32.xlu0 %v8469_v0, %s6423_s22  ;;  %v3420_v34 = vsel %vm3408_vm14, %v3399_v47, %v2953_v6  ;;  %v3572_v6 = vcombine.low %v8707_v54, %v8912_v33 }
 0x23a   : > { %2882 = vrot.lane.b32.xlu1 %v2845_v7, %s6425_s24 }
 0x23b   : > { %v2232_v52 = vpop.permute.xlu0 %2231  ;;  %v3579_v44 = vrot.slane %v3572_v6, %v6672_v42 }
 0x23c   : > { %v3025_v21 = vpop.permute.xlu1 %3024  ;;  %v3318_v48 = vsel %vm3304_vm10, %v10552_v53, %v2232_v52  ;;  %v3863_v52 = vrot.slane %v3855_v1, %v6672_v42  ;;  %v3104_v53 = vrot.slane %v8461_v11, 1 }
 0x23d   : > { %3149 = vrot.lane.b32.xlu0 %v8890_v17, %s6421_s17  ;;  %v3339_v40 = vsel %vm3325_vm11, %v3318_v48, %v2532_v31  ;;  %v8923_v38 = vsel %vm3429_vm15, %v3420_v34, %v3025_v21 }
 0x23e   : > { %3040 = vrot.lane.b32.xlu1 %v8453_v5, %s6427_s26 }
 0x23f   : > { %v2712_v46 = vpop.permute.xlu0 %2711 }
 0x240   : > { %v2801_v32 = vpop.permute.xlu1 %2800  ;;  %v3360_v31 = vsel %vm3346_vm12, %v3339_v40, %v2712_v46  ;;  %v3106_v46 = vsel %vm2174_vm9, %v3104_v53, %v3105_v41 }
 0x241   : > { %v8918_v27 = vsel %vm370_vm1, %v3360_v31, %v2801_v32  ;;  %3208 = vrot.lane.b32.xlu0 %v8461_v11, %s10371_s23 }
 0x242   : > { %3169 = vrot.lane.b32.xlu1 %v8453_v5, %s6423_s22  ;;  %v3598_v5 = vcombine.low %v8806_v10, %v8923_v38 }
 0x243   : > { %v3023_v7 = vpop.permute.xlu0 %3022 }
 0x244   : > { %v2710_v16 = vpop.permute.xlu1 %2709  ;;  %v8935_v20 = vsel %vm3429_vm15, %v3419_v51, %v3023_v7  ;;  %v3605_v36 = vrot.slane %v3598_v5, %v6672_v42 }
 0x245   : > { %v3580_v56 = vcombine.low %v8722_v59, %v8935_v20  ;;  %v3581_v54 = vcombine.high %v8722_v59, %v8935_v20  ;;  %3147 = vrot.lane.b32.xlu0 %v8471_v43, %s6421_s17 }
 0x246   : > { %3210 = vrot.lane.b32.xlu1 %v8939_v24, %s10371_s23 }
 0x247   : > { %v3588_v2 = vrot.slane %v3580_v56, %v6672_v42  ;;  %v3595_v25 = vrot.slane %v3581_v54, %v6672_v42  ;;  %v8954_v10 = vpop.permute.xlu0 %2533 }
 0x248   : > { %v2536_v12 = vpop.permute.xlu1 %2535 }
 0x249   : > { %v3596_v59 = vcombine.high %v3588_v2, %v3588_v2  ;;  %v3597_v9 = vcombine.high %v3595_v25, %v3595_v25  ;;  %3234 = vrot.lane.b32.xlu0 %v3105_v41, %s6425_s24  ;;  %v3856_v49 = vcombine.low %v3579_v44, %v3588_v2 }
 0x24a   : > { %3038 = vrot.lane.b32.xlu1 %v8469_v0, %s6427_s26  ;;  %v10554_v0 = vld [vmem:[#allocation17_spill] sm:$0xff] }
 0x24b   : > { %v2716_v35 = vpop.permute.xlu0 %2715  ;;  %v3870_v21 = vrot.slane %v3856_v49, %v6672_v42  ;;  %v3873_v55 = vcombine.low %v3596_v59, %v3595_v25  ;;  %v3874_v22 = vcombine.low %v3597_v9, %v3605_v36  ;;  %v3317_v47 = vsel %vm3304_vm10, %v10554_v0, %v8866_v19  ;;  %v10555_v59 = vld [vmem:[#allocation8_spill] sm:$0xff] }
 0x24c   : > { %v2957_v28 = vpop.permute.xlu1 %2956  ;;  %v3338_v32 = vsel %vm3325_vm11, %v3317_v47, %v8856_v57  ;;  %v10561_v47 = vld [vmem:[#allocation25_spill] sm:$0xff] }
 0x24d   : > { %3173 = vrot.lane.b32.xlu0 %v8485_v18, %s6423_s22  ;;  %v3872_v48 = vcombine.high %v3863_v52, %v3870_v21  ;;  %v3871_v60 = vcombine.low %v3863_v52, %v3870_v21  ;;  %v3881_v40 = vrot.slane %v3873_v55, %v6672_v42  ;;  %v3888_v4 = vrot.slane %v3874_v22, %v6672_v42  ;;  %v10556_v52 = vld [vmem:[#allocation50_spill] sm:$0xff] }
 0x24e   : > { %3270 = vrot.lane.b32.xlu1 %v8890_v17, %s10443_s16  ;;  %v3359_v39 = vsel %vm3346_vm12, %v3338_v32, %v2710_v16  ;;  %v3207_v21 = vrot.slane %v10556_v52, %v6672_v42 }
 0x24f   : > { %4131 = vmatprep.mubr.f32.mxu1 %v3872_v48  ;;  %v3029_v37 = vpop.permute.xlu0 %3028  ;;  %v3890_v63 = vcombine.high %v3881_v40, %v3888_v4  ;;  %v3889_v19 = vcombine.low %v3881_v40, %v3888_v4  ;;  %v10558_v48 = vld [vmem:[#allocation51_spill] sm:$0xff] }
 0x250   : > { %v2799_v45 = vpop.permute.xlu1 %2798  ;;  %4132 = vmatmul.mubr.f32.gmra.mxu1 %v3871_v60  ;;  %v3267_v60 = vrot.slane %v10558_v48, %v6672_v42 }
 0x251   : > { %4136 = vmatprep.mubr.f32.mxu1 %v3890_v63  ;;  %3111 = vrot.lane.b32.xlu0 %v3106_v46, %s6422_s21  ;;  %v3379_v17 = vsel %vm370_vm1, %v3359_v39, %v2799_v45  ;;  %v10563_v39 = vld [vmem:[#allocation33_spill] sm:$0xff] }
 0x252   : > { %3268 = vrot.lane.b32.xlu1 %v8471_v43, %s10443_s16 }
 0x253   : > { %v2871_v34 = vpop.permute.xlu0 %2870 }
 0x254   : > { %v2955_v31 = vpop.permute.xlu1 %2954  ;;  %v3400_v61 = vsel %vm3387_vm13, %v3379_v17, %v2871_v34  ;;  %4137 = vmatmul.mubr.f32.gmra.mxu1 %v3889_v19 }
 0x255   : > { %3292 = vrot.lane.b32.xlu0 %v8492_v58, %s6427_s26  ;;  %v3421_v62 = vsel %vm3408_vm14, %v3400_v61, %v2955_v31 }
 0x256   : > { %3113 = vrot.lane.b32.xlu1 %v3105_v41, %s6422_s21  ;;  %s323_s21 = sand.u32 1, %s6408_s10  }
 0x257   : > { %v3027_v23 = vpop.permute.xlu0 %3026  ;;  %s5678_s27 = scalar_lea.sflag [#allocation3], %s323_s21 }
 0x258   : > { %v2236_v57 = vpop.permute.xlu1 %2235  ;;  %v8988_v6 = vsel %vm3429_vm15, %v3421_v62, %v3027_v23  ;;  %v10564_v62 = vld [vmem:[#allocation16_spill] sm:$0xff] }
 0x259   : > { %v3320_v43 = vsel %vm3304_vm10, %v8437_v30, %v2236_v57  ;;  %v3606_v51 = vcombine.low %v8820_v29, %v8988_v6  ;;  %v3607_v16 = vcombine.high %v8820_v29, %v8988_v6  ;;  %3212 = vrot.lane.b32.xlu0 %v8543_v8, %s10371_s23 }
 0x25a   : > { %v3341_v7 = vsel %vm3325_vm11, %v3320_v43, %v2536_v12  ;;  %3294 = vrot.lane.b32.xlu1 %v8485_v18, %s6427_s26 }
 0x25b   : > { %v3362_v5 = vsel %vm3346_vm12, %v3341_v7, %v2716_v35  ;;  %v3614_v30 = vrot.slane %v3606_v51, %v6672_v42  ;;  %v3621_v56 = vrot.slane %v3607_v16, %v6672_v42  ;;  %v2803_v41 = vpop.permute.xlu0 %2802 }
 0x25c   : > { %v2873_v54 = vpop.permute.xlu1 %2872 }
 0x25d   : > { %v3401_v44 = vsel %vm3387_vm13, %v8918_v27, %v2873_v54  ;;  %v3622_v2 = vcombine.high %v3614_v30, %v3614_v30  ;;  %v3623_v25 = vcombine.high %v3621_v56, %v3621_v56  ;;  %3272 = vrot.lane.b32.xlu0 %v8535_v14, %s10443_s16 }
 0x25e   : > { %v3422_v29 = vsel %vm3408_vm14, %v3401_v44, %v2957_v28  ;;  %3232 = vrot.lane.b32.xlu1 %v3106_v46, %s6425_s24 }
 0x25f   : > { %v9009_v18 = vsel %vm3429_vm15, %v3422_v29, %v3029_v37  ;;  %v9011_v12 = vpop.permute.xlu0 %2537  ;;  %v3891_v1 = vcombine.low %v3614_v30, %v3622_v2  ;;  %v3892_v36 = vcombine.low %v3621_v56, %v3623_v25  ;;  %v10562_v37 = vrot.slane %v10561_v47, 1 }
 0x260   : > { %v2234_v8 = vpop.permute.xlu1 %2233  ;;  %v3624_v27 = vcombine.low %v8912_v33, %v9009_v18  ;;  %v10557_v33 = vld [vmem:[#allocation15_spill] sm:$0xff] }
 0x261   : > { %3236 = vrot.lane.b32.xlu0 %v10555_v59, %s6425_s24  ;;  %v3899_v9 = vrot.slane %v3891_v1, %v6672_v42  ;;  %v3906_v14 = vrot.slane %v3892_v36, %v6672_v42  ;;  %v3319_v23 = vsel %vm3304_vm10, %v10564_v62, %v2234_v8 }
 0x262   : > { %3171 = vrot.lane.b32.xlu1 %v8492_v58, %s6423_s22  ;;  %v10559_v58 = vld [vmem:[#allocation52_spill] sm:$0xff]  ;;  %v3340_v30 = vsel %vm3325_vm11, %v3319_v23, %v8954_v10 }
 0x263   : > { %v2959_v35 = vpop.permute.xlu0 %2958  ;;  %v3908_v28 = vcombine.high %v3899_v9, %v3906_v14  ;;  %v3907_v55 = vcombine.low %v3899_v9, %v3906_v14  ;;  %v10560_v40 = vrot.slane %v10559_v58, 1  ;;  %v3631_v9 = vrot.slane %v3624_v27, %v6672_v42 }
 0x264   : > { %v2714_v49 = vpop.permute.xlu1 %2713 }
 0x265   : > { %4141 = vmatprep.mubr.f32.mxu1 %v3908_v28  ;;  %3214 = vrot.lane.b32.xlu0 %v3207_v21, %s10371_s23  ;;  %s324_s23 = scalar_lea.vmem [#allocation2], %s323_s21 }
 0x266   : > { %3296 = vrot.lane.b32.xlu1 %v10557_v33, %s6427_s26  ;;  %4142 = vmatmul.mubr.f32.gmra.mxu1 %v3907_v55  ;;  %s5690_s22 = sshll.u32 %s324_s23, 4  ;;  %s5691_s22 = int_to_ptr.vmem [resolvable:$true] %s5690_s22 }
 0x267   : > { %v2720_v53 = vpop.permute.xlu0 %2719  ;;  %s6356_s29 = scalar_lea.vmem %s5691_s22, 16  ;;  %p6363_p0 = scmp.lt.s32.totalorder %s5691_s22, %s6361_s28 }
 0x268   : > { %v2805_v22 = vpop.permute.xlu1 %2804  ;;  %p6357_p11 = scmp.ne.s32.totalorder %s5691_s22, %s6356_s29 }
 0x269   : > { %3274 = vrot.lane.b32.xlu0 %v3267_v60, %s10443_s16  ;;  %v3382_v61 = vsel %vm370_vm1, %v3362_v5, %v2805_v22  ;;  %v3361_v5 = vsel %vm3346_vm12, %v3340_v30, %v2714_v49 }
 0x26a   : > { %3238 = vrot.lane.b32.xlu1 %v10560_v40, %s6425_s24  ;;  %v3381_v2 = vsel %vm370_vm1, %v3361_v5, %v2803_v41  ;;  %p6358_p12 = pnand %p6357_p11, %p6517_p5 }
 0x26b   : > { %v3033_v4 = vpop.permute.xlu0 %3032 }
 0x26c   : > { %v2540_v0 = vpop.permute.xlu1 %2539  ;;  %p6359_p13 = pneg %p6358_p12 }
 0x26e   : > { %3298 = vrot.lane.b32.xlu1 %v10562_v37, %s6427_s26 }
 0x26f   : > { %v2718_v45 = vpop.permute.xlu0 %2717 }
 0x270   : > { %v2961_v63 = vpop.permute.xlu1 %2960 }
 0x273   : > { %v3031_v46 = vpop.permute.xlu0 %3030 }
 0x274   : > { %v2240_v32 = vpop.permute.xlu1 %2239 }
 0x275   : > { %v3322_v19 = vsel %vm3304_vm10, %v10563_v39, %v2240_v32 }
 0x276   : > { %v3343_v17 = vsel %vm3325_vm11, %v3322_v19, %v2540_v0 }
 0x277   : > { %v9038_v31 = vpop.permute.xlu0 %2543  ;;  %v3364_v34 = vsel %vm3346_vm12, %v3343_v17, %v2720_v53 }
 0x278   : > { %v2877_v57 = vpop.permute.xlu1 %2876 }
 0x279   : > { %v3403_v43 = vsel %vm3387_vm13, %v3382_v61, %v2877_v57 }
 0x27a   : > { %v3424_v7 = vsel %vm3408_vm14, %v3403_v43, %v2961_v63 }
 0x27b   : > { %v9047_v51 = vsel %vm3429_vm15, %v3424_v7, %v3033_v4  ;;  %v2807_v16 = vpop.permute.xlu0 %2806 }
 0x27c   : > { %v3650_v56 = vcombine.low %v8923_v38, %v9047_v51  ;;  %v2238_v54 = vpop.permute.xlu1 %2237 }
 0x27d   : > { %v3321_v27 = vsel %vm3304_vm10, %v10507_v3, %v2238_v54 }
 0x27e   : > { %v3657_v49 = vrot.slane %v3650_v56, %v6672_v42  ;;  %v3342_v37 = vsel %vm3325_vm11, %v3321_v27, %v9011_v12 }
 0x27f   : > { %v2963_v44 = vpop.permute.xlu0 %2962  ;;  %v3363_v39 = vsel %vm3346_vm12, %v3342_v37, %v2718_v45 }
 0x280   : > { %v2875_v25 = vpop.permute.xlu1 %2874  ;;  %v3383_v17 = vsel %vm370_vm1, %v3363_v39, %v2807_v16 }
 0x281   : > { %v3402_v29 = vsel %vm3387_vm13, %v3381_v2, %v2875_v25 }
 0x282   : > { %v3423_v8 = vsel %vm3408_vm14, %v3402_v29, %v2959_v35 }
 0x283   : > { %v9058_v1 = vsel %vm3429_vm15, %v3423_v8, %v3031_v46  ;;  %v9060_v36 = vpop.permute.xlu0 %2541 }
 0x284   : > { %v3632_v10 = vcombine.low %v8935_v20, %v9058_v1  ;;  %v3633_v38 = vcombine.high %v8935_v20, %v9058_v1  ;;  %v2809_v59 = vpop.permute.xlu1 %2808 }
 0x285   : > { %v3384_v35 = vsel %vm370_vm1, %v3364_v34, %v2809_v59 }
 0x286   : > { %v3640_v41 = vrot.slane %v3632_v10, %v6672_v42  ;;  %v3647_v14 = vrot.slane %v3633_v38, %v6672_v42 }
 0x287   : > { %v2881_v28 = vpop.permute.xlu0 %2880 }
 0x288   : > { %v2965_v52 = vpop.permute.xlu1 %2964  ;;  %v3405_v21 = vsel %vm3387_vm13, %v3384_v35, %v2881_v28  ;;  %v3648_v55 = vcombine.high %v3640_v41, %v3640_v41  ;;  %v3909_v33 = vcombine.low %v3631_v9, %v3640_v41  ;;  %v3649_v22 = vcombine.high %v3647_v14, %v3647_v14 }
 0x289   : > { %v3426_v48 = vsel %vm3408_vm14, %v3405_v21, %v2965_v52 }
 0x28a   : > { %v3910_v53 = vcombine.low %v3648_v55, %v3647_v14  ;;  %v3927_v20 = vcombine.low %v3649_v22, %v3657_v49  ;;  %v3917_v4 = vrot.slane %v3909_v33, %v6672_v42 }
 0x28b   : > { %v3037_v60 = vpop.permute.xlu0 %3036 }
 0x28c   : > { %v9076_v58 = vsel %vm3429_vm15, %v3426_v48, %v3037_v60  ;;  %v2244_v40 = vpop.permute.xlu1 %2243  ;;  %v3924_v0 = vrot.slane %v3910_v53, %v6672_v42  ;;  %v3935_v2 = vrot.slane %v3927_v20, %v6672_v42 }
 0x28d   : > { %v3676_v47 = vcombine.low %v9009_v18, %v9076_v58  ;;  %v3324_v35 = vsel %vm3304_vm10, %v8759_v26, %v2244_v40 }
 0x28e   : > { %v3926_v63 = vcombine.high %v3917_v4, %v3924_v0  ;;  %v3925_v46 = vcombine.low %v3917_v4, %v3924_v0  ;;  %v3345_v21 = vsel %vm3325_vm11, %v3324_v35, %v9038_v31 }
 0x28f   : > { %v2242_v3 = vpop.permute.xlu0 %2241 }
 0x290   : > { %4146 = vmatprep.mubr.f32.mxu1 %v3926_v63  ;;  %v2724_v32 = vpop.permute.xlu1 %2723  ;;  %v3323_v28 = vsel %vm3304_vm10, %v10532_v15, %v2242_v3 }
 0x291   : > { %4147 = vmatmul.mubr.f32.gmra.mxu1 %v3925_v46  ;;  %v3344_v33 = vsel %vm3325_vm11, %v3323_v28, %v9060_v36  ;;  %v3366_v53 = vsel %vm3346_vm12, %v3345_v21, %v2724_v32 }
 0x293   : > { %v3035_v19 = vpop.permute.xlu0 %3034 }
 0x294   : > { %v2879_v34 = vpop.permute.xlu1 %2878 }
 0x295   : > { %v3404_v61 = vsel %vm3387_vm13, %v3383_v17, %v2879_v34  ;;  %v3683_v17 = vrot.slane %v3676_v47, %v6672_v42 }
 0x296   : > { %v3425_v57 = vsel %vm3408_vm14, %v3404_v61, %v2963_v44 }
 0x297   : > { %v9089_v62 = vsel %vm3429_vm15, %v3425_v57, %v3035_v19  ;;  %v2811_v12 = vpop.permute.xlu0 %2810 }
 0x298   : > { %v3658_v23 = vcombine.low %v8988_v6, %v9089_v62  ;;  %v2722_v43 = vpop.permute.xlu1 %2721  ;;  %v3659_v55 = vcombine.high %v8988_v6, %v9089_v62 }
 0x299   : > { %v3365_v20 = vsel %vm3346_vm12, %v3344_v33, %v2722_v43 }
 0x29a   : > { %v3666_v7 = vrot.slane %v3658_v23, %v6672_v42  ;;  %v3385_v48 = vsel %vm370_vm1, %v3365_v20, %v2811_v12  ;;  %v3673_v60 = vrot.slane %v3659_v55, %v6672_v42 }
 0x29b   : > { %v2967_v45 = vpop.permute.xlu0 %2966 }
 0x29c   : > { %v2813_v30 = vpop.permute.xlu1 %2812  ;;  %v3674_v56 = vcombine.high %v3666_v7, %v3666_v7  ;;  %v3675_v63 = vcombine.high %v3673_v60, %v3673_v60 }
 0x29d   : > { %v3386_v26 = vsel %vm370_vm1, %v3366_v53, %v2813_v30  ;;  %v9162_v53 = vld [vmem:[%s10291_s4] ss:$0 sm:$0xff] }
 0x29e   : > { %v3928_v54 = vcombine.low %v3666_v7, %v3674_v56  ;;  %v3945_v12 = vcombine.low %v3673_v60, %v3675_v63 }
 0x29f   : > { %v9094_v16 = vpop.permute.xlu0 %3143 }
 0x2a0   : > { %v2969_v5 = vpop.permute.xlu1 %2968  ;;  %v3942_v44 = vrot.slane %v3928_v54, %v6672_v42  ;;  %v3953_v54 = vrot.slane %v3945_v12, %v6672_v42 }
 0x2a2   : > { %v3944_v25 = vcombine.high %v3935_v2, %v3942_v44  ;;  %v3943_v29 = vcombine.low %v3935_v2, %v3942_v44 }
 0x2a3   : > { %v9098_v8 = vpop.permute.xlu0 %3109 }
 0x2a4   : > { %4151 = vmatprep.mubr.f32.mxu1 %v3944_v25  ;;  %v9100_v10 = vpop.permute.xlu1 %3145  ;;  %v3451_v33 = vsel %vm3304_vm10, %v8839_v13, %v9098_v8 }
 0x2a5   : > { %4152 = vmatmul.mubr.f32.gmra.mxu1 %v3943_v29 }
 0x2a7   : > { %v3108_v38 = vpop.permute.xlu0 %3107 }
 0x2a8   : > { %v2885_v59 = vpop.permute.xlu1 %2884  ;;  %v3450_v28 = vsel %vm3304_vm10, %v10547_v50, %v3108_v38  ;;  %v3455_v50 = vsel %vm3325_vm11, %v3451_v33, %v9100_v10 }
 0x2a9   : > { %v3407_v15 = vsel %vm3387_vm13, %v3386_v26, %v2885_v59  ;;  %v3454_v26 = vsel %vm3325_vm11, %v3450_v28, %v9094_v16 }
 0x2aa   : > { %v3428_v36 = vsel %vm3408_vm14, %v3407_v15, %v2969_v5 }
 0x2ab   : > { %v9102_v9 = vpop.permute.xlu0 %3167 }
 0x2ac   : > { %v2883_v41 = vpop.permute.xlu1 %2882  ;;  %v3458_v15 = vsel %vm3346_vm12, %v3454_v26, %v9102_v9 }
 0x2ad   : > { %v3406_v6 = vsel %vm3387_vm13, %v3385_v48, %v2883_v41 }
 0x2ae   : > { %v3427_v0 = vsel %vm3408_vm14, %v3406_v6, %v2967_v45 }
 0x2af   : > { %v9104_v14 = vpop.permute.xlu0 %3149 }
 0x2b0   : > { %v3041_v49 = vpop.permute.xlu1 %3040 }
 0x2b1   : > { %v9129_v40 = vsel %vm3429_vm15, %v3428_v36, %v3041_v49 }
 0x2b2   : > { %v3702_v3 = vcombine.low %v9047_v51, %v9129_v40 }
 0x2b3   : > { %v9110_v52 = vpop.permute.xlu0 %3208 }
 0x2b4   : > { %v3170_v22 = vpop.permute.xlu1 %3169  ;;  %v3709_v51 = vrot.slane %v3702_v3, %v6672_v42  ;;  %v3462_v8 = vsel %vm370_vm1, %v3458_v15, %v9110_v52 }
 0x2b5   : > { %v3459_v13 = vsel %vm3346_vm12, %v3455_v50, %v3170_v22 }
 0x2b7   : > { %v9122_v27 = vpop.permute.xlu0 %3147 }
 0x2b8   : > { %v3211_v31 = vpop.permute.xlu1 %3210 }
 0x2b9   : > { %v3463_v6 = vsel %vm370_vm1, %v3459_v13, %v3211_v31 }
 0x2bb   : > { %v3235_v4 = vpop.permute.xlu0 %3234 }
 0x2bc   : > { %v3039_v37 = vpop.permute.xlu1 %3038  ;;  %v3467_v9 = vsel %vm3387_vm13, %v3463_v6, %v3235_v4 }
 0x2bd   : > { %v9133_v46 = vsel %vm3429_vm15, %v3427_v0, %v3039_v37 }
 0x2be   : > { %v3684_v32 = vcombine.low %v9058_v1, %v9133_v46  ;;  %v3685_v39 = vcombine.high %v9058_v1, %v9133_v46 }
 0x2bf   : > { %v9141_v19 = vpop.permute.xlu0 %3173 }
 0x2c0   : > { %v3692_v34 = vrot.slane %v3684_v32, %v6672_v42  ;;  %v3699_v61 = vrot.slane %v3685_v39, %v6672_v42  ;;  %v3271_v57 = vpop.permute.xlu1 %3270 }
 0x2c1   : > { %v3471_v0 = vsel %vm3408_vm14, %v3467_v9, %v3271_v57 }
 0x2c2   : > { %v3700_v23 = vcombine.high %v3692_v34, %v3692_v34  ;;  %v3701_v43 = vcombine.high %v3699_v61, %v3699_v61  ;;  %v3946_v45 = vcombine.low %v3683_v17, %v3692_v34 }
 0x2c3   : > { %v5860_v7 = vpop.f32.mrf.mxu1  ;;  %v3112_v1 = vpop.permute.xlu0 %3111 }
 0x2c4   : > { %v3269_v30 = vpop.permute.xlu1 %3268  ;;  %v3960_v18 = vrot.slane %v3946_v45, %v6672_v42  ;;  %v3963_v47 = vcombine.low %v3700_v23, %v3699_v61  ;;  %v3964_v5 = vcombine.low %v3701_v43, %v3709_v51  ;;  %v3452_v16 = vsel %vm3304_vm10, %v8461_v11, %v3112_v1 }
 0x2c5   : > { %v5861_v56 = vpop.f32.mrf.mxu1  ;;  %v3456_v32 = vsel %vm3325_vm11, %v3452_v16, %v9122_v27 }
 0x2c6   : > { %v5862_v2 = vadd.f32 %v5861_v56, %v5860_v7  ;;  %v3962_v44 = vcombine.high %v3953_v54, %v3960_v18  ;;  %v3961_v25 = vcombine.low %v3953_v54, %v3960_v18  ;;  %v3971_v29 = vrot.slane %v3963_v47, %v6672_v42 }
 0x2c7   : > { %v3978_v59 = vrot.slane %v3964_v5, %v6672_v42  ;;  %v3293_v41 = vpop.permute.xlu0 %3292 }
 0x2c8   : > { %4156 = vmatprep.mubr.f32.mxu1 %v3962_v44  ;;  %v3114_v49 = vpop.permute.xlu1 %3113  ;;  %v4119_v38 = vadd.f32 %v5862_v2, %v9162_v53 }
 0x2c9   : > { %v3980_v35 = vcombine.high %v3971_v29, %v3978_v59  ;;  %4157 = vmatmul.mubr.f32.gmra.mxu1 %v3961_v25  ;;  %v3979_v55 = vcombine.low %v3971_v29, %v3978_v59  ;;  %v3453_v4 = vsel %vm3304_vm10, %v8939_v24, %v3114_v49 }
 0x2ca   : > { %v9181_v37 = vmax.f32 %v4119_v38, 0.0  ;;  %v3457_v24 = vsel %vm3325_vm11, %v3453_v4, %v9104_v14 }
 0x2cb   : > { %4161 = vmatprep.mubr.f32.mxu1 %v3980_v35  ;;  %v3213_v21 = vpop.permute.xlu0 %3212  ;;  %v3461_v2 = vsel %vm3346_vm12, %v3457_v24, %v9141_v19 }
 0x2cc   : > { %v3295_v20 = vpop.permute.xlu1 %3294  ;;  %v4208_v12 = vcombine.high %v9181_v37, %v9181_v37 }
 0x2cd   : > { %4162 = vmatmul.mubr.f32.gmra.mxu1 %v3979_v55  ;;  %v3475_v52 = vsel %vm3429_vm15, %v3471_v0, %v3295_v20 }
 0x2ce   : > { %v9206_v5 = vrot.slane %v4208_v12, %v6672_v42 }
 0x2cf   : > { %v3273_v48 = vpop.permute.xlu0 %3272 }
 0x2d0   : > { %v3233_v60 = vpop.permute.xlu1 %3232  ;;  %v4224_v33 = vcombine.high %v9206_v5, %v9206_v5 }
 0x2d1   : > { %v3466_v36 = vsel %vm3387_vm13, %v3462_v8, %v3233_v60 }
 0x2d2   : > { %v3470_v10 = vsel %vm3408_vm14, %v3466_v36, %v3269_v30 }
 0x2d3   : > { %v3474_v22 = vsel %vm3429_vm15, %v3470_v10, %v3293_v41  ;;  %v3237_v63 = vpop.permute.xlu0 %3236 }
 0x2d4   : > { %v3710_v31 = vcombine.low %v9089_v62, %v3474_v22  ;;  %v3711_v3 = vcombine.high %v9089_v62, %v3474_v22  ;;  %v3172_v11 = vpop.permute.xlu1 %3171  ;;  %v3728_v62 = vcombine.low %v9076_v58, %v3475_v52 }
 0x2d5   : > { %v3460_v39 = vsel %vm3346_vm12, %v3456_v32, %v3172_v11  ;;  %v4215_v32 = vrot.slane %v9181_v37, %v6672_v42 }
 0x2d6   : > { %v3718_v17 = vrot.slane %v3710_v31, %v6672_v42  ;;  %v3725_v34 = vrot.slane %v3711_v3, %v6672_v42  ;;  %v3464_v61 = vsel %vm370_vm1, %v3460_v39, %v3213_v21  ;;  %v5863_v57 = vpop.f32.mrf.mxu1  ;;  %v3735_v14 = vrot.slane %v3728_v62, %v6672_v42 }
 0x2d7   : > { %v3468_v51 = vsel %vm3387_vm13, %v3464_v61, %v3237_v63  ;;  %v3215_v27 = vpop.permute.xlu0 %3214 }
 0x2d8   : > { %v3297_v23 = vpop.permute.xlu1 %3296  ;;  %v3472_v43 = vsel %vm3408_vm14, %v3468_v51, %v3273_v48  ;;  %v5864_v7 = vpop.f32.mrf.mxu1  ;;  %v3726_v45 = vcombine.high %v3718_v17, %v3718_v17  ;;  %v3727_v1 = vcombine.high %v3725_v34, %v3725_v34  ;;  %v3465_v29 = vsel %vm370_vm1, %v3461_v2, %v3215_v27 }
 0x2d9   : > { %v3476_v30 = vsel %vm3429_vm15, %v3472_v43, %v3297_v23  ;;  %v5865_v56 = vadd.f32 %v5864_v7, %v5863_v57 }
 0x2da   : > { %v3736_v54 = vcombine.low %v9133_v46, %v3476_v30  ;;  %v3737_v18 = vcombine.high %v9133_v46, %v3476_v30  ;;  %v3981_v58 = vcombine.low %v3718_v17, %v3726_v45  ;;  %v3982_v47 = vcombine.low %v3725_v34, %v3727_v1 }
 0x2db   : > { %v4124_v44 = vadd.f32 %v5865_v56, %v9162_v53  ;;  %v3275_v28 = vpop.permute.xlu0 %3274  ;;  %v4223_v17 = vcombine.high %v4215_v32, %v4215_v32 }
 0x2dc   : > { %v3744_v25 = vrot.slane %v3736_v54, %v6672_v42  ;;  %v3239_v59 = vpop.permute.xlu1 %3238  ;;  %v3989_v41 = vrot.slane %v3981_v58, %v6672_v42  ;;  %v3996_v46 = vrot.slane %v3982_v47, %v6672_v42  ;;  %v3751_v21 = vrot.slane %v3737_v18, %v6672_v42 }
 0x2dd   : > { %v9216_v49 = vmax.f32 %v4124_v44, 0.0  ;;  %v3469_v35 = vsel %vm3387_vm13, %v3465_v29, %v3239_v59  ;;  %v4470_v57 = vmax.f32 %v4215_v32, %v4223_v17  ;;  %v4471_v45 = vmax.f32 %v4223_v17, %v9206_v5  ;;  %v4805_v32 = vld [vmem:[%s10292_s5 + $0x138] sm:$0xff]  ;;  %v4804_v17 = vld [vmem:[%s10292_s5 + $0x130] sm:$0xff] }
 0x2de   : > { %v3752_v55 = vcombine.high %v3744_v25, %v3744_v25  ;;  %v3999_v19 = vcombine.low %v3735_v14, %v3744_v25  ;;  %v3998_v26 = vcombine.high %v3989_v41, %v3996_v46  ;;  %v3997_v15 = vcombine.low %v3989_v41, %v3996_v46  ;;  %v4829_v41 = vld [vmem:[%s10292_s5 + $0x1f8] sm:$0xff] }
 0x2df   : > { %v9224_v20 = vrot.slane %v9216_v49, %v6672_v42  ;;  %v3473_v38 = vsel %vm3408_vm14, %v3469_v35, %v3275_v28  ;;  %v3753_v36 = vcombine.high %v3751_v21, %v3751_v21  ;;  %v4472_v54 = vmax.f32 %v9206_v5, %v4224_v33  ;;  %v4813_v46 = vld [vmem:[%s10292_s5 + $0x178] sm:$0xff]  ;;  %v4828_v35 = vld [vmem:[%s10292_s5 + $0x1f0] sm:$0xff]  ;;  %5934 = vmatprep.subr.mxu0 %v4829_v41 }
 0x2e0   : > { %v4000_v50 = vcombine.low %v3752_v55, %v3751_v21  ;;  %v3299_v48 = vpop.permute.xlu1 %3298  ;;  %4166 = vmatprep.mubr.f32.mxu1 %v3998_v26  ;;  %v4007_v6 = vrot.slane %v3999_v19, %v6672_v42  ;;  %v4812_v28 = vld [vmem:[%s10292_s5 + $0x170] sm:$0xff]  ;;  %5935 = vmatpush3.msra.mxu0 %v4813_v46  ;;  %v4827_v21 = vld [vmem:[%s10292_s5 + $0x1e8] sm:$0xff]  ;;  %v4826_v19 = vld [vmem:[%s10292_s5 + $0x1e0] sm:$0xff] }
 0x2e1   : > { %v4473_v13 = vmax.f32 %v4224_v33, %v9224_v20  ;;  %v3477_v8 = vsel %vm3429_vm15, %v3473_v38, %v3299_v48  ;;  %4167 = vmatmul.mubr.f32.gmra.mxu1 %v3997_v15  ;;  %5936 = vmatprep.subr.mxu0 %v4828_v35  ;;  %v4811_v55 = vld [vmem:[%s10292_s5 + $0x168] sm:$0xff]  ;;  %v4810_v33 = vld [vmem:[%s10292_s5 + $0x160] sm:$0xff]  ;;  %v4797_v26 = vld [vmem:[%s10292_s5 + $0xf8] sm:$0xff] }
 0x2e2   : > { %v3754_v60 = vcombine.low %v9129_v40, %v3477_v8  ;;  %v4014_v16 = vrot.slane %v4000_v50, %v6672_v42  ;;  %5937 = vmatpush3.msra.mxu0 %v4812_v28  ;;  %v4781_v15 = vld [vmem:[%s10292_s5 + $0x78] sm:$0xff]  ;;  %5899 = vmatprep.subr.mxu1 %v4797_v26  ;;  %v4796_v38 = vld [vmem:[%s10292_s5 + $0xf0] sm:$0xff]  ;;  %v4795_v8 = vld [vmem:[%s10292_s5 + $0xe8] sm:$0xff] }
 0x2e3   : > { %5938 = vmatprep.subr.mxu0 %v4827_v21  ;;  %v4825_v50 = vld [vmem:[%s10292_s5 + $0x1d8] sm:$0xff]  ;;  %v4780_v48 = vld [vmem:[%s10292_s5 + $0x70] sm:$0xff]  ;;  %5900 = vmatpush3.msra.mxu1 %v4781_v15 }
 0x2e4   : > { %v3761_v9 = vrot.slane %v3754_v60, %v6672_v42  ;;  %v4016_v10 = vcombine.high %v4007_v6, %v4014_v16  ;;  %v4015_v0 = vcombine.low %v4007_v6, %v4014_v16  ;;  %5939 = vmatpush3.msra.mxu0 %v4811_v55  ;;  %v4824_v60 = vld [vmem:[%s10292_s5 + $0x1d0] sm:$0xff]  ;;  %5901 = vmatprep.subr.mxu1 %v4796_v38  ;;  %v4779_v6 = vld [vmem:[%s10292_s5 + $0x68] sm:$0xff] }
 0x2e5   : > { %5940 = vmatprep.subr.mxu0 %v4826_v19  ;;  %v4808_v16 = vld [vmem:[%s10292_s5 + $0x150] sm:$0xff]  ;;  %5902 = vmatpush3.msra.mxu1 %v4780_v48 }
 0x2e6   : > { %v4017_v22 = vcombine.low %v3753_v36, %v3761_v9  ;;  %4171 = vmatprep.mubr.f32.mxu1 %v4016_v10  ;;  %5941 = vmatpush3.msra.mxu0 %v4810_v33  ;;  %v4794_v36 = vld [vmem:[%s10292_s5 + $0xe0] sm:$0xff]  ;;  %v4823_v9 = vld [vmem:[%s10292_s5 + $0x1c8] sm:$0xff] }
 0x2e7   : > { %4172 = vmatmul.mubr.f32.gmra.mxu1 %v4015_v0  ;;  %5942 = vmatprep.subr.mxu0 %v4825_v50  ;;  %v4778_v10 = vld [vmem:[%s10292_s5 + $0x60] sm:$0xff]  ;;  %v4807_v0 = vld [vmem:[%s10292_s5 + $0x148] sm:$0xff]  ;;  %v4240_v50 = vcombine.high %v9224_v20, %v9224_v20 }
 0x2e8   : > { %v4024_v63 = vrot.slane %v4017_v22, %v6672_v42  ;;  %5903 = vmatprep.subr.mxu1 %v4795_v8  ;;  %v4793_v22 = vld [vmem:[%s10292_s5 + $0xd8] sm:$0xff] }
 0x2e9   : > { %5904 = vmatpush3.msra.mxu1 %v4779_v6 }
 0x2ea   : > { %v4025_v52 = vcombine.high %v4024_v63, %v4024_v63  ;;  %5905 = vmatprep.subr.mxu1 %v4794_v36 }
 0x2eb   : > { %5906 = vmatpush3.msra.mxu1 %v4778_v10 }
 0x2ec   : > { %4176 = vmatprep.mubr.f32.mxu1 %v4025_v52  ;;  %v4777_v52 = vld [vmem:[%s10292_s5 + $0x58] sm:$0xff]  ;;  %5907 = vmatprep.subr.mxu1 %v4793_v22 }
 0x2ed   : > { %4177 = vmatmul.mubr.f32.gmra.mxu1 %v4024_v63  ;;  %v4822_v63 = vld [vmem:[%s10292_s5 + $0x1c0] sm:$0xff] }
 0x2ee   : > { %v5866_v31 = vpop.f32.mrf.mxu1  ;;  %5908 = vmatpush3.msra.mxu1 %v4777_v52 }
 0x2f0   : > { %v5867_v40 = vpop.f32.mrf.mxu1 }
 0x2f1   : > { %v5868_v3 = vadd.f32 %v5867_v40, %v5866_v31  ;;  %v4806_v31 = vld [vmem:[%s10292_s5 + $0x140] sm:$0xff]  ;;  %v4792_v40 = vld [vmem:[%s10292_s5 + $0xd0] sm:$0xff] }
 0x2f2   : > { %5909 = vmatprep.subr.mxu1 %v4792_v40 }
 0x2f3   : > { %v4129_v11 = vadd.f32 %v5868_v3, %v9162_v53  ;;  %v4821_v3 = vld [vmem:[%s10292_s5 + $0x1b8] sm:$0xff] }
 0x2f5   : > { %v9237_v4 = vmax.f32 %v4129_v11, 0.0  ;;  %v4776_v11 = vld [vmem:[%s10292_s5 + $0x50] sm:$0xff] }
 0x2f6   : > { %5910 = vmatpush3.msra.mxu1 %v4776_v11 }
 0x2f7   : > { %v4242_v39 = vcombine.high %v9237_v4, %v9237_v4  ;;  %v9383_v33 = vrot.slane %v9237_v4, %v6672_v42 }
 0x2f9   : > { %v4256_v34 = vrot.slane %v4242_v39, %v6672_v42  ;;  %v4820_v39 = vld [vmem:[%s10292_s5 + $0x1b0] sm:$0xff]  ;;  %v4257_v6 = vcombine.high %v9383_v33, %v9383_v33 }
 0x2fb   : > { %v4258_v61 = vcombine.high %v4256_v34, %v4256_v34 }
 0x2fd   : > { %v9242_v12 = vmax.f32 %v4256_v34, %v4258_v61  ;;  %v4819_v34 = vld [vmem:[%s10292_s5 + $0x1a8] sm:$0xff] }
 0x2ff   : > { %v4510_v62 = vmax.f32 %v4470_v57, %v9242_v12 }
 0x310   : > { %v5869_v51 = vpop.f32.mrf.mxu1 }
 0x312   : > { %v5870_v27 = vpop.f32.mrf.mxu1 }
 0x313   : > { %v5871_v24 = vadd.f32 %v5870_v27, %v5869_v51 }
 0x314   : > { %v5872_v57 = vpop.f32.mrf.mxu1 }
 0x315   : > { %v4134_v23 = vadd.f32 %v5871_v24, %v9162_v53 }
 0x317   : > { %v4185_v37 = vmax.f32 %v4134_v23, 0.0 }
 0x319   : > { %v4259_v43 = vcombine.high %v4185_v37, %v4185_v37  ;;  %v4266_v7 = vrot.slane %v4185_v37, %v6672_v42 }
 0x31b   : > { %v9249_v1 = vrot.slane %v4259_v43, %v6672_v42  ;;  %v4274_v30 = vcombine.high %v4266_v7, %v4266_v7  ;;  %v9251_v56 = vmax.f32 %v4258_v61, %v4266_v7  ;;  %v4803_v61 = vld [vmem:[%s10292_s5 + $0x128] sm:$0xff] }
 0x31d   : > { %v9254_v18 = vmax.f32 %v4266_v7, %v4274_v30  ;;  %v9257_v58 = vmax.f32 %v4274_v30, %v9249_v1  ;;  %v4511_v47 = vmax.f32 %v4471_v45, %v9251_v56 }
 0x31f   : > { %v4512_v14 = vmax.f32 %v4472_v54, %v9254_v18  ;;  %v4513_v2 = vmax.f32 %v4473_v13, %v9257_v58  ;;  %v4546_v44 = vcombine.low %v4510_v62, %v4511_v47  ;;  %v4809_v13 = vld [vmem:[%s10292_s5 + $0x158] sm:$0xff]  ;;  %v5873_v62 = vpop.f32.mrf.mxu1 }
 0x320   : > { %5943 = vmatpush3.msra.mxu0 %v4809_v13  ;;  %v5874_v45 = vadd.f32 %v5873_v62, %v5872_v57 }
 0x321   : > { %v4547_v25 = vcombine.low %v4512_v14, %v4513_v2  ;;  %v9263_v29 = vrot.slane %v4546_v44, %v6672_v42  ;;  %5944 = vmatprep.subr.mxu0 %v4824_v60  ;;  %v4225_v44 = vcombine.high %v9216_v49, %v9216_v49 }
 0x322   : > { %5945 = vmatpush3.msra.mxu0 %v4808_v16  ;;  %v4139_v47 = vadd.f32 %v5874_v45, %v9162_v53  ;;  %v4275_v16 = vcombine.high %v9249_v1, %v9249_v1 }
 0x323   : > { %v9266_v59 = vrot.slane %v4547_v25, %v6672_v42  ;;  %5946 = vmatprep.subr.mxu0 %v4823_v9  ;;  %v9378_v28 = vrot.slane %v4225_v44, %v6672_v42 }
 0x324   : > { %5947 = vmatpush3.msra.mxu0 %v4807_v0  ;;  %v4186_v25 = vmax.f32 %v4139_v47, 0.0 }
 0x325   : > { %v4562_v5 = vcombine.low %v9263_v29, %v9266_v59  ;;  %5948 = vmatprep.subr.mxu0 %v4822_v63  ;;  %v9391_v38 = vcombine.high %v9378_v28, %v9378_v28  ;;  %v9401_v0 = vmax.f32 %v4240_v50, %v9378_v28  ;;  %v4845_v29 = vld [vmem:[%s10292_s5 + $0x278] sm:$0xff] }
 0x326   : > { %5949 = vmatpush3.msra.mxu0 %v4806_v31  ;;  %v5875_v51 = vpop.f32.mrf.mxu1  ;;  %v4276_v21 = vcombine.high %v4186_v25, %v4186_v25  ;;  %v4283_v26 = vrot.slane %v4186_v25, %v6672_v42 }
 0x327   : > { %5950 = vmatprep.subr.mxu0 %v4821_v3  ;;  %v4475_v22 = vmax.f32 %v9378_v28, %v9391_v38  ;;  %v4476_v31 = vmax.f32 %v9391_v38, %v9383_v33 }
 0x328   : > { %5951 = vmatpush3.msra.mxu0 %v4805_v32  ;;  %v5876_v27 = vpop.f32.mrf.mxu1  ;;  %v4290_v48 = vrot.slane %v4276_v21, %v6672_v42  ;;  %v4291_v20 = vcombine.high %v4283_v26, %v4283_v26  ;;  %v4477_v32 = vmax.f32 %v9383_v33, %v4257_v6 }
 0x329   : > { %5952 = vmatprep.subr.mxu0 %v4820_v39  ;;  %v5877_v30 = vadd.f32 %v5876_v27, %v5875_v51  ;;  %v9409_v39 = vmax.f32 %v4275_v16, %v4283_v26 }
 0x32a   : > { %5953 = vmatpush3.msra.mxu0 %v4804_v17  ;;  %v4292_v63 = vcombine.high %v4290_v48, %v4290_v48  ;;  %v9413_v57 = vmax.f32 %v4291_v20, %v4290_v48 }
 0x32b   : > { %5954 = vmatprep.subr.mxu0 %v4819_v34  ;;  %v4144_v14 = vadd.f32 %v5877_v30, %v9162_v53  ;;  %v4514_v33 = vmax.f32 %v9401_v0, %v9409_v39 }
 0x32c   : > { %5955 = vmatpush3.msra.mxu0 %v4803_v61  ;;  %v9411_v61 = vmax.f32 %v4283_v26, %v4291_v20  ;;  %v9418_v27 = vmax.f32 %v4290_v48, %v4292_v63  ;;  %v4516_v16 = vmax.f32 %v4476_v31, %v9413_v57 }
 0x32d   : > { %v4187_v41 = vmax.f32 %v4144_v14, 0.0 }
 0x32e   : > { %v4515_v6 = vmax.f32 %v4475_v22, %v9411_v61 }
 0x32f   : > { %v4293_v55 = vcombine.high %v4187_v41, %v4187_v41  ;;  %v4300_v13 = vrot.slane %v4187_v41, %v6672_v42 }
 0x331   : > { %v4307_v8 = vrot.slane %v4293_v55, %v6672_v42  ;;  %v4308_v40 = vcombine.high %v4300_v13, %v4300_v13 }
 0x333   : > { %v4309_v3 = vcombine.high %v4307_v8, %v4307_v8 }
 0x335   : > { %v9427_v30 = vmax.f32 %v4307_v8, %v4309_v3 }
 0x351   : > { %v5878_v24 = vpop.f32.mrf.mxu1 }
 0x353   : > { %v5879_v23 = vpop.f32.mrf.mxu1 }
 0x354   : > { %v5880_v46 = vadd.f32 %v5879_v23, %v5878_v24 }
 0x356   : > { %v4149_v19 = vadd.f32 %v5880_v46, %v9162_v53 }
 0x358   : > { %v4188_v4 = vmax.f32 %v4149_v19, 0.0 }
 0x35a   : > { %v4310_v11 = vcombine.high %v4188_v4, %v4188_v4  ;;  %v4317_v62 = vrot.slane %v4188_v4, %v6672_v42 }
 0x35c   : > { %v4324_v45 = vrot.slane %v4310_v11, %v6672_v42  ;;  %v4325_v25 = vcombine.high %v4317_v62, %v4317_v62  ;;  %v9432_v41 = vmax.f32 %v4309_v3, %v4317_v62  ;;  %v4775_v62 = vld [vmem:[%s10292_s5 + $0x48] sm:$0xff] }
 0x35e   : > { %v4326_v26 = vcombine.high %v4324_v45, %v4324_v45 }
 0x365   : > { %v5881_v37 = vpop.f32.mrf.mxu1 }
 0x367   : > { %v5882_v43 = vpop.f32.mrf.mxu1 }
 0x368   : > { %v5883_v7 = vadd.f32 %v5882_v43, %v5881_v37  ;;  %v9422_v43 = vmax.f32 %v4300_v13, %v4308_v40 }
 0x36a   : > { %v4154_v54 = vadd.f32 %v5883_v7, %v9162_v53  ;;  %v9424_v7 = vmax.f32 %v4308_v40, %v4307_v8 }
 0x36c   : > { %v4189_v2 = vmax.f32 %v4154_v54, 0.0 }
 0x36e   : > { %v4327_v35 = vcombine.high %v4189_v2, %v4189_v2  ;;  %v4334_v46 = vrot.slane %v4189_v2, %v6672_v42  ;;  %v4517_v2 = vmax.f32 %v4477_v32, %v9418_v27 }
 0x370   : > { %v4341_v15 = vrot.slane %v4327_v35, %v6672_v42  ;;  %v4342_v13 = vcombine.high %v4334_v46, %v4334_v46  ;;  %v4569_v40 = vcombine.low %v4516_v16, %v4517_v2 }
 0x372   : > { %v4343_v9 = vcombine.high %v4341_v15, %v4341_v15  ;;  %v9468_v22 = vmax.f32 %v4334_v46, %v4342_v13  ;;  %v4816_v13 = vld [vmem:[%s10292_s5 + $0x190] sm:$0xff] }
 0x374   : > { %v9416_v51 = vmax.f32 %v4341_v15, %v4343_v9 }
 0x376   : > { %v4526_v35 = vmax.f32 %v9422_v43, %v9416_v51 }
 0x389   : > { %v5884_v49 = vpop.f32.mrf.mxu1 }
 0x38b   : > { %v5885_v60 = vpop.f32.mrf.mxu1 }
 0x38c   : > { %v5886_v36 = vadd.f32 %v5885_v60, %v5884_v49 }
 0x38d   : > { %v5887_v10 = vpop.f32.mrf.mxu1 }
 0x38e   : > { %v4159_v52 = vadd.f32 %v5886_v36, %v9162_v53  ;;  %v9456_v36 = vmax.f32 %v4325_v25, %v4324_v45  ;;  %v4802_v25 = vld [vmem:[%s10292_s5 + $0x120] sm:$0xff] }
 0x38f   : > { %v5888_v1 = vpop.f32.mrf.mxu1 }
 0x390   : > { %v4190_v17 = vmax.f32 %v4159_v52, 0.0  ;;  %v5889_v34 = vadd.f32 %v5888_v1, %v5887_v10  ;;  %v9464_v52 = vmax.f32 %v4326_v26, %v4334_v46  ;;  %v4789_v46 = vld [vmem:[%s10292_s5 + $0xb8] sm:$0xff] }
 0x392   : > { %v4344_v24 = vcombine.high %v4190_v17, %v4190_v17  ;;  %v4351_v23 = vrot.slane %v4190_v17, %v6672_v42  ;;  %v4164_v37 = vadd.f32 %v5889_v34, %v9162_v53  ;;  %v4791_v34 = vld [vmem:[%s10292_s5 + $0xc8] sm:$0xff] }
 0x393   : > { %5911 = vmatprep.subr.mxu1 %v4791_v34  ;;  %v4770_v34 = vld [vmem:[%s10292_s5 + $0x20] sm:$0xff] }
 0x394   : > { %v4358_v54 = vrot.slane %v4344_v24, %v6672_v42  ;;  %v4359_v47 = vcombine.high %v4351_v23, %v4351_v23  ;;  %v9430_v14 = vmax.f32 %v4343_v9, %v4351_v23  ;;  %v4191_v44 = vmax.f32 %v4164_v37, 0.0  ;;  %v4790_v24 = vld [vmem:[%s10292_s5 + $0xc0] sm:$0xff]  ;;  %5912 = vmatpush3.msra.mxu1 %v4775_v62  ;;  %v4785_v62 = vld [vmem:[%s10292_s5 + $0x98] sm:$0xff] }
 0x395   : > { %v9458_v9 = vmax.f32 %v4324_v45, %v4326_v26  ;;  %v4568_v45 = vcombine.low %v4514_v33, %v4515_v6  ;;  %5913 = vmatprep.subr.mxu1 %v4790_v24  ;;  %v4773_v33 = vld [vmem:[%s10292_s5 + $0x38] sm:$0xff]  ;;  %v4787_v6 = vld [vmem:[%s10292_s5 + $0xa8] sm:$0xff] }
 0x396   : > { %v4360_v28 = vcombine.high %v4358_v54, %v4358_v54  ;;  %v9437_v21 = vmax.f32 %v4351_v23, %v4359_v47  ;;  %v9439_v55 = vmax.f32 %v4359_v47, %v4358_v54  ;;  %v4527_v19 = vmax.f32 %v9424_v7, %v9430_v14  ;;  %v4818_v47 = vld [vmem:[%s10292_s5 + $0x1a0] sm:$0xff]  ;;  %v4801_v26 = vld [vmem:[%s10292_s5 + $0x118] sm:$0xff] }
 0x397   : > { %v4361_v15 = vcombine.high %v4191_v44, %v4191_v44  ;;  %v4368_v49 = vrot.slane %v4191_v44, %v6672_v42  ;;  %v4774_v44 = vld [vmem:[%s10292_s5 + $0x40] sm:$0xff]  ;;  %5956 = vmatprep.subr.mxu0 %v4818_v47  ;;  %v4576_v2 = vrot.slane %v4568_v45, %v6672_v42 }
 0x398   : > { %v4528_v50 = vmax.f32 %v9427_v30, %v9437_v21  ;;  %v4529_v38 = vmax.f32 %v9432_v41, %v9439_v55  ;;  %v4640_v48 = vcombine.low %v4526_v35, %v4527_v19  ;;  %v4817_v35 = vld [vmem:[%s10292_s5 + $0x198] sm:$0xff]  ;;  %5957 = vmatpush3.msra.mxu0 %v4802_v25  ;;  %5914 = vmatpush3.msra.mxu1 %v4774_v44 }
 0x399   : > { %v4375_v8 = vrot.slane %v4361_v15, %v6672_v42  ;;  %v4376_v4 = vcombine.high %v4368_v49, %v4368_v49  ;;  %v9452_v60 = vmax.f32 %v4360_v28, %v4368_v49  ;;  %v4583_v28 = vrot.slane %v4569_v40, %v6672_v42  ;;  %5958 = vmatprep.subr.mxu0 %v4817_v35  ;;  %v4771_v40 = vld [vmem:[%s10292_s5 + $0x28] sm:$0xff] }
 0x39a   : > { %v4641_v20 = vcombine.low %v4528_v50, %v4529_v38  ;;  %v4648_v3 = vrot.slane %v4640_v48, %v6672_v42  ;;  %5915 = vmatprep.subr.mxu1 %v4789_v46  ;;  %5959 = vmatpush3.msra.mxu0 %v4801_v26  ;;  %v4772_v48 = vld [vmem:[%s10292_s5 + $0x30] sm:$0xff]  ;;  %v4518_v44 = vmax.f32 %v9242_v12, %v9422_v43 }
 0x39b   : > { %v4377_v10 = vcombine.high %v4375_v8, %v4375_v8  ;;  %v9460_v0 = vmax.f32 %v4368_v49, %v4376_v4  ;;  %v9462_v63 = vmax.f32 %v4376_v4, %v4375_v8  ;;  %v4530_v1 = vmax.f32 %v9456_v36, %v9452_v60  ;;  %v4788_v49 = vld [vmem:[%s10292_s5 + $0xb0] sm:$0xff]  ;;  %5916 = vmatpush3.msra.mxu1 %v4773_v33 }
 0x39c   : > { %v4655_v11 = vrot.slane %v4641_v20, %v6672_v42  ;;  %5960 = vmatprep.subr.mxu0 %v4816_v13  ;;  %v4584_v20 = vcombine.low %v4576_v2, %v4583_v28  ;;  %5917 = vmatprep.subr.mxu1 %v4788_v49  ;;  %v4519_v25 = vmax.f32 %v9251_v56, %v9424_v7 }
 0x39d   : > { %v9470_v31 = vmax.f32 %v4375_v8, %v4377_v10  ;;  %v4531_v32 = vmax.f32 %v9458_v9, %v9460_v0  ;;  %v4532_v23 = vmax.f32 %v9464_v52, %v9462_v63  ;;  %v4800_v8 = vld [vmem:[%s10292_s5 + $0x110] sm:$0xff]  ;;  %5918 = vmatpush3.msra.mxu1 %v4772_v48  ;;  %v4521_v35 = vmax.f32 %v9257_v58, %v9432_v41 }
 0x39e   : > { %v9476_v17 = vcombine.low %v4648_v3, %v4655_v11  ;;  %5961 = vmatpush3.msra.mxu0 %v4800_v8  ;;  %v4786_v3 = vld [vmem:[%s10292_s5 + $0xa0] sm:$0xff]  ;;  %5919 = vmatprep.subr.mxu1 %v4787_v6 }
 0x39f   : > { %v4533_v37 = vmax.f32 %v9468_v22, %v9470_v31  ;;  %v4662_v54 = vcombine.low %v4530_v1, %v4531_v32  ;;  %5920 = vmatpush3.msra.mxu1 %v4771_v40 }
 0x3a0   : > { %5921 = vmatprep.subr.mxu1 %v4786_v3 }
 0x3a1   : > { %v4663_v19 = vcombine.low %v4532_v23, %v4533_v37  ;;  %v5890_v15 = vpop.f32.mrf.mxu1  ;;  %v4670_v50 = vrot.slane %v4662_v54, %v6672_v42  ;;  %v4769_v37 = vld [vmem:[%s10292_s5 + $0x18] sm:$0xff]  ;;  %5922 = vmatpush3.msra.mxu1 %v4770_v34  ;;  %v4814_v34 = vld [vmem:[%s10292_s5 + $0x180] sm:$0xff] }
 0x3a2   : > { %5923 = vmatprep.subr.mxu1 %v4785_v62  ;;  %v4525_v62 = vmax.f32 %v9418_v27, %v9468_v22  ;;  %v4522_v22 = vmax.f32 %v9409_v39, %v9456_v36  ;;  %v4766_v39 = vld [vmem:[%s10292_s5] sm:$0xff] }
 0x3a3   : > { %v4677_v38 = vrot.slane %v4663_v19, %v6672_v42  ;;  %v5891_v4 = vpop.f32.mrf.mxu1  ;;  %5924 = vmatpush3.msra.mxu1 %v4769_v37 }
 0x3a4   : > { %v5892_v16 = vadd.f32 %v5891_v4, %v5890_v15  ;;  %v4520_v15 = vmax.f32 %v9254_v18, %v9427_v30 }
 0x3a5   : > { %v4678_v10 = vcombine.low %v4670_v50, %v4677_v38  ;;  %v4592_v50 = vcombine.low %v4518_v44, %v4519_v25 }
 0x3a6   : > { %v4169_v11 = vadd.f32 %v5892_v16, %v9162_v53  ;;  %v4593_v48 = vcombine.low %v4520_v15, %v4521_v35  ;;  %v4815_v16 = vld [vmem:[%s10292_s5 + $0x188] sm:$0xff]  ;;  %v4861_v15 = vld [vmem:[%s10292_s5 + $0x2f8] sm:$0xff] }
 0x3a7   : > { %v5893_v1 = vpop.f32.mrf.mxu1  ;;  %v6336_v32 = vpack.i.bf16 %v4584_v20, %v4678_v10  ;;  %v4784_v20 = vld [vmem:[%s10292_s5 + $0x90] sm:$0xff]  ;;  %5962 = vmatprep.subr.mxu0 %v4815_v16 }
 0x3a8   : > { %v4192_v24 = vmax.f32 %v4169_v11, 0.0  ;;  %5925 = vmatprep.subr.mxu1 %v4784_v20  ;;  %v4783_v11 = vld [vmem:[%s10292_s5 + $0x88] sm:$0xff] }
 0x3a9   : > { %6337 = vrot.lane.b32.xlu0 %v6336_v32, %s6421_s17  ;;  %v5894_v23 = vpop.f32.mrf.mxu1  ;;  %s10565_s17 = smov 64  }
 0x3aa   : > { %v5895_v45 = vadd.f32 %v5894_v23, %v5893_v1  ;;  %v4378_v54 = vcombine.high %v4192_v24, %v4192_v24  ;;  %v4385_v47 = vrot.slane %v4192_v24, %v6672_v42  ;;  %v4767_v1 = vld [vmem:[%s10292_s5 + $0x8] sm:$0xff] }
 0x3ac   : > { %v4174_v46 = vadd.f32 %v5895_v45, %v9162_v53  ;;  %v4392_v28 = vrot.slane %v4378_v54, %v6672_v42  ;;  %v4393_v19 = vcombine.high %v4385_v47, %v4385_v47  ;;  %v4523_v45 = vmax.f32 %v9411_v61, %v9458_v9 }
 0x3ad   : > { %v5896_v33 = vpop.f32.mrf.mxu1  ;;  %v4524_v54 = vmax.f32 %v9413_v57, %v9464_v52 }
 0x3ae   : > { %v4193_v26 = vmax.f32 %v4174_v46, 0.0  ;;  %v4502_v49 = vmax.f32 %v4385_v47, %v4393_v19  ;;  %v4503_v2 = vmax.f32 %v4393_v19, %v4392_v28  ;;  %v4394_v12 = vcombine.high %v4392_v28, %v4392_v28 }
 0x3af   : > { %v5897_v43 = vpop.f32.mrf.mxu1  ;;  %v4617_v19 = vcombine.low %v4524_v54, %v4525_v62  ;;  %v4616_v57 = vcombine.low %v4522_v22, %v4523_v45  ;;  %v4842_v62 = vld [vmem:[%s10292_s5 + $0x260] sm:$0xff]  ;;  %v4841_v45 = vld [vmem:[%s10292_s5 + $0x258] sm:$0xff]  ;;  %v4888_v22 = vld [vmem:[%s10292_s5 + $0x3d0] sm:$0xff] }
 0x3b0   : > { %v4395_v56 = vcombine.high %v4193_v26, %v4193_v26  ;;  %v4402_v7 = vrot.slane %v4193_v26, %v6672_v42  ;;  %v5898_v38 = vadd.f32 %v5897_v43, %v5896_v33  ;;  %v4534_v58 = vmax.f32 %v9416_v51, %v4502_v49  ;;  %v4799_v51 = vld [vmem:[%s10292_s5 + $0x108] sm:$0xff]  ;;  %v4782_v33 = vld [vmem:[%s10292_s5 + $0x80] sm:$0xff] }
 0x3b1   : > { %v4535_v41 = vmax.f32 %v9430_v14, %v4503_v2  ;;  %v4504_v13 = vmax.f32 %v4392_v28, %v4394_v12  ;;  %5963 = vmatpush3.msra.mxu0 %v4799_v51  ;;  %v4631_v49 = vrot.slane %v4617_v19, %v6672_v42  ;;  %v4874_v54 = vld [vmem:[%s10292_s5 + $0x360] sm:$0xff] }
 0x3b2   : > { %v4409_v8 = vrot.slane %v4395_v56, %v6672_v42  ;;  %v4410_v4 = vcombine.high %v4402_v7, %v4402_v7  ;;  %v4505_v6 = vmax.f32 %v4394_v12, %v4402_v7  ;;  %v4179_v18 = vadd.f32 %v5898_v38, %v9162_v53  ;;  %v4768_v53 = vld [vmem:[%s10292_s5 + $0x10] sm:$0xff]  ;;  %5964 = vmatprep.subr.mxu0 %v4814_v34  ;;  %v4891_v34 = vld [vmem:[%s10292_s5 + $0x3e8] sm:$0xff]  ;;  %v4838_v19 = vld [vmem:[%s10292_s5 + $0x240] sm:$0xff] }
 0x3b3   : > { %v4686_v30 = vcombine.low %v4534_v58, %v4535_v41  ;;  %v4536_v10 = vmax.f32 %v9437_v21, %v4504_v13  ;;  %v4600_v21 = vrot.slane %v4592_v50, %v6672_v42  ;;  %5926 = vmatpush3.msra.mxu1 %v4768_v53  ;;  %v4859_v53 = vld [vmem:[%s10292_s5 + $0x2e8] sm:$0xff] }
 0x3b4   : > { %v4411_v14 = vcombine.high %v4409_v8, %v4409_v8  ;;  %v4537_v40 = vmax.f32 %v9439_v55, %v4505_v6  ;;  %v4194_v3 = vmax.f32 %v4179_v18, 0.0  ;;  %v4506_v32 = vmax.f32 %v4410_v4, %v4409_v8  ;;  %5927 = vmatprep.subr.mxu1 %v4783_v11  ;;  %v4892_v11 = vld [vmem:[%s10292_s5 + $0x3f0] sm:$0xff] }
 0x3b5   : > { %v4607_v55 = vrot.slane %v4593_v48, %v6672_v42  ;;  %v4694_v47 = vrot.slane %v4686_v30, %v6672_v42  ;;  %5928 = vmatpush3.msra.mxu1 %v4767_v1 }
 0x3b6   : > { %v4507_v24 = vmax.f32 %v4409_v8, %v4411_v14  ;;  %v4687_v23 = vcombine.low %v4536_v10, %v4537_v40  ;;  %v4418_v37 = vrot.slane %v4194_v3, %v6672_v42  ;;  %v4538_v35 = vmax.f32 %v9452_v60, %v4506_v32  ;;  %5929 = vmatprep.subr.mxu1 %v4782_v33  ;;  %v4844_v40 = vld [vmem:[%s10292_s5 + $0x270] sm:$0xff]  ;;  %v4877_v3 = vld [vmem:[%s10292_s5 + $0x378] sm:$0xff]  ;;  %v4843_v32 = vld [vmem:[%s10292_s5 + $0x268] sm:$0xff] }
 0x3b7   : > { %v4608_v61 = vcombine.low %v4600_v21, %v4607_v55  ;;  %5930 = vmatpush3.msra.mxu1 %v4766_v39  ;;  %v4876_v21 = vld [vmem:[%s10292_s5 + $0x370] sm:$0xff]  ;;  %v4858_v55 = vld [vmem:[%s10292_s5 + $0x2e0] sm:$0xff] }
 0x3b8   : > { %v4539_v44 = vmax.f32 %v9460_v0, %v4507_v24  ;;  %v4419_v25 = vcombine.high %v4418_v37, %v4418_v37  ;;  %v4508_v46 = vmax.f32 %v4411_v14, %v4418_v37  ;;  %v4701_v27 = vrot.slane %v4687_v23, %v6672_v42  ;;  %v4798_v0 = vld [vmem:[%s10292_s5 + $0x100] sm:$0xff]  ;;  %5969 = vmatprep.subr.mxu1 %v4861_v15  ;;  %v4875_v24 = vld [vmem:[%s10292_s5 + $0x368] sm:$0xff]  ;;  %v4857_v23 = vld [vmem:[%s10292_s5 + $0x2d8] sm:$0xff] }
 0x3b9   : > { %5965 = vmatpush3.msra.mxu0 %v4798_v0  ;;  %v4886_v33 = vld [vmem:[%s10292_s5 + $0x3c0] sm:$0xff]  ;;  %v4837_v0 = vld [vmem:[%s10292_s5 + $0x238] sm:$0xff] }
 0x3ba   : > { %v4509_v28 = vmax.f32 %v4418_v37, %v4419_v25  ;;  %v4702_v9 = vcombine.low %v4694_v47, %v4701_v27  ;;  %v4710_v52 = vcombine.low %v4538_v35, %v4539_v44  ;;  %v4540_v60 = vmax.f32 %v9462_v63, %v4508_v46  ;;  %v4893_v63 = vld [vmem:[%s10292_s5 + $0x3f8] sm:$0xff]  ;;  %v4890_v37 = vld [vmem:[%s10292_s5 + $0x3e0] sm:$0xff]  ;;  %v4856_v47 = vld [vmem:[%s10292_s5 + $0x2d0] sm:$0xff] }
 0x3bb   : > { %6004 = vmatprep.subr.mxu0 %v4893_v63  ;;  %v4889_v44 = vld [vmem:[%s10292_s5 + $0x3d8] sm:$0xff]  ;;  %v4840_v25 = vld [vmem:[%s10292_s5 + $0x250] sm:$0xff]  ;;  %v4855_v27 = vld [vmem:[%s10292_s5 + $0x2c8] sm:$0xff] }
 0x3bc   : > { %v4541_v36 = vmax.f32 %v9470_v31, %v4509_v28  ;;  %v6341_v26 = vpack.i.bf16 %v4608_v61, %v4702_v9  ;;  %v4624_v31 = vrot.slane %v4616_v57, %v6672_v42  ;;  %v4718_v12 = vrot.slane %v4710_v52, %v6672_v42  ;;  %v4873_v46 = vld [vmem:[%s10292_s5 + $0x358] sm:$0xff]  ;;  %v4839_v35 = vld [vmem:[%s10292_s5 + $0x248] sm:$0xff]  ;;  %v4872_v28 = vld [vmem:[%s10292_s5 + $0x350] sm:$0xff] }
 0x3bd   : > { %v4854_v61 = vld [vmem:[%s10292_s5 + $0x2c0] sm:$0xff]  ;;  %v4887_v9 = vld [vmem:[%s10292_s5 + $0x3c8] sm:$0xff]  ;;  %v4853_v52 = vld [vmem:[%s10292_s5 + $0x2b8] sm:$0xff] }
 0x3be   : > { %6342 = vrot.lane.b32.xlu1 %v6341_v26, %s10565_s17  ;;  %v4711_v2 = vcombine.low %v4540_v60, %v4541_v36  ;;  %v4632_v50 = vcombine.low %v4624_v31, %v4631_v49  ;;  %v4871_v57 = vld [vmem:[%s10292_s5 + $0x348] sm:$0xff]  ;;  %v4870_v39 = vld [vmem:[%s10292_s5 + $0x340] sm:$0xff]  ;;  %v4852_v60 = vld [vmem:[%s10292_s5 + $0x2b0] sm:$0xff]  ;;  %s5792_s17 = sshll.u32 %s6500_s13, 4  ;;  %s6362_s13 = scalar_lea.vmem %s6361_s28, 32 }
 0x3bf   : > { %v4885_v36 = vld [vmem:[%s10292_s5 + $0x3b8] sm:$0xff]  ;;  %v4836_v26 = vld [vmem:[%s10292_s5 + $0x230] sm:$0xff]  ;;  %v4851_v49 = vld [vmem:[%s10292_s5 + $0x2a8] sm:$0xff]  ;;  %s5688_s26 = scalar_lea.hbm %s10296_s9, %s5792_s17  ;;  %p6364_p1 = scmp.lt.s32.totalorder %s6362_s13, %s6356_s29 }
 0x3c0   : > { %v4725_v43 = vrot.slane %v4711_v2, %v6672_v42  ;;  %v4869_v15 = vld [vmem:[%s10292_s5 + $0x338] sm:$0xff]  ;;  %v4884_v2 = vld [vmem:[%s10292_s5 + $0x3b0] sm:$0xff]  ;;  %v4835_v63 = vld [vmem:[%s10292_s5 + $0x228] sm:$0xff] }
 0x3c1   : > { %v4868_v31 = vld [vmem:[%s10292_s5 + $0x330] sm:$0xff]  ;;  %p6365_p2 = por %p6364_p1, %p6363_p0 }
 0x3c2   : > { %v4726_v56 = vcombine.low %v4718_v12, %v4725_v43  ;;  %v4850_v12 = vld [vmem:[%s10292_s5 + $0x2a0] sm:$0xff]  ;;  %v4883_v43 = vld [vmem:[%s10292_s5 + $0x3a8] sm:$0xff] }
 0x3c3   : > { %p6366_p3 = pnand %p6365_p2, %p6359_p13 }
 0x3c4   : > { %v6346_v7 = vpack.i.bf16 %v4632_v50, %v4726_v56  ;;  %v4834_v50 = vld [vmem:[%s10292_s5 + $0x220] sm:$0xff]  ;;  %v4867_v56 = vld [vmem:[%s10292_s5 + $0x328] sm:$0xff] }
 0x3c6   : > { %6347 = vrot.lane.b32.xlu0 %v6346_v7, %s10443_s16  ;;  %v4849_v7 = vld [vmem:[%s10292_s5 + $0x298] sm:$0xff] }
 0x41b   : > { %v6338_v38 = vpop.permute.xlu0 %6337 }
 0x41c   : > { %v6340_v58 = vunpack.i.h.bf16 %v6338_v38  ;;  %v6339_v41 = vunpack.i.l.bf16 %v6338_v38  ;;  %v4882_v38 = vld [vmem:[%s10292_s5 + $0x3a0] sm:$0xff] }
 0x41e   : > { %v4730_v6 = vsel %vm3325_vm11, %v4562_v5, %v6340_v58  ;;  %v4733_v42 = vsel %vm3325_vm11, %v9476_v17, %v6339_v41  ;;  %v4860_v5 = vld [vmem:[%s10292_s5 + $0x2f0] sm:$0xff]  ;;  %v4866_v58 = vld [vmem:[%s10292_s5 + $0x320] sm:$0xff] }
 0x41f   : > { %v4848_v41 = vld [vmem:[%s10292_s5 + $0x290] sm:$0xff] }
 0x430   : > { %v6343_v48 = vpop.permute.xlu1 %6342 }
 0x431   : > { %v6345_v13 = vunpack.i.h.bf16 %v6343_v48  ;;  %v6344_v8 = vunpack.i.l.bf16 %v6343_v48  ;;  %v4833_v48 = vld [vmem:[%s10292_s5 + $0x218] sm:$0xff] }
 0x433   : > { %v4731_v16 = vsel %vm370_vm1, %v4730_v6, %v6345_v13  ;;  %v4734_v20 = vsel %vm370_vm1, %v4733_v42, %v6344_v8  ;;  %v4881_v13 = vld [vmem:[%s10292_s5 + $0x398] sm:$0xff]  ;;  %v4832_v8 = vld [vmem:[%s10292_s5 + $0x210] sm:$0xff]  ;;  %v4847_v6 = vld [vmem:[%s10292_s5 + $0x288] sm:$0xff] }
 0x434   : > { %v4880_v42 = vld [vmem:[%s10292_s5 + $0x390] sm:$0xff] }
 0x438   : > { %v6348_v4 = vpop.permute.xlu0 %6347 }
 0x439   : > { %v6350_v18 = vunpack.i.h.bf16 %v6348_v4  ;;  %v6349_v30 = vunpack.i.l.bf16 %v6348_v4  ;;  %v4865_v4 = vld [vmem:[%s10292_s5 + $0x318] sm:$0xff] }
 0x43b   : > { %v9634_v51 = vsel %vm3408_vm14, %v4731_v16, %v6350_v18  ;;  %v9637_v14 = vsel %vm3408_vm14, %v4734_v20, %v6349_v30  ;;  %v4831_v18 = vld [vmem:[%s10292_s5 + $0x208] sm:$0xff]  ;;  %v4864_v30 = vld [vmem:[%s10292_s5 + $0x310] sm:$0xff]  ;;  %v4846_v16 = vld [vmem:[%s10292_s5 + $0x280] sm:$0xff] }
 0x43c   : > { %5087 = vmatprep.mubr.f32.mxu1 %v9637_v14  ;;  %v4739_v59 = vrot.slane %v9637_v14, 1  ;;  %v4743_v17 = vrot.slane %v9637_v14, 2  ;;  %v4738_v10 = vrot.slane %v9634_v51, 1  ;;  %v4747_v1 = vrot.slane %v9637_v14, 3  ;;  %v4879_v20 = vld [vmem:[%s10292_s5 + $0x388] sm:$0xff] }
 0x43d   : > { %5088 = vmatmul.mubr.f32.vlgmr.msra.gmra.mxu1 %v9634_v51 }
 0x43e   : > { %5970 = vmatpush3.msra.mxu1 %v4845_v29  ;;  %5157 = vmatprep.mubr.f32.mxu0 %v4739_v59  ;;  %v4830_v29 = vld [vmem:[%s10292_s5 + $0x200] sm:$0xff]  ;;  %v4863_v59 = vld [vmem:[%s10292_s5 + $0x308] sm:$0xff] }
 0x43f   : > { %5971 = vmatprep.subr.mxu1 %v4860_v5  ;;  %5227 = vmatprep.mubr.f32.mxu1 %v4743_v17  ;;  %v4878_v5 = vld [vmem:[%s10292_s5 + $0x380] sm:$0xff]  ;;  %v4742_v17 = vrot.slane %v9634_v51, 2 }
 0x440   : > { %5158 = vmatmul.mubr.f32.vlgmr.msra.gmra.mxu0 %v4738_v10  ;;  %5972 = vmatpush3.msra.mxu1 %v4844_v40  ;;  %v4925_v10 = vld [vmem:[%s10292_s5 + $0x4f8] sm:$0xff]  ;;  %v4862_v40 = vld [vmem:[%s10292_s5 + $0x300] sm:$0xff] }
 0x441   : > { %6005 = vmatpush3.msra.mxu0 %v4877_v3  ;;  %5973 = vmatprep.subr.mxu1 %v4859_v53  ;;  %v4909_v3 = vld [vmem:[%s10292_s5 + $0x478] sm:$0xff]  ;;  %v4751_v53 = vrot.slane %v9637_v14, 4 }
 0x442   : > { %6006 = vmatprep.subr.mxu0 %v4892_v11  ;;  %5297 = vmatprep.mubr.f32.mxu0 %v4747_v1  ;;  %v4924_v11 = vld [vmem:[%s10292_s5 + $0x4f0] sm:$0xff]  ;;  %v4746_v1 = vrot.slane %v9634_v51, 3 }
 0x443   : > { %5974 = vmatpush3.msra.mxu1 %v4843_v32  ;;  %6007 = vmatpush3.msra.mxu0 %v4876_v21  ;;  %v4957_v32 = vld [vmem:[%s10292_s5 + $0x5f8] sm:$0xff]  ;;  %v4908_v21 = vld [vmem:[%s10292_s5 + $0x470] sm:$0xff] }
 0x444   : > { %5975 = vmatprep.subr.mxu1 %v4858_v55  ;;  %6008 = vmatprep.subr.mxu0 %v4891_v34  ;;  %v4941_v55 = vld [vmem:[%s10292_s5 + $0x578] sm:$0xff]  ;;  %v4755_v34 = vrot.slane %v9637_v14, 5 }
 0x445   : > { %5976 = vmatpush3.msra.mxu1 %v4842_v62  ;;  %6009 = vmatpush3.msra.mxu0 %v4875_v24  ;;  %v4923_v62 = vld [vmem:[%s10292_s5 + $0x4e8] sm:$0xff]  ;;  %v4956_v24 = vld [vmem:[%s10292_s5 + $0x5f0] sm:$0xff] }
 0x446   : > { %5977 = vmatprep.subr.mxu1 %v4857_v23  ;;  %6010 = vmatprep.subr.mxu0 %v4890_v37  ;;  %v4907_v23 = vld [vmem:[%s10292_s5 + $0x468] sm:$0xff]  ;;  %v4940_v37 = vld [vmem:[%s10292_s5 + $0x570] sm:$0xff] }
 0x447   : > { %5978 = vmatpush3.msra.mxu1 %v4841_v45  ;;  %6011 = vmatpush3.msra.mxu0 %v4874_v54  ;;  %v4922_v45 = vld [vmem:[%s10292_s5 + $0x4e0] sm:$0xff]  ;;  %v4955_v54 = vld [vmem:[%s10292_s5 + $0x5e8] sm:$0xff] }
 0x448   : > { %5979 = vmatprep.subr.mxu1 %v4856_v47  ;;  %6012 = vmatprep.subr.mxu0 %v4889_v44  ;;  %v4906_v47 = vld [vmem:[%s10292_s5 + $0x460] sm:$0xff]  ;;  %v4939_v44 = vld [vmem:[%s10292_s5 + $0x568] sm:$0xff] }
 0x449   : > { %5980 = vmatpush3.msra.mxu1 %v4840_v25  ;;  %6013 = vmatpush3.msra.mxu0 %v4873_v46  ;;  %v4921_v25 = vld [vmem:[%s10292_s5 + $0x4d8] sm:$0xff]  ;;  %v4954_v46 = vld [vmem:[%s10292_s5 + $0x5e0] sm:$0xff] }
 0x44a   : > { %5981 = vmatprep.subr.mxu1 %v4855_v27  ;;  %6014 = vmatprep.subr.mxu0 %v4888_v22  ;;  %v4905_v27 = vld [vmem:[%s10292_s5 + $0x458] sm:$0xff]  ;;  %v4938_v22 = vld [vmem:[%s10292_s5 + $0x560] sm:$0xff] }
 0x44b   : > { %5982 = vmatpush3.msra.mxu1 %v4839_v35  ;;  %6015 = vmatpush3.msra.mxu0 %v4872_v28  ;;  %v4920_v35 = vld [vmem:[%s10292_s5 + $0x4d0] sm:$0xff]  ;;  %v4953_v28 = vld [vmem:[%s10292_s5 + $0x5d8] sm:$0xff] }
 0x44c   : > { %5983 = vmatprep.subr.mxu1 %v4854_v61  ;;  %6016 = vmatprep.subr.mxu0 %v4887_v9  ;;  %v4904_v61 = vld [vmem:[%s10292_s5 + $0x450] sm:$0xff]  ;;  %v4937_v9 = vld [vmem:[%s10292_s5 + $0x558] sm:$0xff] }
 0x44d   : > { %5984 = vmatpush3.msra.mxu1 %v4838_v19  ;;  %6017 = vmatpush3.msra.mxu0 %v4871_v57  ;;  %v4919_v19 = vld [vmem:[%s10292_s5 + $0x4c8] sm:$0xff]  ;;  %v4952_v57 = vld [vmem:[%s10292_s5 + $0x5d0] sm:$0xff] }
 0x44e   : > { %5985 = vmatprep.subr.mxu1 %v4853_v52  ;;  %6018 = vmatprep.subr.mxu0 %v4886_v33  ;;  %v4903_v52 = vld [vmem:[%s10292_s5 + $0x448] sm:$0xff]  ;;  %v4936_v33 = vld [vmem:[%s10292_s5 + $0x550] sm:$0xff] }
 0x44f   : > { %5986 = vmatpush3.msra.mxu1 %v4837_v0  ;;  %6019 = vmatpush3.msra.mxu0 %v4870_v39  ;;  %v4918_v0 = vld [vmem:[%s10292_s5 + $0x4c0] sm:$0xff]  ;;  %v4951_v39 = vld [vmem:[%s10292_s5 + $0x5c8] sm:$0xff] }
 0x450   : > { %5987 = vmatprep.subr.mxu1 %v4852_v60  ;;  %6020 = vmatprep.subr.mxu0 %v4885_v36  ;;  %v4902_v60 = vld [vmem:[%s10292_s5 + $0x440] sm:$0xff]  ;;  %v4935_v36 = vld [vmem:[%s10292_s5 + $0x548] sm:$0xff] }
 0x451   : > { %5988 = vmatpush3.msra.mxu1 %v4836_v26  ;;  %6021 = vmatpush3.msra.mxu0 %v4869_v15  ;;  %v4917_v26 = vld [vmem:[%s10292_s5 + $0x4b8] sm:$0xff]  ;;  %v4950_v15 = vld [vmem:[%s10292_s5 + $0x5c0] sm:$0xff] }
 0x452   : > { %5989 = vmatprep.subr.mxu1 %v4851_v49  ;;  %6022 = vmatprep.subr.mxu0 %v4884_v2  ;;  %v4901_v49 = vld [vmem:[%s10292_s5 + $0x438] sm:$0xff]  ;;  %v4934_v2 = vld [vmem:[%s10292_s5 + $0x540] sm:$0xff] }
 0x453   : > { %5990 = vmatpush3.msra.mxu1 %v4835_v63  ;;  %6023 = vmatpush3.msra.mxu0 %v4868_v31  ;;  %v4916_v63 = vld [vmem:[%s10292_s5 + $0x4b0] sm:$0xff]  ;;  %v4949_v31 = vld [vmem:[%s10292_s5 + $0x5b8] sm:$0xff] }
 0x454   : > { %5991 = vmatprep.subr.mxu1 %v4850_v12  ;;  %6024 = vmatprep.subr.mxu0 %v4883_v43  ;;  %v4900_v12 = vld [vmem:[%s10292_s5 + $0x430] sm:$0xff]  ;;  %v4933_v43 = vld [vmem:[%s10292_s5 + $0x538] sm:$0xff] }
 0x455   : > { %5992 = vmatpush3.msra.mxu1 %v4834_v50  ;;  %6025 = vmatpush3.msra.mxu0 %v4867_v56  ;;  %v4915_v50 = vld [vmem:[%s10292_s5 + $0x4a8] sm:$0xff]  ;;  %v4948_v56 = vld [vmem:[%s10292_s5 + $0x5b0] sm:$0xff] }
 0x456   : > { %5993 = vmatprep.subr.mxu1 %v4849_v7  ;;  %6026 = vmatprep.subr.mxu0 %v4882_v38  ;;  %v4899_v7 = vld [vmem:[%s10292_s5 + $0x428] sm:$0xff]  ;;  %v4932_v38 = vld [vmem:[%s10292_s5 + $0x530] sm:$0xff] }
 0x457   : > { %5994 = vmatpush3.msra.mxu1 %v4833_v48  ;;  %6027 = vmatpush3.msra.mxu0 %v4866_v58  ;;  %v4914_v48 = vld [vmem:[%s10292_s5 + $0x4a0] sm:$0xff]  ;;  %v4947_v58 = vld [vmem:[%s10292_s5 + $0x5a8] sm:$0xff] }
 0x458   : > { %5995 = vmatprep.subr.mxu1 %v4848_v41  ;;  %6028 = vmatprep.subr.mxu0 %v4881_v13  ;;  %v4898_v41 = vld [vmem:[%s10292_s5 + $0x420] sm:$0xff]  ;;  %v4931_v13 = vld [vmem:[%s10292_s5 + $0x528] sm:$0xff] }
 0x459   : > { %5996 = vmatpush3.msra.mxu1 %v4832_v8  ;;  %6029 = vmatpush3.msra.mxu0 %v4865_v4  ;;  %v4913_v8 = vld [vmem:[%s10292_s5 + $0x498] sm:$0xff]  ;;  %v4946_v4 = vld [vmem:[%s10292_s5 + $0x5a0] sm:$0xff] }
 0x45a   : > { %5997 = vmatprep.subr.mxu1 %v4847_v6  ;;  %6030 = vmatprep.subr.mxu0 %v4880_v42  ;;  %v4897_v6 = vld [vmem:[%s10292_s5 + $0x418] sm:$0xff]  ;;  %v4930_v42 = vld [vmem:[%s10292_s5 + $0x520] sm:$0xff] }
 0x45b   : > { %5998 = vmatpush3.msra.mxu1 %v4831_v18  ;;  %6031 = vmatpush3.msra.mxu0 %v4864_v30  ;;  %v4912_v18 = vld [vmem:[%s10292_s5 + $0x490] sm:$0xff]  ;;  %v4945_v30 = vld [vmem:[%s10292_s5 + $0x598] sm:$0xff] }
 0x45c   : > { %5999 = vmatprep.subr.mxu1 %v4846_v16  ;;  %6032 = vmatprep.subr.mxu0 %v4879_v20  ;;  %v4896_v16 = vld [vmem:[%s10292_s5 + $0x410] sm:$0xff]  ;;  %v4929_v20 = vld [vmem:[%s10292_s5 + $0x518] sm:$0xff] }
 0x45d   : > { %6000 = vmatpush3.msra.mxu1 %v4830_v29  ;;  %6033 = vmatpush3.msra.mxu0 %v4863_v59  ;;  %v4911_v29 = vld [vmem:[%s10292_s5 + $0x488] sm:$0xff]  ;;  %v4944_v59 = vld [vmem:[%s10292_s5 + $0x590] sm:$0xff] }
 0x45e   : > { %5228 = vmatmul.mubr.f32.vlgmr.msra.gmra.mxu1 %v4742_v17  ;;  %6034 = vmatprep.subr.mxu0 %v4878_v5  ;;  %v4895_v5 = vld [vmem:[%s10292_s5 + $0x408] sm:$0xff]  ;;  %v4928_v17 = vld [vmem:[%s10292_s5 + $0x510] sm:$0xff] }
 0x45f   : > { %6039 = vmatprep.subr.mxu1 %v4925_v10  ;;  %6035 = vmatpush3.msra.mxu0 %v4862_v40  ;;  %v4910_v10 = vld [vmem:[%s10292_s5 + $0x480] sm:$0xff]  ;;  %v4943_v40 = vld [vmem:[%s10292_s5 + $0x588] sm:$0xff] }
 0x460   : > { %6040 = vmatpush3.msra.mxu1 %v4909_v3  ;;  %5367 = vmatprep.mubr.f32.mxu1 %v4751_v53  ;;  %v4894_v3 = vld [vmem:[%s10292_s5 + $0x400] sm:$0xff]  ;;  %v4927_v53 = vld [vmem:[%s10292_s5 + $0x508] sm:$0xff] }
 0x461   : > { %5298 = vmatmul.mubr.f32.vlgmr.msra.gmra.mxu0 %v4746_v1  ;;  %6041 = vmatprep.subr.mxu1 %v4924_v11  ;;  %v4942_v11 = vld [vmem:[%s10292_s5 + $0x580] sm:$0xff]  ;;  %v4750_v1 = vrot.slane %v9634_v51, 4 }
 0x462   : > { %6074 = vmatprep.subr.mxu0 %v4957_v32  ;;  %6042 = vmatpush3.msra.mxu1 %v4908_v21  ;;  %v4989_v32 = vld [vmem:[%s10292_s5 + $0x6f8] sm:$0xff]  ;;  %v4926_v21 = vld [vmem:[%s10292_s5 + $0x500] sm:$0xff] }
 0x463   : > { %6075 = vmatpush3.msra.mxu0 %v4941_v55  ;;  %5437 = vmatprep.mubr.f32.mxu0 %v4755_v34  ;;  %v4973_v55 = vld [vmem:[%s10292_s5 + $0x678] sm:$0xff]  ;;  %v4759_v34 = vrot.slane %v9637_v14, 6 }
 0x464   : > { %6043 = vmatprep.subr.mxu1 %v4923_v62  ;;  %6076 = vmatprep.subr.mxu0 %v4956_v24  ;;  %v4988_v62 = vld [vmem:[%s10292_s5 + $0x6f0] sm:$0xff]  ;;  %v4754_v24 = vrot.slane %v9634_v51, 5 }
 0x465   : > { %6044 = vmatpush3.msra.mxu1 %v4907_v23  ;;  %6077 = vmatpush3.msra.mxu0 %v4940_v37  ;;  %v5021_v23 = vld [vmem:[%s10292_s5 + $0x7f8] sm:$0xff]  ;;  %v4972_v37 = vld [vmem:[%s10292_s5 + $0x670] sm:$0xff] }
 0x466   : > { %6045 = vmatprep.subr.mxu1 %v4922_v45  ;;  %6078 = vmatprep.subr.mxu0 %v4955_v54  ;;  %v5005_v45 = vld [vmem:[%s10292_s5 + $0x778] sm:$0xff]  ;;  %v4763_v54 = vrot.slane %v9637_v14, 7  ;;  %v4986_v14 = vld [vmem:[%s10292_s5 + $0x6e0] sm:$0xff] }
 0x467   : > { %6046 = vmatpush3.msra.mxu1 %v4906_v47  ;;  %6079 = vmatpush3.msra.mxu0 %v4939_v44  ;;  %v4987_v47 = vld [vmem:[%s10292_s5 + $0x6e8] sm:$0xff]  ;;  %v5020_v44 = vld [vmem:[%s10292_s5 + $0x7f0] sm:$0xff] }
 0x468   : > { %6047 = vmatprep.subr.mxu1 %v4921_v25  ;;  %6080 = vmatprep.subr.mxu0 %v4954_v46  ;;  %v4971_v25 = vld [vmem:[%s10292_s5 + $0x668] sm:$0xff]  ;;  %v5004_v46 = vld [vmem:[%s10292_s5 + $0x770] sm:$0xff] }
 0x469   : > { %6048 = vmatpush3.msra.mxu1 %v4905_v27  ;;  %6081 = vmatpush3.msra.mxu0 %v4938_v22  ;;  %v5019_v27 = vld [vmem:[%s10292_s5 + $0x7e8] sm:$0xff]  ;;  %v4970_v22 = vld [vmem:[%s10292_s5 + $0x660] sm:$0xff] }
 0x46a   : > { %6049 = vmatprep.subr.mxu1 %v4920_v35  ;;  %6082 = vmatprep.subr.mxu0 %v4953_v28  ;;  %v5003_v35 = vld [vmem:[%s10292_s5 + $0x768] sm:$0xff]  ;;  %v4985_v28 = vld [vmem:[%s10292_s5 + $0x6d8] sm:$0xff] }
 0x46b   : > { %6050 = vmatpush3.msra.mxu1 %v4904_v61  ;;  %6083 = vmatpush3.msra.mxu0 %v4937_v9  ;;  %v5018_v61 = vld [vmem:[%s10292_s5 + $0x7e0] sm:$0xff]  ;;  %v4969_v9 = vld [vmem:[%s10292_s5 + $0x658] sm:$0xff] }
 0x46c   : > { %6051 = vmatprep.subr.mxu1 %v4919_v19  ;;  %6084 = vmatprep.subr.mxu0 %v4952_v57  ;;  %v5002_v19 = vld [vmem:[%s10292_s5 + $0x760] sm:$0xff]  ;;  %v4984_v57 = vld [vmem:[%s10292_s5 + $0x6d0] sm:$0xff] }
 0x46d   : > { %6052 = vmatpush3.msra.mxu1 %v4903_v52  ;;  %6085 = vmatpush3.msra.mxu0 %v4936_v33  ;;  %v5017_v52 = vld [vmem:[%s10292_s5 + $0x7d8] sm:$0xff]  ;;  %v4968_v33 = vld [vmem:[%s10292_s5 + $0x650] sm:$0xff] }
 0x46e   : > { %6053 = vmatprep.subr.mxu1 %v4918_v0  ;;  %6086 = vmatprep.subr.mxu0 %v4951_v39  ;;  %v5001_v0 = vld [vmem:[%s10292_s5 + $0x758] sm:$0xff]  ;;  %v4983_v39 = vld [vmem:[%s10292_s5 + $0x6c8] sm:$0xff] }
 0x46f   : > { %6054 = vmatpush3.msra.mxu1 %v4902_v60  ;;  %6087 = vmatpush3.msra.mxu0 %v4935_v36  ;;  %v5016_v60 = vld [vmem:[%s10292_s5 + $0x7d0] sm:$0xff]  ;;  %v4967_v36 = vld [vmem:[%s10292_s5 + $0x648] sm:$0xff] }
 0x470   : > { %6055 = vmatprep.subr.mxu1 %v4917_v26  ;;  %6088 = vmatprep.subr.mxu0 %v4950_v15  ;;  %v5000_v26 = vld [vmem:[%s10292_s5 + $0x750] sm:$0xff]  ;;  %v4982_v15 = vld [vmem:[%s10292_s5 + $0x6c0] sm:$0xff] }
 0x471   : > { %6056 = vmatpush3.msra.mxu1 %v4901_v49  ;;  %6089 = vmatpush3.msra.mxu0 %v4934_v2  ;;  %v5015_v49 = vld [vmem:[%s10292_s5 + $0x7c8] sm:$0xff]  ;;  %v4966_v2 = vld [vmem:[%s10292_s5 + $0x640] sm:$0xff] }
 0x472   : > { %6057 = vmatprep.subr.mxu1 %v4916_v63  ;;  %6090 = vmatprep.subr.mxu0 %v4949_v31  ;;  %v4999_v63 = vld [vmem:[%s10292_s5 + $0x748] sm:$0xff]  ;;  %v4981_v31 = vld [vmem:[%s10292_s5 + $0x6b8] sm:$0xff] }
 0x473   : > { %6058 = vmatpush3.msra.mxu1 %v4900_v12  ;;  %6091 = vmatpush3.msra.mxu0 %v4933_v43  ;;  %v5014_v12 = vld [vmem:[%s10292_s5 + $0x7c0] sm:$0xff]  ;;  %v4965_v43 = vld [vmem:[%s10292_s5 + $0x638] sm:$0xff] }
 0x474   : > { %6059 = vmatprep.subr.mxu1 %v4915_v50  ;;  %6092 = vmatprep.subr.mxu0 %v4948_v56  ;;  %v4998_v50 = vld [vmem:[%s10292_s5 + $0x740] sm:$0xff]  ;;  %v4980_v56 = vld [vmem:[%s10292_s5 + $0x6b0] sm:$0xff] }
 0x475   : > { %6060 = vmatpush3.msra.mxu1 %v4899_v7  ;;  %6093 = vmatpush3.msra.mxu0 %v4932_v38  ;;  %v5013_v7 = vld [vmem:[%s10292_s5 + $0x7b8] sm:$0xff]  ;;  %v4964_v38 = vld [vmem:[%s10292_s5 + $0x630] sm:$0xff] }
 0x476   : > { %6061 = vmatprep.subr.mxu1 %v4914_v48  ;;  %6094 = vmatprep.subr.mxu0 %v4947_v58  ;;  %v4997_v48 = vld [vmem:[%s10292_s5 + $0x738] sm:$0xff]  ;;  %v4979_v58 = vld [vmem:[%s10292_s5 + $0x6a8] sm:$0xff] }
 0x477   : > { %6062 = vmatpush3.msra.mxu1 %v4898_v41  ;;  %6095 = vmatpush3.msra.mxu0 %v4931_v13  ;;  %v5012_v41 = vld [vmem:[%s10292_s5 + $0x7b0] sm:$0xff]  ;;  %v4963_v13 = vld [vmem:[%s10292_s5 + $0x628] sm:$0xff] }
 0x478   : > { %6063 = vmatprep.subr.mxu1 %v4913_v8  ;;  %6096 = vmatprep.subr.mxu0 %v4946_v4  ;;  %v4996_v8 = vld [vmem:[%s10292_s5 + $0x730] sm:$0xff]  ;;  %v4978_v4 = vld [vmem:[%s10292_s5 + $0x6a0] sm:$0xff] }
 0x479   : > { %6064 = vmatpush3.msra.mxu1 %v4897_v6  ;;  %6097 = vmatpush3.msra.mxu0 %v4930_v42  ;;  %v5011_v6 = vld [vmem:[%s10292_s5 + $0x7a8] sm:$0xff]  ;;  %v4962_v42 = vld [vmem:[%s10292_s5 + $0x620] sm:$0xff] }
 0x47a   : > { %6065 = vmatprep.subr.mxu1 %v4912_v18  ;;  %6098 = vmatprep.subr.mxu0 %v4945_v30  ;;  %v4995_v18 = vld [vmem:[%s10292_s5 + $0x728] sm:$0xff]  ;;  %v4977_v30 = vld [vmem:[%s10292_s5 + $0x698] sm:$0xff] }
 0x47b   : > { %6066 = vmatpush3.msra.mxu1 %v4896_v16  ;;  %6099 = vmatpush3.msra.mxu0 %v4929_v20  ;;  %v5010_v16 = vld [vmem:[%s10292_s5 + $0x7a0] sm:$0xff]  ;;  %v4961_v20 = vld [vmem:[%s10292_s5 + $0x618] sm:$0xff] }
 0x47c   : > { %6067 = vmatprep.subr.mxu1 %v4911_v29  ;;  %6100 = vmatprep.subr.mxu0 %v4944_v59  ;;  %v4994_v29 = vld [vmem:[%s10292_s5 + $0x720] sm:$0xff]  ;;  %v4976_v59 = vld [vmem:[%s10292_s5 + $0x690] sm:$0xff] }
 0x47d   : > { %6068 = vmatpush3.msra.mxu1 %v4895_v5  ;;  %6101 = vmatpush3.msra.mxu0 %v4928_v17  ;;  %v5009_v5 = vld [vmem:[%s10292_s5 + $0x798] sm:$0xff]  ;;  %v4960_v17 = vld [vmem:[%s10292_s5 + $0x610] sm:$0xff] }
 0x47e   : > { %6069 = vmatprep.subr.mxu1 %v4910_v10  ;;  %6102 = vmatprep.subr.mxu0 %v4943_v40  ;;  %v4993_v10 = vld [vmem:[%s10292_s5 + $0x718] sm:$0xff]  ;;  %v4975_v40 = vld [vmem:[%s10292_s5 + $0x688] sm:$0xff] }
 0x47f   : > { %6070 = vmatpush3.msra.mxu1 %v4894_v3  ;;  %6103 = vmatpush3.msra.mxu0 %v4927_v53  ;;  %v5008_v3 = vld [vmem:[%s10292_s5 + $0x790] sm:$0xff]  ;;  %v4959_v53 = vld [vmem:[%s10292_s5 + $0x608] sm:$0xff] }
 0x480   : > { %5368 = vmatmul.mubr.f32.vlgmr.msra.gmra.mxu1 %v4750_v1  ;;  %6104 = vmatprep.subr.mxu0 %v4942_v11  ;;  %v4992_v11 = vld [vmem:[%s10292_s5 + $0x710] sm:$0xff]  ;;  %v4974_v1 = vld [vmem:[%s10292_s5 + $0x680] sm:$0xff] }
 0x481   : > { %6109 = vmatprep.subr.mxu1 %v4989_v32  ;;  %6105 = vmatpush3.msra.mxu0 %v4926_v21  ;;  %v5007_v32 = vld [vmem:[%s10292_s5 + $0x788] sm:$0xff]  ;;  %v4958_v21 = vld [vmem:[%s10292_s5 + $0x600] sm:$0xff] }
 0x482   : > { %6110 = vmatpush3.msra.mxu1 %v4973_v55  ;;  %5507 = vmatprep.mubr.f32.mxu1 %v4759_v34  ;;  %v4991_v55 = vld [vmem:[%s10292_s5 + $0x708] sm:$0xff]  ;;  %v5006_v34 = vld [vmem:[%s10292_s5 + $0x780] sm:$0xff] }
 0x483   : > { %5438 = vmatmul.mubr.f32.vlgmr.msra.gmra.mxu0 %v4754_v24  ;;  %6111 = vmatprep.subr.mxu1 %v4988_v62  ;;  %v4758_v62 = vrot.slane %v9634_v51, 6  ;;  %v4990_v24 = vld [vmem:[%s10292_s5 + $0x700] sm:$0xff] }
 0x484   : > { %6144 = vmatprep.subr.mxu0 %v5021_v23  ;;  %6112 = vmatpush3.msra.mxu1 %v4972_v37  ;;  %v4762_v23 = vrot.slane %v9634_v51, 7  ;;  %v10566_v37 = vmov 0.0   ;;  %v5585_v51 = vld [vmem:[%s10294_s7 + $0x8] sm:$0xff] }
 0x485   : > { %6145 = vmatpush3.msra.mxu0 %v5005_v45  ;;  %5577 = vmatprep.mubr.f32.mxu0 %v4763_v54  ;;  %v5587_v45 = vld [vmem:[%s10294_s7 + $0x18] sm:$0xff]  ;;  %v5586_v54 = vld [vmem:[%s10294_s7 + $0x10] sm:$0xff] }
 0x486   : > { %6113 = vmatprep.subr.mxu1 %v4987_v47  ;;  %6146 = vmatprep.subr.mxu0 %v5020_v44  ;;  %v5584_v47 = vld [vmem:[%s10294_s7] sm:$0xff] }
 0x487   : > { %6114 = vmatpush3.msra.mxu1 %v4971_v25  ;;  %6147 = vmatpush3.msra.mxu0 %v5004_v46 }
 0x488   : > { %6115 = vmatprep.subr.mxu1 %v4986_v14  ;;  %6148 = vmatprep.subr.mxu0 %v5019_v27 }
 0x489   : > { %6116 = vmatpush3.msra.mxu1 %v4970_v22  ;;  %6149 = vmatpush3.msra.mxu0 %v5003_v35  ;;  %v5022_v22 = vld [vmem:[%s10293_s6] sm:$0x1] }
 0x48a   : > { %6117 = vmatprep.subr.mxu1 %v4985_v28  ;;  %6150 = vmatprep.subr.mxu0 %v5018_v61 }
 0x48b   : > { %6118 = vmatpush3.msra.mxu1 %v4969_v9  ;;  %6151 = vmatpush3.msra.mxu0 %v5002_v19 }
 0x48c   : > { %6119 = vmatprep.subr.mxu1 %v4984_v57  ;;  %6152 = vmatprep.subr.mxu0 %v5017_v52 }
 0x48d   : > { %6120 = vmatpush3.msra.mxu1 %v4968_v33  ;;  %6153 = vmatpush3.msra.mxu0 %v5001_v0 }
 0x48e   : > { %6121 = vmatprep.subr.mxu1 %v4983_v39  ;;  %6154 = vmatprep.subr.mxu0 %v5016_v60 }
 0x48f   : > { %6122 = vmatpush3.msra.mxu1 %v4967_v36  ;;  %6155 = vmatpush3.msra.mxu0 %v5000_v26 }
 0x490   : > { %6123 = vmatprep.subr.mxu1 %v4982_v15  ;;  %6156 = vmatprep.subr.mxu0 %v5015_v49 }
 0x491   : > { %6124 = vmatpush3.msra.mxu1 %v4966_v2  ;;  %6157 = vmatpush3.msra.mxu0 %v4999_v63 }
 0x492   : > { %6125 = vmatprep.subr.mxu1 %v4981_v31  ;;  %6158 = vmatprep.subr.mxu0 %v5014_v12 }
 0x493   : > { %6126 = vmatpush3.msra.mxu1 %v4965_v43  ;;  %6159 = vmatpush3.msra.mxu0 %v4998_v50 }
 0x494   : > { %6127 = vmatprep.subr.mxu1 %v4980_v56  ;;  %6160 = vmatprep.subr.mxu0 %v5013_v7 }
 0x495   : > { %6128 = vmatpush3.msra.mxu1 %v4964_v38  ;;  %6161 = vmatpush3.msra.mxu0 %v4997_v48 }
 0x496   : > { %6129 = vmatprep.subr.mxu1 %v4979_v58  ;;  %6162 = vmatprep.subr.mxu0 %v5012_v41 }
 0x497   : > { %6130 = vmatpush3.msra.mxu1 %v4963_v13  ;;  %6163 = vmatpush3.msra.mxu0 %v4996_v8  ;;  %v5588_v8 = vld [vmem:[%s10295_s8] sm:$0x1] }
 0x498   : > { %6131 = vmatprep.subr.mxu1 %v4978_v4  ;;  %6164 = vmatprep.subr.mxu0 %v5011_v6 }
 0x499   : > { %6132 = vmatpush3.msra.mxu1 %v4962_v42  ;;  %6165 = vmatpush3.msra.mxu0 %v4995_v18 }
 0x49a   : > { %6133 = vmatprep.subr.mxu1 %v4977_v30  ;;  %6166 = vmatprep.subr.mxu0 %v5010_v16 }
 0x49b   : > { %6134 = vmatpush3.msra.mxu1 %v4961_v20  ;;  %6167 = vmatpush3.msra.mxu0 %v4994_v29 }
 0x49c   : > { %6135 = vmatprep.subr.mxu1 %v4976_v59  ;;  %6168 = vmatprep.subr.mxu0 %v5009_v5 }
 0x49d   : > { %6136 = vmatpush3.msra.mxu1 %v4960_v17  ;;  %6169 = vmatpush3.msra.mxu0 %v4993_v10 }
 0x49e   : > { %6137 = vmatprep.subr.mxu1 %v4975_v40  ;;  %6170 = vmatprep.subr.mxu0 %v5008_v3 }
 0x49f   : > { %6138 = vmatpush3.msra.mxu1 %v4959_v53  ;;  %6171 = vmatpush3.msra.mxu0 %v4992_v11 }
 0x4a0   : > { %6139 = vmatprep.subr.mxu1 %v4974_v1  ;;  %6172 = vmatprep.subr.mxu0 %v5007_v32 }
 0x4a1   : > { %6140 = vmatpush3.msra.mxu1 %v4958_v21  ;;  %6173 = vmatpush3.msra.mxu0 %v4991_v55 }
 0x4a2   : > { %5508 = vmatmul.mubr.f32.vlgmr.msra.gmra.mxu1 %v4758_v62  ;;  %6174 = vmatprep.subr.mxu0 %v5006_v34 }
 0x4a3   : > { %6175 = vmatpush3.msra.mxu0 %v4990_v24  ;;  %6275 = vmatprep.subr.mxu1 %v10566_v37 }
 0x4a4   : > { %5578 = vmatmul.mubr.f32.vlgmr.msra.gmra.mxu0 %v4762_v23  ;;  %6283 = vmatprep.mubr.msk.f32.mxu1 %vm6419_vm0, %v10566_v37  ;;  %vm5662_vm0 = vcmask 73728  }
 0x4a5   : > { %6276 = vmatpush3.msra.mxu1 %v5587_v45 }
 0x4a6   : > { %6277 = vmatprep.subr.mxu1 %v10566_v37 }
 0x4a7   : > { %6278 = vmatpush3.msra.mxu1 %v5586_v54 }
 0x4a8   : > { %6279 = vmatprep.subr.mxu1 %v10566_v37 }
 0x4a9   : > { %6280 = vmatpush3.msra.mxu1 %v5585_v51 }
 0x4aa   : > { %6281 = vmatprep.subr.mxu1 %v10566_v37 }
 0x4ab   : > { %6282 = vmatpush3.msra.mxu1 %v5584_v47 }
 0x4fd   : > { %v5931_v44 = vpop.f32.mrf.mxu1 }
 0x4ff   : > { %v5932_v25 = vpop.f32.mrf.mxu1 }
 0x500   : > { %v5966_v46 = vpop.f32.mrf.mxu0  ;;  %v5933_v27 = vadd.f32 %v5932_v25, %v5931_v44 }
 0x502   : > { %v5967_v35 = vpop.f32.mrf.mxu0  ;;  %v5090_v9 = vadd.f32 %v5933_v27, %v5022_v22 }
 0x503   : > { %v5968_v19 = vadd.f32 %v5967_v35, %v5966_v46 }
 0x505   : > { %v5160_v0 = vadd.f32 %v5968_v19, %v5090_v9 }
 0x51e   : > { %v6001_v14 = vpop.f32.mrf.mxu1 }
 0x520   : > { %v6002_v28 = vpop.f32.mrf.mxu1 }
 0x521   : > { %v6036_v61 = vpop.f32.mrf.mxu0  ;;  %v6003_v52 = vadd.f32 %v6002_v28, %v6001_v14 }
 0x523   : > { %v6037_v33 = vpop.f32.mrf.mxu0  ;;  %v5230_v36 = vadd.f32 %v6003_v52, %v5160_v0 }
 0x524   : > { %v6038_v26 = vadd.f32 %v6037_v33, %v6036_v61 }
 0x526   : > { %v5300_v2 = vadd.f32 %v6038_v26, %v5230_v36 }
 0x540   : > { %v6071_v57 = vpop.f32.mrf.mxu1 }
 0x542   : > { %v6072_v39 = vpop.f32.mrf.mxu1 }
 0x543   : > { %v6106_v60 = vpop.f32.mrf.mxu0  ;;  %v6073_v15 = vadd.f32 %v6072_v39, %v6071_v57 }
 0x545   : > { %v6107_v49 = vpop.f32.mrf.mxu0  ;;  %v5370_v63 = vadd.f32 %v6073_v15, %v5300_v2 }
 0x546   : > { %v6108_v31 = vadd.f32 %v6107_v49, %v6106_v60 }
 0x548   : > { %v5440_v56 = vadd.f32 %v6108_v31, %v5370_v63 }
 0x562   : > { %v6141_v12 = vpop.f32.mrf.mxu1 }
 0x564   : > { %v6142_v43 = vpop.f32.mrf.mxu1  ;;  %v6176_v50 = vpop.f32.mrf.mxu0 }
 0x565   : > { %v6143_v7 = vadd.f32 %v6142_v43, %v6141_v12 }
 0x566   : > { %v6177_v38 = vpop.f32.mrf.mxu0 }
 0x567   : > { %v5510_v48 = vadd.f32 %v6143_v7, %v5440_v56  ;;  %v6178_v58 = vadd.f32 %v6177_v38, %v6176_v50 }
 0x569   : > { %v5580_v41 = vadd.f32 %v6178_v58, %v5510_v48 }
 0x56b   : > { %v5583_v13 = vmax.f32 %v5580_v41, 0.0 }
 0x56d   : > { %6284 = vmatmul.mubr.msk.f32.vlgmr.msra.gmra.mxu1 %vm3325_vm11, %v5583_v13 }
 0x62d   : > { %v5658_v4 = vpop.f32.mrf.mxu1 }
 0x62e   : > { %v5659_v6 = vadd.f32 %v5658_v4, %v5588_v8 }
 0x62f   : > { %v6285_v42 = vpop.f32.mrf.mxu1 }
 0x630   : > { %v5663_v18 = vsel %vm5662_vm0, %v5659_v6, -inf }
 0x631   : > { %5664 = vmax.xlane.f32.xlu1 %v5663_v18 }
 0x6ba   : > { %v5665_v30 = vpop.xlane.xlu1 %5664 }
 0x6bb   : > { %v5666_v16 = vsub.f32 %v5659_v6, %v5665_v30 }
 0x6bd   : > { %v5667_v20 = vmul.f32 1.442695, %v5666_v16 }
 0x6bf   : > { %6351 = vpow2.f32 %v5667_v20 }
 0x6cc   : > { %v6352_v29 = vpop.eup %6351 }
 0x6cd   : > { %v5669_v59 = vsel %vm5662_vm0, %v6352_v29, 0.0 }
 0x6ce   : > { %5670 = vadd.xlane.f32.xlu0 %v5669_v59 }
 0x757   : > { %v5671_v5 = vpop.xlane.xlu0 %5670 }
 0x758   : > { %6353 = vlog2.f32 %v5671_v5 }
 0x765   : > { %v6354_v17 = vpop.eup %6353 }
 0x766   : > { %v5673_v10 = vmul.f32 0.6931472, %v6354_v17 }
 0x768   : > { %v5674_v40 = vadd.f32 %v5673_v10, %v5665_v30 }
 0x76a   : > { %v5675_v3 = vsub.f32 %v5659_v6, %v5674_v40 }
 0x76c   : > { %5676 = vst.msk [vmem:[%s324_s23] sm:$0x1] %vm5662_vm0, %v5675_v3 }
 0x76d   : > { %6369 = shalt.err (!%p6366_p3)
}
 0x76e   : > { %s6370_s25 = scalar_lea.hbm %s5688_s26, 16  ;;  %s6374_s23 = scalar_lea.hbm %s10296_s9, 32 }
 0x76f   : > { %p6371_p4 = scmp.ne.s32.totalorder %s5688_s26, %s6370_s25  ;;  %p6375_p9 = scmp.lt.s32.totalorder %s5688_s26, %s10296_s9 }
 0x770   : > { %p6376_p10 = scmp.lt.s32.totalorder %s6374_s23, %s6370_s25 }
 0x771   : > { %p6372_p7 = pnand %p6371_p4, %p6517_p5 }
 0x772   : > { %p6377_p11 = por %p6376_p10, %p6375_p9 }
 0x773   : > { %p6373_p8 = pneg %p6372_p7 }
 0x775   : > { %p6378_p12 = pnand %p6377_p11, %p6373_p8 }
 0x777   : > { %6381 = shalt.err (!%p6378_p12)
}
 0x778   : > { %6287 = dma.vmem_to_hbm [thread:$0]  (%p6517_p5), %s5691_s22, 16, %s5688_s26, %s5678_s27  }
 0x779 PF: > { %p6293_p13 = scmp.ge.s32.totalorder %s6416_s12, 2  ;;  %s5702_s29 = sand.u32 1, %s6404_s30  }
 0x77a   : > { %s5703_s14 = scalar_lea.sflag [#allocation3], %s5702_s29 }
 0x77b   : > { %p6290_p0 = pnand %p6293_p13, %p6521_p6 }
 0x77d   : > { %p6291_p1 = pneg %p6290_p0 }
 0x77f   : > { %6399 = dma.done.wait (%p6291_p1), %s5703_s14, 16  }
 0x780   : > { %6401 = vsyncadd (%p6291_p1), %s5703_s14, 4294967280  ;;  %p19_p2 = scmp.ge.s32.totalorder %s6504_s15, 4   ;;  %s10567_s30 = smov %s6408_s10 }
 0x781   : > { %s10568_s10 = smov %s6412_s11  ;;  %s10569_s11 = smov %s6515_s18 }
 0x782   : > { %s10570_s12 = smov %s6504_s15  ;;  %21 = sbr.rel (!%p19_p2) target bundleno = 3 (0x3), region = 91 }
 0x787   :  { %5707 = vsyncpa [#allocation3], 1 }
 0x788   :  { %5709 = vsyncpa [#allocation3 + $0x1], 1 }

</bundles_post_ra>
